<compile_context>
chip_gen: v7x
topology: tpu7x:2x2x1
jax: 0.10.0
libtpu: 0.0.40
codegen_flags: <defaults>
</compile_context>

<pallas_src>
import functools

import jax
import jax.numpy as jnp
import numpy as np
from jax.experimental import pallas as pl
from jax.experimental.pallas import tpu as pltpu

NEG_SLOPE = 0.2          # LeakyReLU slope used throughout the model
IN_EPS = 1e-5            # nn.InstanceNorm2d default eps
LANE = 128


def _round_up(x, m):
    return ((x + m - 1) // m) * m


# ---------------------------------------------------------------------------
# Fused Conv2d (+bias) (+InstanceNorm2d affine=False) (+LeakyReLU 0.2) kernel.
# Implicit GEMM over a stride-1-equivalent, spatially-flattened input.
# ---------------------------------------------------------------------------

def _conv_block_kernel(x_ref, w_ref, b_ref, o_ref, *,
                       tap_offsets, m_rows, row_len, valid_cols,
                       use_bias, use_in, apply_lrelu):
    # x_ref: (1, HWp, Cs)        bf16  flattened (stride-1 equiv.) input, 1 sample
    # w_ref: (T,  Cs, co_blk)    bf16  per-tap weights
    # b_ref: (1,  co_blk)        f32   bias (zeros for bias-free convs)
    # o_ref: (1, m_rows, co_blk)       output rows = Ho * Ws (junk cols are
    #                                  sliced off by the wrapper)
    co_blk = o_ref.shape[-1]
    acc = jnp.zeros((m_rows, co_blk), jnp.float32)
    for t, off in enumerate(tap_offsets):            # static unroll over taps
        lhs = x_ref[0, off:off + m_rows, :].astype(jnp.bfloat16)
        acc = acc + jnp.dot(lhs, w_ref[t], preferred_element_type=jnp.float32)
    if use_bias:
        acc = acc + b_ref[...]

    if use_in:
        # InstanceNorm2d(affine=False): biased mean/var per (sample, channel)
        # over the Ho*Wo valid positions; mask the Ws-Wo wrap-around junk
        # columns of the implicit-GEMM layout before reducing.
        col = jax.lax.broadcasted_iota(jnp.int32, (m_rows, 1), 0) % row_len
        valid = (col < valid_cols).astype(jnp.float32)
        inv_count = 1.0 / float((m_rows // row_len) * valid_cols)
        mean = jnp.sum(acc * valid, axis=0, keepdims=True) * inv_count
        cent = (acc - mean) * valid
        var = jnp.sum(cent * cent, axis=0, keepdims=True) * inv_count
        acc = (acc - mean) * jax.lax.rsqrt(var + IN_EPS)

    if apply_lrelu:
        acc = jnp.where(acc >= 0, acc, NEG_SLOPE * acc)

    o_ref[0, :, :] = acc.astype(o_ref.dtype)


def conv_block(x, w, b, *, kernel_size, stride, padding,
               use_bias, use_in, apply_lrelu, out_dtype=jnp.bfloat16):
    """Fused Conv2d(+bias)(+InstanceNorm2d(affine=False))(+LeakyReLU(0.2)).

    x: (N, H, W, Cin) NHWC;  w: (k, k, Cin, Cout);  b: (Cout,)
    returns (N, Ho, Wo, Cout) in `out_dtype` with PyTorch Conv2d geometry.
    """
    n, h, wdt, cin = x.shape
    k = kernel_size
    ph, pw = padding
    cout = w.shape[-1]
    ho = (h + 2 * ph - k) // stride + 1
    wo = (wdt + 2 * pw - k) // stride + 1

    xp = jnp.pad(x, ((0, 0), (ph, ph), (pw, pw), (0, 0)))
    if stride == 2:
        # Space-to-depth: a k=4, s=2 conv over (Hp, Wp, Cin) becomes a k=2,
        # s=1 conv over (Hp/2, Wp/2, 4*Cin).  Pure relayout, no amplification.
        hp, wp = xp.shape[1], xp.shape[2]
        xp = jnp.pad(xp, ((0, 0), (0, hp % 2), (0, wp % 2), (0, 0)))
        hp, wp = xp.shape[1], xp.shape[2]
        xs = xp.reshape(n, hp // 2, 2, wp // 2, 2, cin)
        xs = xs.transpose(0, 1, 3, 2, 4, 5).reshape(n, hp // 2, wp // 2, 4 * cin)
        # w[2*qi+ri, 2*qj+rj, c, co] -> w_taps[qi*2+qj, (2*ri+rj)*Cin + c, co]
        w_taps = (w.reshape(2, 2, 2, 2, cin, cout)
                   .transpose(0, 2, 1, 3, 4, 5)
                   .reshape(4, 4 * cin, cout))
        ks = 2
    elif stride == 1:
        xs = xp
        w_taps = w.reshape(k * k, cin, cout)
        ks = k
    else:
        raise NotImplementedError("stride must be 1 or 2")

    _, hs, ws_len, cs = xs.shape
    m_rows = ho * ws_len          # compute Ho x Ws positions; the Ws-Wo
                                  # wrap-around columns are junk, sliced below.
    taps = ks * ks
    tap_offsets = tuple(i * ws_len + j for i in range(ks) for j in range(ks))

    # Flatten spatial; pad (ks-1) rows so the last tap's slice stays in bounds.
    # Activations are fed to the MXU in bf16 either way, so store them bf16.
    x_flat = xs.reshape(n, hs * ws_len, cs).astype(jnp.bfloat16)
    x_flat = jnp.pad(x_flat, ((0, 0), (0, ks - 1), (0, 0)))
    hwp = x_flat.shape[1]

    # Lane-dense C_out: pad to a multiple of 128 (also for the final 1-channel
    # conv) so output stores are full-lane, unmasked vst's.
    co_pad = _round_up(cout, LANE)
    co_blk = 256 if co_pad % 256 == 0 else LANE
    w_taps = jnp.pad(w_taps, ((0, 0), (0, 0), (0, co_pad - cout))).astype(jnp.bfloat16)
    b_pad = jnp.pad(b.reshape(1, cout), ((0, 0), (0, co_pad - cout))).astype(jnp.float32)

    kernel = functools.partial(
        _conv_block_kernel,
        tap_offsets=tap_offsets, m_rows=m_rows, row_len=ws_len, valid_cols=wo,
        use_bias=use_bias, use_in=use_in, apply_lrelu=apply_lrelu)

    grid = (n, co_pad // co_blk)
    out_itemsize = jnp.dtype(out_dtype).itemsize
    flops = 2 * n * m_rows * cs * taps * co_pad
    bytes_accessed = (x_flat.size * x_flat.dtype.itemsize
                      + w_taps.size * w_taps.dtype.itemsize
                      + b_pad.size * b_pad.dtype.itemsize
                      + n * m_rows * co_pad * out_itemsize)

    out = pl.pallas_call(
        kernel,
        out_shape=jax.ShapeDtypeStruct((n, m_rows, co_pad), out_dtype),
        grid=grid,
        in_specs=[
            pl.BlockSpec((1, hwp, cs), lambda ni, ci: (ni, 0, 0)),       # resident across ci
            pl.BlockSpec((taps, cs, co_blk), lambda ni, ci: (0, 0, ci)),
            pl.BlockSpec((1, co_blk), lambda ni, ci: (0, ci)),
        ],
        out_specs=pl.BlockSpec((1, m_rows, co_blk), lambda ni, ci: (ni, 0, ci)),
        compiler_params=pltpu.CompilerParams(
            dimension_semantics=("parallel", "parallel"),
            vmem_limit_bytes=48 * 1024 * 1024,
        ),
        cost_estimate=pl.CostEstimate(
            flops=flops,
            transcendentals=n * co_pad if use_in else 0,
            bytes_accessed=bytes_accessed),
    )(x_flat, w_taps, b_pad)

    # Drop the implicit-GEMM junk columns and the padded output channels.
    return out.reshape(n, ho, ws_len, co_pad)[:, :, :wo, :cout]


# ------------------------------- model glue --------------------------------

def layer_configs(dim):
    # mirrors Discriminator.__init__ (dim=64 in the reference)
    return [
        dict(cin=3,       cout=dim,     k=4, stride=2, pad=(1, 1), bias=True,  use_in=False, lrelu=True),
        dict(cin=dim,     cout=dim * 2, k=4, stride=2, pad=(1, 1), bias=False, use_in=True,  lrelu=True),
        dict(cin=dim * 2, cout=dim * 4, k=4, stride=2, pad=(1, 1), bias=False, use_in=True,  lrelu=True),
        dict(cin=dim * 4, cout=dim * 8, k=4, stride=1, pad=(1, 2), bias=False, use_in=True,  lrelu=True),
        dict(cin=dim * 8, cout=1,       k=4, stride=1, pad=(2, 1), bias=True,  use_in=False, lrelu=False),
    ]


def init_params(key, dim):
    params = []
    for cfg in layer_configs(dim):
        key, wk, bk = jax.random.split(key, 3)
        w = 0.05 * jax.random.normal(
            wk, (cfg["k"], cfg["k"], cfg["cin"], cfg["cout"]), jnp.float32)
        if cfg["bias"]:
            b = 0.05 * jax.random.normal(bk, (cfg["cout"],), jnp.float32)
        else:
            b = jnp.zeros((cfg["cout"],), jnp.float32)
        params.append((w, b))
    return params


def discriminator_forward(x_nchw, params, dim):
    """Equivalent of Discriminator.forward(x, layers=[]) (default path)."""
    cfgs = layer_configs(dim)
    x = jnp.transpose(x_nchw, (0, 2, 3, 1))                       # NCHW -> NHWC
    for li, ((w, b), cfg) in enumerate(zip(params, cfgs)):
        last = li == len(cfgs) - 1
        x = conv_block(x, w, b,
                       kernel_size=cfg["k"], stride=cfg["stride"],
                       padding=cfg["pad"], use_bias=cfg["bias"],
                       use_in=cfg["use_in"], apply_lrelu=cfg["lrelu"],
                       out_dtype=jnp.float32 if last else jnp.bfloat16)
    return jnp.transpose(x, (0, 3, 1, 2))                         # NHWC -> NCHW


# ----------------------- pure-JAX numerical reference -----------------------

def _ref_conv_block(x, w, b, *, stride, padding, use_bias, use_in,
                    apply_lrelu, out_dtype):
    # Mirrors the kernel's numerics: bf16 operands, f32 accumulation/epilogue.
    y = jax.lax.conv_general_dilated(
        x.astype(jnp.bfloat16), w.astype(jnp.bfloat16),
        window_strides=(stride, stride),
        padding=[(padding[0], padding[0]), (padding[1], padding[1])],
        dimension_numbers=("NHWC", "HWIO", "NHWC"),
        preferred_element_type=jnp.float32)
    if use_bias:
        y = y + b.astype(jnp.float32)
    if use_in:
        mean = jnp.mean(y, axis=(1, 2), keepdims=True)
        var = jnp.mean(jnp.square(y - mean), axis=(1, 2), keepdims=True)
        y = (y - mean) * jax.lax.rsqrt(var + IN_EPS)
    if apply_lrelu:
        y = jnp.where(y >= 0, y, NEG_SLOPE * y)
    return y.astype(out_dtype)


def discriminator_reference(x_nchw, params, dim):
    cfgs = layer_configs(dim)
    x = jnp.transpose(x_nchw, (0, 2, 3, 1))
    for li, ((w, b), cfg) in enumerate(zip(params, cfgs)):
        last = li == len(cfgs) - 1
        x = _ref_conv_block(x, w, b, stride=cfg["stride"], padding=cfg["pad"],
                            use_bias=cfg["bias"], use_in=cfg["use_in"],
                            apply_lrelu=cfg["lrelu"],
                            out_dtype=jnp.float32 if last else jnp.bfloat16)
    return jnp.transpose(x, (0, 3, 1, 2))


if __name__ == "__main__":
    key = jax.random.PRNGKey(0)
    xkey, pkey = jax.random.split(key)

    dim = 8                                   # small stand-in for default dim=64
    x = jax.random.normal(xkey, (2, 3, 32, 32), jnp.float32)      # NCHW like PyTorch
    params = init_params(pkey, dim)

    fwd = jax.jit(lambda inp: discriminator_forward(inp, params, dim))
    out = fwd(x)
    jax.block_until_ready(out)

    # 32 -> 16 -> 8 -> 4 -> (3,5) -> (4,4), 1 output channel
    assert out.shape == (2, 1, 4, 4), out.shape
    assert out.dtype == jnp.float32

    ref = discriminator_reference(x, params, dim)
    np.testing.assert_allclose(np.asarray(out), np.asarray(ref),
                               atol=2e-2, rtol=2e-2)
    print("KERNEL_OK")
</pallas_src>

<mosaic_0001>
module attributes {stable_mosaic.version = 11 : i64} {
  func.func @_conv_block_kernel(%arg0: i32, %arg1: i32, %arg2: memref<1x290x12xbf16, #tpu.memory_space<vmem>>, %arg3: memref<4x12x128xbf16, #tpu.memory_space<vmem>>, %arg4: memref<1x128xf32, #tpu.memory_space<vmem>>, %arg5: memref<1x272x128xbf16, #tpu.memory_space<vmem>>) attributes {dimension_semantics = [#tpu.dimension_semantics<parallel>, #tpu.dimension_semantics<parallel>], iteration_bounds = array<i64: 2, 1>, scalar_prefetch = 0 : i64, scratch_operands = 0 : i64, tpu.core_type = #tpu.core_type<tc>, window_params = [{transform_indices = @transform_0, window_bounds = array<i64: 1, 290, 12>}, {transform_indices = @transform_1, window_bounds = array<i64: 4, 12, 128>}, {transform_indices = @transform_2, window_bounds = array<i64: 1, 128>}, {transform_indices = @transform_3, window_bounds = array<i64: 1, 272, 128>}]} {
    %cst = arith.constant 0.000000e+00 : f32
    %0 = vector.broadcast %cst : f32 to vector<272x128xf32>
    %c0 = arith.constant 0 : index
    %c0_0 = arith.constant 0 : index
    %c0_1 = arith.constant 0 : index
    %1 = vector.load %arg2[%c0, %c0_0, %c0_1] : memref<1x290x12xbf16, #tpu.memory_space<vmem>>, vector<1x272x12xbf16>
    %2 = vector.shape_cast %1 : vector<1x272x12xbf16> to vector<272x12xbf16>
    %c0_2 = arith.constant 0 : index
    %c0_3 = arith.constant 0 : index
    %c0_4 = arith.constant 0 : index
    %3 = vector.load %arg3[%c0_2, %c0_3, %c0_4] : memref<4x12x128xbf16, #tpu.memory_space<vmem>>, vector<1x12x128xbf16>
    %4 = vector.shape_cast %3 : vector<1x12x128xbf16> to vector<12x128xbf16>
    %cst_5 = arith.constant dense<0.000000e+00> : vector<272x128xf32>
    %5 = tpu.matmul %2, %4, %cst_5 {dimension_numbers = #tpu.dot_dimension_numbers<[1], [0], [0], [1], [0, 0, 1, 1], [], []>} : vector<272x12xbf16>, vector<12x128xbf16>, vector<272x128xf32> -> vector<272x128xf32>
    %6 = arith.addf %0, %5 : vector<272x128xf32>
    %c0_6 = arith.constant 0 : index
    %c1 = arith.constant 1 : index
    %c0_7 = arith.constant 0 : index
    %7 = vector.load %arg2[%c0_6, %c1, %c0_7] : memref<1x290x12xbf16, #tpu.memory_space<vmem>>, vector<1x272x12xbf16>
    %8 = vector.shape_cast %7 : vector<1x272x12xbf16> to vector<272x12xbf16>
    %c1_8 = arith.constant 1 : index
    %c0_9 = arith.constant 0 : index
    %c0_10 = arith.constant 0 : index
    %9 = vector.load %arg3[%c1_8, %c0_9, %c0_10] : memref<4x12x128xbf16, #tpu.memory_space<vmem>>, vector<1x12x128xbf16>
    %10 = vector.shape_cast %9 : vector<1x12x128xbf16> to vector<12x128xbf16>
    %cst_11 = arith.constant dense<0.000000e+00> : vector<272x128xf32>
    %11 = tpu.matmul %8, %10, %cst_11 {dimension_numbers = #tpu.dot_dimension_numbers<[1], [0], [0], [1], [0, 0, 1, 1], [], []>} : vector<272x12xbf16>, vector<12x128xbf16>, vector<272x128xf32> -> vector<272x128xf32>
    %12 = arith.addf %6, %11 : vector<272x128xf32>
    %c0_12 = arith.constant 0 : index
    %c17 = arith.constant 17 : index
    %c0_13 = arith.constant 0 : index
    %13 = vector.load %arg2[%c0_12, %c17, %c0_13] : memref<1x290x12xbf16, #tpu.memory_space<vmem>>, vector<1x272x12xbf16>
    %14 = vector.shape_cast %13 : vector<1x272x12xbf16> to vector<272x12xbf16>
    %c2 = arith.constant 2 : index
    %c0_14 = arith.constant 0 : index
    %c0_15 = arith.constant 0 : index
    %15 = vector.load %arg3[%c2, %c0_14, %c0_15] : memref<4x12x128xbf16, #tpu.memory_space<vmem>>, vector<1x12x128xbf16>
    %16 = vector.shape_cast %15 : vector<1x12x128xbf16> to vector<12x128xbf16>
    %cst_16 = arith.constant dense<0.000000e+00> : vector<272x128xf32>
    %17 = tpu.matmul %14, %16, %cst_16 {dimension_numbers = #tpu.dot_dimension_numbers<[1], [0], [0], [1], [0, 0, 1, 1], [], []>} : vector<272x12xbf16>, vector<12x128xbf16>, vector<272x128xf32> -> vector<272x128xf32>
    %18 = arith.addf %12, %17 : vector<272x128xf32>
    %c0_17 = arith.constant 0 : index
    %c18 = arith.constant 18 : index
    %c0_18 = arith.constant 0 : index
    %19 = vector.load %arg2[%c0_17, %c18, %c0_18] : memref<1x290x12xbf16, #tpu.memory_space<vmem>>, vector<1x272x12xbf16>
    %20 = vector.shape_cast %19 : vector<1x272x12xbf16> to vector<272x12xbf16>
    %c3 = arith.constant 3 : index
    %c0_19 = arith.constant 0 : index
    %c0_20 = arith.constant 0 : index
    %21 = vector.load %arg3[%c3, %c0_19, %c0_20] : memref<4x12x128xbf16, #tpu.memory_space<vmem>>, vector<1x12x128xbf16>
    %22 = vector.shape_cast %21 : vector<1x12x128xbf16> to vector<12x128xbf16>
    %cst_21 = arith.constant dense<0.000000e+00> : vector<272x128xf32>
    %23 = tpu.matmul %20, %22, %cst_21 {dimension_numbers = #tpu.dot_dimension_numbers<[1], [0], [0], [1], [0, 0, 1, 1], [], []>} : vector<272x12xbf16>, vector<12x128xbf16>, vector<272x128xf32> -> vector<272x128xf32>
    %24 = arith.addf %18, %23 : vector<272x128xf32>
    %c0_22 = arith.constant 0 : index
    %c0_23 = arith.constant 0 : index
    %25 = vector.load %arg4[%c0_22, %c0_23] : memref<1x128xf32, #tpu.memory_space<vmem>>, vector<1x128xf32>
    %26 = vector.broadcast %25 : vector<1x128xf32> to vector<272x128xf32>
    %27 = arith.addf %24, %26 : vector<272x128xf32>
    %cst_24 = arith.constant 0.000000e+00 : f32
    %28 = vector.broadcast %cst_24 : f32 to vector<272x128xf32>
    %29 = arith.cmpf oge, %27, %28 : vector<272x128xf32>
    %cst_25 = arith.constant 2.000000e-01 : f32
    %30 = vector.broadcast %cst_25 : f32 to vector<272x128xf32>
    %31 = arith.mulf %30, %27 : vector<272x128xf32>
    %32 = arith.select %29, %27, %31 : vector<272x128xi1>, vector<272x128xf32>
    %33 = arith.truncf %32 : vector<272x128xf32> to vector<272x128xbf16>
    %c0_26 = arith.constant 0 : index
    %c0_27 = arith.constant 0 : index
    %c0_28 = arith.constant 0 : index
    %34 = vector.load %arg5[%c0_26, %c0_27, %c0_28] : memref<1x272x128xbf16, #tpu.memory_space<vmem>>, vector<1x272x128xbf16>
    %35 = vector.shape_cast %34 : vector<1x272x128xbf16> to vector<272x128xbf16>
    %36 = vector.shape_cast %33 : vector<272x128xbf16> to vector<1x272x128xbf16>
    tpu.vector_store %arg5[%c0_26, %c0_27, %c0_28], %36 {strides = array<i32>} : memref<1x272x128xbf16, #tpu.memory_space<vmem>>, vector<1x272x128xbf16>,
    return
  }
  func.func @transform_0(%arg0: i32, %arg1: i32) -> (i32, i32, i32) {
    %c0_i32 = arith.constant 0 : i32
    %c0_i32_0 = arith.constant 0 : i32
    %c0_i32_1 = arith.constant 0 : i32
    return %arg0, %c0_i32, %c0_i32_0 : i32, i32, i32
  }
  func.func @transform_1(%arg0: i32, %arg1: i32) -> (i32, i32, i32) {
    %c0_i32 = arith.constant 0 : i32
    %c0_i32_0 = arith.constant 0 : i32
    %c0_i32_1 = arith.constant 0 : i32
    return %c0_i32, %c0_i32_0, %arg1 : i32, i32, i32
  }
  func.func @transform_2(%arg0: i32, %arg1: i32) -> (i32, i32) {
    %c0_i32 = arith.constant 0 : i32
    %c0_i32_0 = arith.constant 0 : i32
    return %c0_i32, %arg1 : i32, i32
  }
  func.func @transform_3(%arg0: i32, %arg1: i32) -> (i32, i32, i32) {
    %c0_i32 = arith.constant 0 : i32
    %c0_i32_0 = arith.constant 0 : i32
    return %arg0, %c0_i32, %arg1 : i32, i32, i32
  }
}

module attributes {stable_mosaic.version = 11 : i64} {
  func.func @_conv_block_kernel(%arg0: i32, %arg1: i32, %arg2: memref<1x82x32xbf16, #tpu.memory_space<vmem>>, %arg3: memref<4x32x128xbf16, #tpu.memory_space<vmem>>, %arg4: memref<1x128xf32, #tpu.memory_space<vmem>>, %arg5: memref<1x72x128xbf16, #tpu.memory_space<vmem>>) attributes {dimension_semantics = [#tpu.dimension_semantics<parallel>, #tpu.dimension_semantics<parallel>], iteration_bounds = array<i64: 2, 1>, scalar_prefetch = 0 : i64, scratch_operands = 0 : i64, tpu.core_type = #tpu.core_type<tc>, window_params = [{transform_indices = @transform_0, window_bounds = array<i64: 1, 82, 32>}, {transform_indices = @transform_1, window_bounds = array<i64: 4, 32, 128>}, {transform_indices = @transform_2, window_bounds = array<i64: 1, 128>}, {transform_indices = @transform_3, window_bounds = array<i64: 1, 72, 128>}]} {
    %cst = arith.constant 0.000000e+00 : f32
    %0 = vector.broadcast %cst : f32 to vector<72x128xf32>
    %c0 = arith.constant 0 : index
    %c0_0 = arith.constant 0 : index
    %c0_1 = arith.constant 0 : index
    %1 = vector.load %arg2[%c0, %c0_0, %c0_1] : memref<1x82x32xbf16, #tpu.memory_space<vmem>>, vector<1x72x32xbf16>
    %2 = vector.shape_cast %1 : vector<1x72x32xbf16> to vector<72x32xbf16>
    %c0_2 = arith.constant 0 : index
    %c0_3 = arith.constant 0 : index
    %c0_4 = arith.constant 0 : index
    %3 = vector.load %arg3[%c0_2, %c0_3, %c0_4] : memref<4x32x128xbf16, #tpu.memory_space<vmem>>, vector<1x32x128xbf16>
    %4 = vector.shape_cast %3 : vector<1x32x128xbf16> to vector<32x128xbf16>
    %cst_5 = arith.constant dense<0.000000e+00> : vector<72x128xf32>
    %5 = tpu.matmul %2, %4, %cst_5 {dimension_numbers = #tpu.dot_dimension_numbers<[1], [0], [0], [1], [0, 0, 1, 1], [], []>} : vector<72x32xbf16>, vector<32x128xbf16>, vector<72x128xf32> -> vector<72x128xf32>
    %6 = arith.addf %0, %5 : vector<72x128xf32>
    %c0_6 = arith.constant 0 : index
    %c1 = arith.constant 1 : index
    %c0_7 = arith.constant 0 : index
    %7 = vector.load %arg2[%c0_6, %c1, %c0_7] : memref<1x82x32xbf16, #tpu.memory_space<vmem>>, vector<1x72x32xbf16>
    %8 = vector.shape_cast %7 : vector<1x72x32xbf16> to vector<72x32xbf16>
    %c1_8 = arith.constant 1 : index
    %c0_9 = arith.constant 0 : index
    %c0_10 = arith.constant 0 : index
    %9 = vector.load %arg3[%c1_8, %c0_9, %c0_10] : memref<4x32x128xbf16, #tpu.memory_space<vmem>>, vector<1x32x128xbf16>
    %10 = vector.shape_cast %9 : vector<1x32x128xbf16> to vector<32x128xbf16>
    %cst_11 = arith.constant dense<0.000000e+00> : vector<72x128xf32>
    %11 = tpu.matmul %8, %10, %cst_11 {dimension_numbers = #tpu.dot_dimension_numbers<[1], [0], [0], [1], [0, 0, 1, 1], [], []>} : vector<72x32xbf16>, vector<32x128xbf16>, vector<72x128xf32> -> vector<72x128xf32>
    %12 = arith.addf %6, %11 : vector<72x128xf32>
    %c0_12 = arith.constant 0 : index
    %c9 = arith.constant 9 : index
    %c0_13 = arith.constant 0 : index
    %13 = vector.load %arg2[%c0_12, %c9, %c0_13] : memref<1x82x32xbf16, #tpu.memory_space<vmem>>, vector<1x72x32xbf16>
    %14 = vector.shape_cast %13 : vector<1x72x32xbf16> to vector<72x32xbf16>
    %c2 = arith.constant 2 : index
    %c0_14 = arith.constant 0 : index
    %c0_15 = arith.constant 0 : index
    %15 = vector.load %arg3[%c2, %c0_14, %c0_15] : memref<4x32x128xbf16, #tpu.memory_space<vmem>>, vector<1x32x128xbf16>
    %16 = vector.shape_cast %15 : vector<1x32x128xbf16> to vector<32x128xbf16>
    %cst_16 = arith.constant dense<0.000000e+00> : vector<72x128xf32>
    %17 = tpu.matmul %14, %16, %cst_16 {dimension_numbers = #tpu.dot_dimension_numbers<[1], [0], [0], [1], [0, 0, 1, 1], [], []>} : vector<72x32xbf16>, vector<32x128xbf16>, vector<72x128xf32> -> vector<72x128xf32>
    %18 = arith.addf %12, %17 : vector<72x128xf32>
    %c0_17 = arith.constant 0 : index
    %c10 = arith.constant 10 : index
    %c0_18 = arith.constant 0 : index
    %19 = vector.load %arg2[%c0_17, %c10, %c0_18] : memref<1x82x32xbf16, #tpu.memory_space<vmem>>, vector<1x72x32xbf16>
    %20 = vector.shape_cast %19 : vector<1x72x32xbf16> to vector<72x32xbf16>
    %c3 = arith.constant 3 : index
    %c0_19 = arith.constant 0 : index
    %c0_20 = arith.constant 0 : index
    %21 = vector.load %arg3[%c3, %c0_19, %c0_20] : memref<4x32x128xbf16, #tpu.memory_space<vmem>>, vector<1x32x128xbf16>
    %22 = vector.shape_cast %21 : vector<1x32x128xbf16> to vector<32x128xbf16>
    %cst_21 = arith.constant dense<0.000000e+00> : vector<72x128xf32>
    %23 = tpu.matmul %20, %22, %cst_21 {dimension_numbers = #tpu.dot_dimension_numbers<[1], [0], [0], [1], [0, 0, 1, 1], [], []>} : vector<72x32xbf16>, vector<32x128xbf16>, vector<72x128xf32> -> vector<72x128xf32>
    %24 = arith.addf %18, %23 : vector<72x128xf32>
    %25 = tpu.iota {dimensions = array<i32: 0>} : vector<72x1xi32>
    %c9_i32 = arith.constant 9 : i32
    %c0_i32 = arith.constant 0 : i32
    %26 = arith.cmpi eq, %c9_i32, %c0_i32 : i32
    %c1_i32 = arith.constant 1 : i32
    %27 = arith.select %26, %c1_i32, %c9_i32 : i32
    %28 = vector.broadcast %27 : i32 to vector<72x1xi32>
    %29 = arith.remsi %25, %28 : vector<72x1xi32>
    %c0_i32_22 = arith.constant 0 : i32
    %30 = vector.broadcast %c0_i32_22 : i32 to vector<72x1xi32>
    %31 = arith.cmpi ne, %29, %30 : vector<72x1xi32>
    %c0_i32_23 = arith.constant 0 : i32
    %32 = vector.broadcast %c0_i32_23 : i32 to vector<72x1xi32>
    %33 = arith.cmpi slt, %29, %32 : vector<72x1xi32>
    %c0_i32_24 = arith.constant 0 : i32
    %34 = arith.cmpi slt, %27, %c0_i32_24 : i32
    %35 = vector.broadcast %34 : i1 to vector<72x1xi1>
    %36 = vector.broadcast %35 : vector<72x1xi1> to vector<72x1xi1>
    %37 = arith.xori %33, %36 : vector<72x1xi1>
    %38 = arith.andi %37, %31 : vector<72x1xi1>
    %39 = vector.broadcast %27 : i32 to vector<72x1xi32>
    %40 = arith.addi %29, %39 : vector<72x1xi32>
    %41 = arith.select %38, %40, %29 : vector<72x1xi1>, vector<72x1xi32>
    %c8_i32 = arith.constant 8 : i32
    %42 = vector.broadcast %c8_i32 : i32 to vector<72x1xi32>
    %43 = arith.cmpi slt, %41, %42 : vector<72x1xi32>
    %44 = arith.extui %43 : vector<72x1xi1> to vector<72x1xi32>
    %45 = arith.sitofp %44 : vector<72x1xi32> to vector<72x1xf32>
    %46 = vector.broadcast %45 : vector<72x1xf32> to vector<72x128xf32>
    %47 = arith.mulf %24, %46 : vector<72x128xf32>
    %cst_25 = arith.constant dense<0.000000e+00> : vector<128xf32>
    %48 = vector.multi_reduction <add>, %47, %cst_25 [0] : vector<72x128xf32> to vector<128xf32>
    %49 = vector.shape_cast %48 : vector<128xf32> to vector<1x128xf32>
    %cst_26 = arith.constant 1.562500e-02 : f32
    %50 = vector.broadcast %cst_26 : f32 to vector<1x128xf32>
    %51 = arith.mulf %49, %50 : vector<1x128xf32>
    %52 = vector.broadcast %51 : vector<1x128xf32> to vector<72x128xf32>
    %53 = arith.subf %24, %52 : vector<72x128xf32>
    %54 = vector.broadcast %45 : vector<72x1xf32> to vector<72x128xf32>
    %55 = arith.mulf %53, %54 : vector<72x128xf32>
    %56 = arith.mulf %55, %55 : vector<72x128xf32>
    %cst_27 = arith.constant dense<0.000000e+00> : vector<128xf32>
    %57 = vector.multi_reduction <add>, %56, %cst_27 [0] : vector<72x128xf32> to vector<128xf32>
    %58 = vector.shape_cast %57 : vector<128xf32> to vector<1x128xf32>
    %cst_28 = arith.constant 1.562500e-02 : f32
    %59 = vector.broadcast %cst_28 : f32 to vector<1x128xf32>
    %60 = arith.mulf %58, %59 : vector<1x128xf32>
    %61 = vector.broadcast %51 : vector<1x128xf32> to vector<72x128xf32>
    %62 = arith.subf %24, %61 : vector<72x128xf32>
    %cst_29 = arith.constant 9.99999974E-6 : f32
    %63 = vector.broadcast %cst_29 : f32 to vector<1x128xf32>
    %64 = arith.addf %60, %63 : vector<1x128xf32>
    %65 = math.rsqrt %64 : vector<1x128xf32>
    %66 = vector.broadcast %65 : vector<1x128xf32> to vector<72x128xf32>
    %67 = arith.mulf %62, %66 : vector<72x128xf32>
    %cst_30 = arith.constant 0.000000e+00 : f32
    %68 = vector.broadcast %cst_30 : f32 to vector<72x128xf32>
    %69 = arith.cmpf oge, %67, %68 : vector<72x128xf32>
    %cst_31 = arith.constant 2.000000e-01 : f32
    %70 = vector.broadcast %cst_31 : f32 to vector<72x128xf32>
    %71 = arith.mulf %70, %67 : vector<72x128xf32>
    %72 = arith.select %69, %67, %71 : vector<72x128xi1>, vector<72x128xf32>
    %73 = arith.truncf %72 : vector<72x128xf32> to vector<72x128xbf16>
    %c0_32 = arith.constant 0 : index
    %c0_33 = arith.constant 0 : index
    %c0_34 = arith.constant 0 : index
    %74 = vector.load %arg5[%c0_32, %c0_33, %c0_34] : memref<1x72x128xbf16, #tpu.memory_space<vmem>>, vector<1x72x128xbf16>
    %75 = vector.shape_cast %74 : vector<1x72x128xbf16> to vector<72x128xbf16>
    %76 = vector.shape_cast %73 : vector<72x128xbf16> to vector<1x72x128xbf16>
    tpu.vector_store %arg5[%c0_32, %c0_33, %c0_34], %76 {strides = array<i32>} : memref<1x72x128xbf16, #tpu.memory_space<vmem>>, vector<1x72x128xbf16>,
    return
  }
  func.func @transform_0(%arg0: i32, %arg1: i32) -> (i32, i32, i32) {
    %c0_i32 = arith.constant 0 : i32
    %c0_i32_0 = arith.constant 0 : i32
    %c0_i32_1 = arith.constant 0 : i32
    return %arg0, %c0_i32, %c0_i32_0 : i32, i32, i32
  }
  func.func @transform_1(%arg0: i32, %arg1: i32) -> (i32, i32, i32) {
    %c0_i32 = arith.constant 0 : i32
    %c0_i32_0 = arith.constant 0 : i32
    %c0_i32_1 = arith.constant 0 : i32
    return %c0_i32, %c0_i32_0, %arg1 : i32, i32, i32
  }
  func.func @transform_2(%arg0: i32, %arg1: i32) -> (i32, i32) {
    %c0_i32 = arith.constant 0 : i32
    %c0_i32_0 = arith.constant 0 : i32
    return %c0_i32, %arg1 : i32, i32
  }
  func.func @transform_3(%arg0: i32, %arg1: i32) -> (i32, i32, i32) {
    %c0_i32 = arith.constant 0 : i32
    %c0_i32_0 = arith.constant 0 : i32
    return %arg0, %c0_i32, %arg1 : i32, i32, i32
  }
}

module attributes {stable_mosaic.version = 11 : i64} {
  func.func @_conv_block_kernel(%arg0: i32, %arg1: i32, %arg2: memref<1x26x64xbf16, #tpu.memory_space<vmem>>, %arg3: memref<4x64x128xbf16, #tpu.memory_space<vmem>>, %arg4: memref<1x128xf32, #tpu.memory_space<vmem>>, %arg5: memref<1x20x128xbf16, #tpu.memory_space<vmem>>) attributes {dimension_semantics = [#tpu.dimension_semantics<parallel>, #tpu.dimension_semantics<parallel>], iteration_bounds = array<i64: 2, 1>, scalar_prefetch = 0 : i64, scratch_operands = 0 : i64, tpu.core_type = #tpu.core_type<tc>, window_params = [{transform_indices = @transform_0, window_bounds = array<i64: 1, 26, 64>}, {transform_indices = @transform_1, window_bounds = array<i64: 4, 64, 128>}, {transform_indices = @transform_2, window_bounds = array<i64: 1, 128>}, {transform_indices = @transform_3, window_bounds = array<i64: 1, 20, 128>}]} {
    %cst = arith.constant 0.000000e+00 : f32
    %0 = vector.broadcast %cst : f32 to vector<20x128xf32>
    %c0 = arith.constant 0 : index
    %c0_0 = arith.constant 0 : index
    %c0_1 = arith.constant 0 : index
    %1 = vector.load %arg2[%c0, %c0_0, %c0_1] : memref<1x26x64xbf16, #tpu.memory_space<vmem>>, vector<1x20x64xbf16>
    %2 = vector.shape_cast %1 : vector<1x20x64xbf16> to vector<20x64xbf16>
    %c0_2 = arith.constant 0 : index
    %c0_3 = arith.constant 0 : index
    %c0_4 = arith.constant 0 : index
    %3 = vector.load %arg3[%c0_2, %c0_3, %c0_4] : memref<4x64x128xbf16, #tpu.memory_space<vmem>>, vector<1x64x128xbf16>
    %4 = vector.shape_cast %3 : vector<1x64x128xbf16> to vector<64x128xbf16>
    %cst_5 = arith.constant dense<0.000000e+00> : vector<20x128xf32>
    %5 = tpu.matmul %2, %4, %cst_5 {dimension_numbers = #tpu.dot_dimension_numbers<[1], [0], [0], [1], [0, 0, 1, 1], [], []>} : vector<20x64xbf16>, vector<64x128xbf16>, vector<20x128xf32> -> vector<20x128xf32>
    %6 = arith.addf %0, %5 : vector<20x128xf32>
    %c0_6 = arith.constant 0 : index
    %c1 = arith.constant 1 : index
    %c0_7 = arith.constant 0 : index
    %7 = vector.load %arg2[%c0_6, %c1, %c0_7] : memref<1x26x64xbf16, #tpu.memory_space<vmem>>, vector<1x20x64xbf16>
    %8 = vector.shape_cast %7 : vector<1x20x64xbf16> to vector<20x64xbf16>
    %c1_8 = arith.constant 1 : index
    %c0_9 = arith.constant 0 : index
    %c0_10 = arith.constant 0 : index
    %9 = vector.load %arg3[%c1_8, %c0_9, %c0_10] : memref<4x64x128xbf16, #tpu.memory_space<vmem>>, vector<1x64x128xbf16>
    %10 = vector.shape_cast %9 : vector<1x64x128xbf16> to vector<64x128xbf16>
    %cst_11 = arith.constant dense<0.000000e+00> : vector<20x128xf32>
    %11 = tpu.matmul %8, %10, %cst_11 {dimension_numbers = #tpu.dot_dimension_numbers<[1], [0], [0], [1], [0, 0, 1, 1], [], []>} : vector<20x64xbf16>, vector<64x128xbf16>, vector<20x128xf32> -> vector<20x128xf32>
    %12 = arith.addf %6, %11 : vector<20x128xf32>
    %c0_12 = arith.constant 0 : index
    %c5 = arith.constant 5 : index
    %c0_13 = arith.constant 0 : index
    %13 = vector.load %arg2[%c0_12, %c5, %c0_13] : memref<1x26x64xbf16, #tpu.memory_space<vmem>>, vector<1x20x64xbf16>
    %14 = vector.shape_cast %13 : vector<1x20x64xbf16> to vector<20x64xbf16>
    %c2 = arith.constant 2 : index
    %c0_14 = arith.constant 0 : index
    %c0_15 = arith.constant 0 : index
    %15 = vector.load %arg3[%c2, %c0_14, %c0_15] : memref<4x64x128xbf16, #tpu.memory_space<vmem>>, vector<1x64x128xbf16>
    %16 = vector.shape_cast %15 : vector<1x64x128xbf16> to vector<64x128xbf16>
    %cst_16 = arith.constant dense<0.000000e+00> : vector<20x128xf32>
    %17 = tpu.matmul %14, %16, %cst_16 {dimension_numbers = #tpu.dot_dimension_numbers<[1], [0], [0], [1], [0, 0, 1, 1], [], []>} : vector<20x64xbf16>, vector<64x128xbf16>, vector<20x128xf32> -> vector<20x128xf32>
    %18 = arith.addf %12, %17 : vector<20x128xf32>
    %c0_17 = arith.constant 0 : index
    %c6 = arith.constant 6 : index
    %c0_18 = arith.constant 0 : index
    %19 = vector.load %arg2[%c0_17, %c6, %c0_18] : memref<1x26x64xbf16, #tpu.memory_space<vmem>>, vector<1x20x64xbf16>
    %20 = vector.shape_cast %19 : vector<1x20x64xbf16> to vector<20x64xbf16>
    %c3 = arith.constant 3 : index
    %c0_19 = arith.constant 0 : index
    %c0_20 = arith.constant 0 : index
    %21 = vector.load %arg3[%c3, %c0_19, %c0_20] : memref<4x64x128xbf16, #tpu.memory_space<vmem>>, vector<1x64x128xbf16>
    %22 = vector.shape_cast %21 : vector<1x64x128xbf16> to vector<64x128xbf16>
    %cst_21 = arith.constant dense<0.000000e+00> : vector<20x128xf32>
    %23 = tpu.matmul %20, %22, %cst_21 {dimension_numbers = #tpu.dot_dimension_numbers<[1], [0], [0], [1], [0, 0, 1, 1], [], []>} : vector<20x64xbf16>, vector<64x128xbf16>, vector<20x128xf32> -> vector<20x128xf32>
    %24 = arith.addf %18, %23 : vector<20x128xf32>
    %25 = tpu.iota {dimensions = array<i32: 0>} : vector<20x1xi32>
    %c5_i32 = arith.constant 5 : i32
    %c0_i32 = arith.constant 0 : i32
    %26 = arith.cmpi eq, %c5_i32, %c0_i32 : i32
    %c1_i32 = arith.constant 1 : i32
    %27 = arith.select %26, %c1_i32, %c5_i32 : i32
    %28 = vector.broadcast %27 : i32 to vector<20x1xi32>
    %29 = arith.remsi %25, %28 : vector<20x1xi32>
    %c0_i32_22 = arith.constant 0 : i32
    %30 = vector.broadcast %c0_i32_22 : i32 to vector<20x1xi32>
    %31 = arith.cmpi ne, %29, %30 : vector<20x1xi32>
    %c0_i32_23 = arith.constant 0 : i32
    %32 = vector.broadcast %c0_i32_23 : i32 to vector<20x1xi32>
    %33 = arith.cmpi slt, %29, %32 : vector<20x1xi32>
    %c0_i32_24 = arith.constant 0 : i32
    %34 = arith.cmpi slt, %27, %c0_i32_24 : i32
    %35 = vector.broadcast %34 : i1 to vector<20x1xi1>
    %36 = vector.broadcast %35 : vector<20x1xi1> to vector<20x1xi1>
    %37 = arith.xori %33, %36 : vector<20x1xi1>
    %38 = arith.andi %37, %31 : vector<20x1xi1>
    %39 = vector.broadcast %27 : i32 to vector<20x1xi32>
    %40 = arith.addi %29, %39 : vector<20x1xi32>
    %41 = arith.select %38, %40, %29 : vector<20x1xi1>, vector<20x1xi32>
    %c4_i32 = arith.constant 4 : i32
    %42 = vector.broadcast %c4_i32 : i32 to vector<20x1xi32>
    %43 = arith.cmpi slt, %41, %42 : vector<20x1xi32>
    %44 = arith.extui %43 : vector<20x1xi1> to vector<20x1xi32>
    %45 = arith.sitofp %44 : vector<20x1xi32> to vector<20x1xf32>
    %46 = vector.broadcast %45 : vector<20x1xf32> to vector<20x128xf32>
    %47 = arith.mulf %24, %46 : vector<20x128xf32>
    %cst_25 = arith.constant dense<0.000000e+00> : vector<128xf32>
    %48 = vector.multi_reduction <add>, %47, %cst_25 [0] : vector<20x128xf32> to vector<128xf32>
    %49 = vector.shape_cast %48 : vector<128xf32> to vector<1x128xf32>
    %cst_26 = arith.constant 6.250000e-02 : f32
    %50 = vector.broadcast %cst_26 : f32 to vector<1x128xf32>
    %51 = arith.mulf %49, %50 : vector<1x128xf32>
    %52 = vector.broadcast %51 : vector<1x128xf32> to vector<20x128xf32>
    %53 = arith.subf %24, %52 : vector<20x128xf32>
    %54 = vector.broadcast %45 : vector<20x1xf32> to vector<20x128xf32>
    %55 = arith.mulf %53, %54 : vector<20x128xf32>
    %56 = arith.mulf %55, %55 : vector<20x128xf32>
    %cst_27 = arith.constant dense<0.000000e+00> : vector<128xf32>
    %57 = vector.multi_reduction <add>, %56, %cst_27 [0] : vector<20x128xf32> to vector<128xf32>
    %58 = vector.shape_cast %57 : vector<128xf32> to vector<1x128xf32>
    %cst_28 = arith.constant 6.250000e-02 : f32
    %59 = vector.broadcast %cst_28 : f32 to vector<1x128xf32>
    %60 = arith.mulf %58, %59 : vector<1x128xf32>
    %61 = vector.broadcast %51 : vector<1x128xf32> to vector<20x128xf32>
    %62 = arith.subf %24, %61 : vector<20x128xf32>
    %cst_29 = arith.constant 9.99999974E-6 : f32
    %63 = vector.broadcast %cst_29 : f32 to vector<1x128xf32>
    %64 = arith.addf %60, %63 : vector<1x128xf32>
    %65 = math.rsqrt %64 : vector<1x128xf32>
    %66 = vector.broadcast %65 : vector<1x128xf32> to vector<20x128xf32>
    %67 = arith.mulf %62, %66 : vector<20x128xf32>
    %cst_30 = arith.constant 0.000000e+00 : f32
    %68 = vector.broadcast %cst_30 : f32 to vector<20x128xf32>
    %69 = arith.cmpf oge, %67, %68 : vector<20x128xf32>
    %cst_31 = arith.constant 2.000000e-01 : f32
    %70 = vector.broadcast %cst_31 : f32 to vector<20x128xf32>
    %71 = arith.mulf %70, %67 : vector<20x128xf32>
    %72 = arith.select %69, %67, %71 : vector<20x128xi1>, vector<20x128xf32>
    %73 = arith.truncf %72 : vector<20x128xf32> to vector<20x128xbf16>
    %c0_32 = arith.constant 0 : index
    %c0_33 = arith.constant 0 : index
    %c0_34 = arith.constant 0 : index
    %74 = vector.load %arg5[%c0_32, %c0_33, %c0_34] : memref<1x20x128xbf16, #tpu.memory_space<vmem>>, vector<1x20x128xbf16>
    %75 = vector.shape_cast %74 : vector<1x20x128xbf16> to vector<20x128xbf16>
    %76 = vector.shape_cast %73 : vector<20x128xbf16> to vector<1x20x128xbf16>
    tpu.vector_store %arg5[%c0_32, %c0_33, %c0_34], %76 {strides = array<i32>} : memref<1x20x128xbf16, #tpu.memory_space<vmem>>, vector<1x20x128xbf16>,
    return
  }
  func.func @transform_0(%arg0: i32, %arg1: i32) -> (i32, i32, i32) {
    %c0_i32 = arith.constant 0 : i32
    %c0_i32_0 = arith.constant 0 : i32
    %c0_i32_1 = arith.constant 0 : i32
    return %arg0, %c0_i32, %c0_i32_0 : i32, i32, i32
  }
  func.func @transform_1(%arg0: i32, %arg1: i32) -> (i32, i32, i32) {
    %c0_i32 = arith.constant 0 : i32
    %c0_i32_0 = arith.constant 0 : i32
    %c0_i32_1 = arith.constant 0 : i32
    return %c0_i32, %c0_i32_0, %arg1 : i32, i32, i32
  }
  func.func @transform_2(%arg0: i32, %arg1: i32) -> (i32, i32) {
    %c0_i32 = arith.constant 0 : i32
    %c0_i32_0 = arith.constant 0 : i32
    return %c0_i32, %arg1 : i32, i32
  }
  func.func @transform_3(%arg0: i32, %arg1: i32) -> (i32, i32, i32) {
    %c0_i32 = arith.constant 0 : i32
    %c0_i32_0 = arith.constant 0 : i32
    return %arg0, %c0_i32, %arg1 : i32, i32, i32
  }
}

module attributes {stable_mosaic.version = 11 : i64} {
  func.func @_conv_block_kernel(%arg0: i32, %arg1: i32, %arg2: memref<1x51x32xbf16, #tpu.memory_space<vmem>>, %arg3: memref<16x32x128xbf16, #tpu.memory_space<vmem>>, %arg4: memref<1x128xf32, #tpu.memory_space<vmem>>, %arg5: memref<1x24x128xbf16, #tpu.memory_space<vmem>>) attributes {dimension_semantics = [#tpu.dimension_semantics<parallel>, #tpu.dimension_semantics<parallel>], iteration_bounds = array<i64: 2, 1>, scalar_prefetch = 0 : i64, scratch_operands = 0 : i64, tpu.core_type = #tpu.core_type<tc>, window_params = [{transform_indices = @transform_0, window_bounds = array<i64: 1, 51, 32>}, {transform_indices = @transform_1, window_bounds = array<i64: 16, 32, 128>}, {transform_indices = @transform_2, window_bounds = array<i64: 1, 128>}, {transform_indices = @transform_3, window_bounds = array<i64: 1, 24, 128>}]} {
    %cst = arith.constant 0.000000e+00 : f32
    %0 = vector.broadcast %cst : f32 to vector<24x128xf32>
    %c0 = arith.constant 0 : index
    %c0_0 = arith.constant 0 : index
    %c0_1 = arith.constant 0 : index
    %1 = vector.load %arg2[%c0, %c0_0, %c0_1] : memref<1x51x32xbf16, #tpu.memory_space<vmem>>, vector<1x24x32xbf16>
    %2 = vector.shape_cast %1 : vector<1x24x32xbf16> to vector<24x32xbf16>
    %c0_2 = arith.constant 0 : index
    %c0_3 = arith.constant 0 : index
    %c0_4 = arith.constant 0 : index
    %3 = vector.load %arg3[%c0_2, %c0_3, %c0_4] : memref<16x32x128xbf16, #tpu.memory_space<vmem>>, vector<1x32x128xbf16>
    %4 = vector.shape_cast %3 : vector<1x32x128xbf16> to vector<32x128xbf16>
    %cst_5 = arith.constant dense<0.000000e+00> : vector<24x128xf32>
    %5 = tpu.matmul %2, %4, %cst_5 {dimension_numbers = #tpu.dot_dimension_numbers<[1], [0], [0], [1], [0, 0, 1, 1], [], []>} : vector<24x32xbf16>, vector<32x128xbf16>, vector<24x128xf32> -> vector<24x128xf32>
    %6 = arith.addf %0, %5 : vector<24x128xf32>
    %c0_6 = arith.constant 0 : index
    %c1 = arith.constant 1 : index
    %c0_7 = arith.constant 0 : index
    %7 = vector.load %arg2[%c0_6, %c1, %c0_7] : memref<1x51x32xbf16, #tpu.memory_space<vmem>>, vector<1x24x32xbf16>
    %8 = vector.shape_cast %7 : vector<1x24x32xbf16> to vector<24x32xbf16>
    %c1_8 = arith.constant 1 : index
    %c0_9 = arith.constant 0 : index
    %c0_10 = arith.constant 0 : index
    %9 = vector.load %arg3[%c1_8, %c0_9, %c0_10] : memref<16x32x128xbf16, #tpu.memory_space<vmem>>, vector<1x32x128xbf16>
    %10 = vector.shape_cast %9 : vector<1x32x128xbf16> to vector<32x128xbf16>
    %cst_11 = arith.constant dense<0.000000e+00> : vector<24x128xf32>
    %11 = tpu.matmul %8, %10, %cst_11 {dimension_numbers = #tpu.dot_dimension_numbers<[1], [0], [0], [1], [0, 0, 1, 1], [], []>} : vector<24x32xbf16>, vector<32x128xbf16>, vector<24x128xf32> -> vector<24x128xf32>
    %12 = arith.addf %6, %11 : vector<24x128xf32>
    %c0_12 = arith.constant 0 : index
    %c2 = arith.constant 2 : index
    %c0_13 = arith.constant 0 : index
    %13 = vector.load %arg2[%c0_12, %c2, %c0_13] : memref<1x51x32xbf16, #tpu.memory_space<vmem>>, vector<1x24x32xbf16>
    %14 = vector.shape_cast %13 : vector<1x24x32xbf16> to vector<24x32xbf16>
    %c2_14 = arith.constant 2 : index
    %c0_15 = arith.constant 0 : index
    %c0_16 = arith.constant 0 : index
    %15 = vector.load %arg3[%c2_14, %c0_15, %c0_16] : memref<16x32x128xbf16, #tpu.memory_space<vmem>>, vector<1x32x128xbf16>
    %16 = vector.shape_cast %15 : vector<1x32x128xbf16> to vector<32x128xbf16>
    %cst_17 = arith.constant dense<0.000000e+00> : vector<24x128xf32>
    %17 = tpu.matmul %14, %16, %cst_17 {dimension_numbers = #tpu.dot_dimension_numbers<[1], [0], [0], [1], [0, 0, 1, 1], [], []>} : vector<24x32xbf16>, vector<32x128xbf16>, vector<24x128xf32> -> vector<24x128xf32>
    %18 = arith.addf %12, %17 : vector<24x128xf32>
    %c0_18 = arith.constant 0 : index
    %c3 = arith.constant 3 : index
    %c0_19 = arith.constant 0 : index
    %19 = vector.load %arg2[%c0_18, %c3, %c0_19] : memref<1x51x32xbf16, #tpu.memory_space<vmem>>, vector<1x24x32xbf16>
    %20 = vector.shape_cast %19 : vector<1x24x32xbf16> to vector<24x32xbf16>
    %c3_20 = arith.constant 3 : index
    %c0_21 = arith.constant 0 : index
    %c0_22 = arith.constant 0 : index
    %21 = vector.load %arg3[%c3_20, %c0_21, %c0_22] : memref<16x32x128xbf16, #tpu.memory_space<vmem>>, vector<1x32x128xbf16>
    %22 = vector.shape_cast %21 : vector<1x32x128xbf16> to vector<32x128xbf16>
    %cst_23 = arith.constant dense<0.000000e+00> : vector<24x128xf32>
    %23 = tpu.matmul %20, %22, %cst_23 {dimension_numbers = #tpu.dot_dimension_numbers<[1], [0], [0], [1], [0, 0, 1, 1], [], []>} : vector<24x32xbf16>, vector<32x128xbf16>, vector<24x128xf32> -> vector<24x128xf32>
    %24 = arith.addf %18, %23 : vector<24x128xf32>
    %c0_24 = arith.constant 0 : index
    %c8 = arith.constant 8 : index
    %c0_25 = arith.constant 0 : index
    %25 = vector.load %arg2[%c0_24, %c8, %c0_25] : memref<1x51x32xbf16, #tpu.memory_space<vmem>>, vector<1x24x32xbf16>
    %26 = vector.shape_cast %25 : vector<1x24x32xbf16> to vector<24x32xbf16>
    %c4 = arith.constant 4 : index
    %c0_26 = arith.constant 0 : index
    %c0_27 = arith.constant 0 : index
    %27 = vector.load %arg3[%c4, %c0_26, %c0_27] : memref<16x32x128xbf16, #tpu.memory_space<vmem>>, vector<1x32x128xbf16>
    %28 = vector.shape_cast %27 : vector<1x32x128xbf16> to vector<32x128xbf16>
    %cst_28 = arith.constant dense<0.000000e+00> : vector<24x128xf32>
    %29 = tpu.matmul %26, %28, %cst_28 {dimension_numbers = #tpu.dot_dimension_numbers<[1], [0], [0], [1], [0, 0, 1, 1], [], []>} : vector<24x32xbf16>, vector<32x128xbf16>, vector<24x128xf32> -> vector<24x128xf32>
    %30 = arith.addf %24, %29 : vector<24x128xf32>
    %c0_29 = arith.constant 0 : index
    %c9 = arith.constant 9 : index
    %c0_30 = arith.constant 0 : index
    %31 = vector.load %arg2[%c0_29, %c9, %c0_30] : memref<1x51x32xbf16, #tpu.memory_space<vmem>>, vector<1x24x32xbf16>
    %32 = vector.shape_cast %31 : vector<1x24x32xbf16> to vector<24x32xbf16>
    %c5 = arith.constant 5 : index
    %c0_31 = arith.constant 0 : index
    %c0_32 = arith.constant 0 : index
    %33 = vector.load %arg3[%c5, %c0_31, %c0_32] : memref<16x32x128xbf16, #tpu.memory_space<vmem>>, vector<1x32x128xbf16>
    %34 = vector.shape_cast %33 : vector<1x32x128xbf16> to vector<32x128xbf16>
    %cst_33 = arith.constant dense<0.000000e+00> : vector<24x128xf32>
    %35 = tpu.matmul %32, %34, %cst_33 {dimension_numbers = #tpu.dot_dimension_numbers<[1], [0], [0], [1], [0, 0, 1, 1], [], []>} : vector<24x32xbf16>, vector<32x128xbf16>, vector<24x128xf32> -> vector<24x128xf32>
    %36 = arith.addf %30, %35 : vector<24x128xf32>
    %c0_34 = arith.constant 0 : index
    %c10 = arith.constant 10 : index
    %c0_35 = arith.constant 0 : index
    %37 = vector.load %arg2[%c0_34, %c10, %c0_35] : memref<1x51x32xbf16, #tpu.memory_space<vmem>>, vector<1x24x32xbf16>
    %38 = vector.shape_cast %37 : vector<1x24x32xbf16> to vector<24x32xbf16>
    %c6 = arith.constant 6 : index
    %c0_36 = arith.constant 0 : index
    %c0_37 = arith.constant 0 : index
    %39 = vector.load %arg3[%c6, %c0_36, %c0_37] : memref<16x32x128xbf16, #tpu.memory_space<vmem>>, vector<1x32x128xbf16>
    %40 = vector.shape_cast %39 : vector<1x32x128xbf16> to vector<32x128xbf16>
    %cst_38 = arith.constant dense<0.000000e+00> : vector<24x128xf32>
    %41 = tpu.matmul %38, %40, %cst_38 {dimension_numbers = #tpu.dot_dimension_numbers<[1], [0], [0], [1], [0, 0, 1, 1], [], []>} : vector<24x32xbf16>, vector<32x128xbf16>, vector<24x128xf32> -> vector<24x128xf32>
    %42 = arith.addf %36, %41 : vector<24x128xf32>
    %c0_39 = arith.constant 0 : index
    %c11 = arith.constant 11 : index
    %c0_40 = arith.constant 0 : index
    %43 = vector.load %arg2[%c0_39, %c11, %c0_40] : memref<1x51x32xbf16, #tpu.memory_space<vmem>>, vector<1x24x32xbf16>
    %44 = vector.shape_cast %43 : vector<1x24x32xbf16> to vector<24x32xbf16>
    %c7 = arith.constant 7 : index
    %c0_41 = arith.constant 0 : index
    %c0_42 = arith.constant 0 : index
    %45 = vector.load %arg3[%c7, %c0_41, %c0_42] : memref<16x32x128xbf16, #tpu.memory_space<vmem>>, vector<1x32x128xbf16>
    %46 = vector.shape_cast %45 : vector<1x32x128xbf16> to vector<32x128xbf16>
    %cst_43 = arith.constant dense<0.000000e+00> : vector<24x128xf32>
    %47 = tpu.matmul %44, %46, %cst_43 {dimension_numbers = #tpu.dot_dimension_numbers<[1], [0], [0], [1], [0, 0, 1, 1], [], []>} : vector<24x32xbf16>, vector<32x128xbf16>, vector<24x128xf32> -> vector<24x128xf32>
    %48 = arith.addf %42, %47 : vector<24x128xf32>
    %c0_44 = arith.constant 0 : index
    %c16 = arith.constant 16 : index
    %c0_45 = arith.constant 0 : index
    %49 = vector.load %arg2[%c0_44, %c16, %c0_45] : memref<1x51x32xbf16, #tpu.memory_space<vmem>>, vector<1x24x32xbf16>
    %50 = vector.shape_cast %49 : vector<1x24x32xbf16> to vector<24x32xbf16>
    %c8_46 = arith.constant 8 : index
    %c0_47 = arith.constant 0 : index
    %c0_48 = arith.constant 0 : index
    %51 = vector.load %arg3[%c8_46, %c0_47, %c0_48] : memref<16x32x128xbf16, #tpu.memory_space<vmem>>, vector<1x32x128xbf16>
    %52 = vector.shape_cast %51 : vector<1x32x128xbf16> to vector<32x128xbf16>
    %cst_49 = arith.constant dense<0.000000e+00> : vector<24x128xf32>
    %53 = tpu.matmul %50, %52, %cst_49 {dimension_numbers = #tpu.dot_dimension_numbers<[1], [0], [0], [1], [0, 0, 1, 1], [], []>} : vector<24x32xbf16>, vector<32x128xbf16>, vector<24x128xf32> -> vector<24x128xf32>
    %54 = arith.addf %48, %53 : vector<24x128xf32>
    %c0_50 = arith.constant 0 : index
    %c17 = arith.constant 17 : index
    %c0_51 = arith.constant 0 : index
    %55 = vector.load %arg2[%c0_50, %c17, %c0_51] : memref<1x51x32xbf16, #tpu.memory_space<vmem>>, vector<1x24x32xbf16>
    %56 = vector.shape_cast %55 : vector<1x24x32xbf16> to vector<24x32xbf16>
    %c9_52 = arith.constant 9 : index
    %c0_53 = arith.constant 0 : index
    %c0_54 = arith.constant 0 : index
    %57 = vector.load %arg3[%c9_52, %c0_53, %c0_54] : memref<16x32x128xbf16, #tpu.memory_space<vmem>>, vector<1x32x128xbf16>
    %58 = vector.shape_cast %57 : vector<1x32x128xbf16> to vector<32x128xbf16>
    %cst_55 = arith.constant dense<0.000000e+00> : vector<24x128xf32>
    %59 = tpu.matmul %56, %58, %cst_55 {dimension_numbers = #tpu.dot_dimension_numbers<[1], [0], [0], [1], [0, 0, 1, 1], [], []>} : vector<24x32xbf16>, vector<32x128xbf16>, vector<24x128xf32> -> vector<24x128xf32>
    %60 = arith.addf %54, %59 : vector<24x128xf32>
    %c0_56 = arith.constant 0 : index
    %c18 = arith.constant 18 : index
    %c0_57 = arith.constant 0 : index
    %61 = vector.load %arg2[%c0_56, %c18, %c0_57] : memref<1x51x32xbf16, #tpu.memory_space<vmem>>, vector<1x24x32xbf16>
    %62 = vector.shape_cast %61 : vector<1x24x32xbf16> to vector<24x32xbf16>
    %c10_58 = arith.constant 10 : index
    %c0_59 = arith.constant 0 : index
    %c0_60 = arith.constant 0 : index
    %63 = vector.load %arg3[%c10_58, %c0_59, %c0_60] : memref<16x32x128xbf16, #tpu.memory_space<vmem>>, vector<1x32x128xbf16>
    %64 = vector.shape_cast %63 : vector<1x32x128xbf16> to vector<32x128xbf16>
    %cst_61 = arith.constant dense<0.000000e+00> : vector<24x128xf32>
    %65 = tpu.matmul %62, %64, %cst_61 {dimension_numbers = #tpu.dot_dimension_numbers<[1], [0], [0], [1], [0, 0, 1, 1], [], []>} : vector<24x32xbf16>, vector<32x128xbf16>, vector<24x128xf32> -> vector<24x128xf32>
    %66 = arith.addf %60, %65 : vector<24x128xf32>
    %c0_62 = arith.constant 0 : index
    %c19 = arith.constant 19 : index
    %c0_63 = arith.constant 0 : index
    %67 = vector.load %arg2[%c0_62, %c19, %c0_63] : memref<1x51x32xbf16, #tpu.memory_space<vmem>>, vector<1x24x32xbf16>
    %68 = vector.shape_cast %67 : vector<1x24x32xbf16> to vector<24x32xbf16>
    %c11_64 = arith.constant 11 : index
    %c0_65 = arith.constant 0 : index
    %c0_66 = arith.constant 0 : index
    %69 = vector.load %arg3[%c11_64, %c0_65, %c0_66] : memref<16x32x128xbf16, #tpu.memory_space<vmem>>, vector<1x32x128xbf16>
    %70 = vector.shape_cast %69 : vector<1x32x128xbf16> to vector<32x128xbf16>
    %cst_67 = arith.constant dense<0.000000e+00> : vector<24x128xf32>
    %71 = tpu.matmul %68, %70, %cst_67 {dimension_numbers = #tpu.dot_dimension_numbers<[1], [0], [0], [1], [0, 0, 1, 1], [], []>} : vector<24x32xbf16>, vector<32x128xbf16>, vector<24x128xf32> -> vector<24x128xf32>
    %72 = arith.addf %66, %71 : vector<24x128xf32>
    %c0_68 = arith.constant 0 : index
    %c24 = arith.constant 24 : index
    %c0_69 = arith.constant 0 : index
    %73 = vector.load %arg2[%c0_68, %c24, %c0_69] : memref<1x51x32xbf16, #tpu.memory_space<vmem>>, vector<1x24x32xbf16>
    %74 = vector.shape_cast %73 : vector<1x24x32xbf16> to vector<24x32xbf16>
    %c12 = arith.constant 12 : index
    %c0_70 = arith.constant 0 : index
    %c0_71 = arith.constant 0 : index
    %75 = vector.load %arg3[%c12, %c0_70, %c0_71] : memref<16x32x128xbf16, #tpu.memory_space<vmem>>, vector<1x32x128xbf16>
    %76 = vector.shape_cast %75 : vector<1x32x128xbf16> to vector<32x128xbf16>
    %cst_72 = arith.constant dense<0.000000e+00> : vector<24x128xf32>
    %77 = tpu.matmul %74, %76, %cst_72 {dimension_numbers = #tpu.dot_dimension_numbers<[1], [0], [0], [1], [0, 0, 1, 1], [], []>} : vector<24x32xbf16>, vector<32x128xbf16>, vector<24x128xf32> -> vector<24x128xf32>
    %78 = arith.addf %72, %77 : vector<24x128xf32>
    %c0_73 = arith.constant 0 : index
    %c25 = arith.constant 25 : index
    %c0_74 = arith.constant 0 : index
    %79 = vector.load %arg2[%c0_73, %c25, %c0_74] : memref<1x51x32xbf16, #tpu.memory_space<vmem>>, vector<1x24x32xbf16>
    %80 = vector.shape_cast %79 : vector<1x24x32xbf16> to vector<24x32xbf16>
    %c13 = arith.constant 13 : index
    %c0_75 = arith.constant 0 : index
    %c0_76 = arith.constant 0 : index
    %81 = vector.load %arg3[%c13, %c0_75, %c0_76] : memref<16x32x128xbf16, #tpu.memory_space<vmem>>, vector<1x32x128xbf16>
    %82 = vector.shape_cast %81 : vector<1x32x128xbf16> to vector<32x128xbf16>
    %cst_77 = arith.constant dense<0.000000e+00> : vector<24x128xf32>
    %83 = tpu.matmul %80, %82, %cst_77 {dimension_numbers = #tpu.dot_dimension_numbers<[1], [0], [0], [1], [0, 0, 1, 1], [], []>} : vector<24x32xbf16>, vector<32x128xbf16>, vector<24x128xf32> -> vector<24x128xf32>
    %84 = arith.addf %78, %83 : vector<24x128xf32>
    %c0_78 = arith.constant 0 : index
    %c26 = arith.constant 26 : index
    %c0_79 = arith.constant 0 : index
    %85 = vector.load %arg2[%c0_78, %c26, %c0_79] : memref<1x51x32xbf16, #tpu.memory_space<vmem>>, vector<1x24x32xbf16>
    %86 = vector.shape_cast %85 : vector<1x24x32xbf16> to vector<24x32xbf16>
    %c14 = arith.constant 14 : index
    %c0_80 = arith.constant 0 : index
    %c0_81 = arith.constant 0 : index
    %87 = vector.load %arg3[%c14, %c0_80, %c0_81] : memref<16x32x128xbf16, #tpu.memory_space<vmem>>, vector<1x32x128xbf16>
    %88 = vector.shape_cast %87 : vector<1x32x128xbf16> to vector<32x128xbf16>
    %cst_82 = arith.constant dense<0.000000e+00> : vector<24x128xf32>
    %89 = tpu.matmul %86, %88, %cst_82 {dimension_numbers = #tpu.dot_dimension_numbers<[1], [0], [0], [1], [0, 0, 1, 1], [], []>} : vector<24x32xbf16>, vector<32x128xbf16>, vector<24x128xf32> -> vector<24x128xf32>
    %90 = arith.addf %84, %89 : vector<24x128xf32>
    %c0_83 = arith.constant 0 : index
    %c27 = arith.constant 27 : index
    %c0_84 = arith.constant 0 : index
    %91 = vector.load %arg2[%c0_83, %c27, %c0_84] : memref<1x51x32xbf16, #tpu.memory_space<vmem>>, vector<1x24x32xbf16>
    %92 = vector.shape_cast %91 : vector<1x24x32xbf16> to vector<24x32xbf16>
    %c15 = arith.constant 15 : index
    %c0_85 = arith.constant 0 : index
    %c0_86 = arith.constant 0 : index
    %93 = vector.load %arg3[%c15, %c0_85, %c0_86] : memref<16x32x128xbf16, #tpu.memory_space<vmem>>, vector<1x32x128xbf16>
    %94 = vector.shape_cast %93 : vector<1x32x128xbf16> to vector<32x128xbf16>
    %cst_87 = arith.constant dense<0.000000e+00> : vector<24x128xf32>
    %95 = tpu.matmul %92, %94, %cst_87 {dimension_numbers = #tpu.dot_dimension_numbers<[1], [0], [0], [1], [0, 0, 1, 1], [], []>} : vector<24x32xbf16>, vector<32x128xbf16>, vector<24x128xf32> -> vector<24x128xf32>
    %96 = arith.addf %90, %95 : vector<24x128xf32>
    %97 = tpu.iota {dimensions = array<i32: 0>} : vector<24x1xi32>
    %c8_i32 = arith.constant 8 : i32
    %c0_i32 = arith.constant 0 : i32
    %98 = arith.cmpi eq, %c8_i32, %c0_i32 : i32
    %c1_i32 = arith.constant 1 : i32
    %99 = arith.select %98, %c1_i32, %c8_i32 : i32
    %100 = vector.broadcast %99 : i32 to vector<24x1xi32>
    %101 = arith.remsi %97, %100 : vector<24x1xi32>
    %c0_i32_88 = arith.constant 0 : i32
    %102 = vector.broadcast %c0_i32_88 : i32 to vector<24x1xi32>
    %103 = arith.cmpi ne, %101, %102 : vector<24x1xi32>
    %c0_i32_89 = arith.constant 0 : i32
    %104 = vector.broadcast %c0_i32_89 : i32 to vector<24x1xi32>
    %105 = arith.cmpi slt, %101, %104 : vector<24x1xi32>
    %c0_i32_90 = arith.constant 0 : i32
    %106 = arith.cmpi slt, %99, %c0_i32_90 : i32
    %107 = vector.broadcast %106 : i1 to vector<24x1xi1>
    %108 = vector.broadcast %107 : vector<24x1xi1> to vector<24x1xi1>
    %109 = arith.xori %105, %108 : vector<24x1xi1>
    %110 = arith.andi %109, %103 : vector<24x1xi1>
    %111 = vector.broadcast %99 : i32 to vector<24x1xi32>
    %112 = arith.addi %101, %111 : vector<24x1xi32>
    %113 = arith.select %110, %112, %101 : vector<24x1xi1>, vector<24x1xi32>
    %c5_i32 = arith.constant 5 : i32
    %114 = vector.broadcast %c5_i32 : i32 to vector<24x1xi32>
    %115 = arith.cmpi slt, %113, %114 : vector<24x1xi32>
    %116 = arith.extui %115 : vector<24x1xi1> to vector<24x1xi32>
    %117 = arith.sitofp %116 : vector<24x1xi32> to vector<24x1xf32>
    %118 = vector.broadcast %117 : vector<24x1xf32> to vector<24x128xf32>
    %119 = arith.mulf %96, %118 : vector<24x128xf32>
    %cst_91 = arith.constant dense<0.000000e+00> : vector<128xf32>
    %120 = vector.multi_reduction <add>, %119, %cst_91 [0] : vector<24x128xf32> to vector<128xf32>
    %121 = vector.shape_cast %120 : vector<128xf32> to vector<1x128xf32>
    %cst_92 = arith.constant 0.0666666701 : f32
    %122 = vector.broadcast %cst_92 : f32 to vector<1x128xf32>
    %123 = arith.mulf %121, %122 : vector<1x128xf32>
    %124 = vector.broadcast %123 : vector<1x128xf32> to vector<24x128xf32>
    %125 = arith.subf %96, %124 : vector<24x128xf32>
    %126 = vector.broadcast %117 : vector<24x1xf32> to vector<24x128xf32>
    %127 = arith.mulf %125, %126 : vector<24x128xf32>
    %128 = arith.mulf %127, %127 : vector<24x128xf32>
    %cst_93 = arith.constant dense<0.000000e+00> : vector<128xf32>
    %129 = vector.multi_reduction <add>, %128, %cst_93 [0] : vector<24x128xf32> to vector<128xf32>
    %130 = vector.shape_cast %129 : vector<128xf32> to vector<1x128xf32>
    %cst_94 = arith.constant 0.0666666701 : f32
    %131 = vector.broadcast %cst_94 : f32 to vector<1x128xf32>
    %132 = arith.mulf %130, %131 : vector<1x128xf32>
    %133 = vector.broadcast %123 : vector<1x128xf32> to vector<24x128xf32>
    %134 = arith.subf %96, %133 : vector<24x128xf32>
    %cst_95 = arith.constant 9.99999974E-6 : f32
    %135 = vector.broadcast %cst_95 : f32 to vector<1x128xf32>
    %136 = arith.addf %132, %135 : vector<1x128xf32>
    %137 = math.rsqrt %136 : vector<1x128xf32>
    %138 = vector.broadcast %137 : vector<1x128xf32> to vector<24x128xf32>
    %139 = arith.mulf %134, %138 : vector<24x128xf32>
    %cst_96 = arith.constant 0.000000e+00 : f32
    %140 = vector.broadcast %cst_96 : f32 to vector<24x128xf32>
    %141 = arith.cmpf oge, %139, %140 : vector<24x128xf32>
    %cst_97 = arith.constant 2.000000e-01 : f32
    %142 = vector.broadcast %cst_97 : f32 to vector<24x128xf32>
    %143 = arith.mulf %142, %139 : vector<24x128xf32>
    %144 = arith.select %141, %139, %143 : vector<24x128xi1>, vector<24x128xf32>
    %145 = arith.truncf %144 : vector<24x128xf32> to vector<24x128xbf16>
    %c0_98 = arith.constant 0 : index
    %c0_99 = arith.constant 0 : index
    %c0_100 = arith.constant 0 : index
    %146 = vector.load %arg5[%c0_98, %c0_99, %c0_100] : memref<1x24x128xbf16, #tpu.memory_space<vmem>>, vector<1x24x128xbf16>
    %147 = vector.shape_cast %146 : vector<1x24x128xbf16> to vector<24x128xbf16>
    %148 = vector.shape_cast %145 : vector<24x128xbf16> to vector<1x24x128xbf16>
    tpu.vector_store %arg5[%c0_98, %c0_99, %c0_100], %148 {strides = array<i32>} : memref<1x24x128xbf16, #tpu.memory_space<vmem>>, vector<1x24x128xbf16>,
    return
  }
  func.func @transform_0(%arg0: i32, %arg1: i32) -> (i32, i32, i32) {
    %c0_i32 = arith.constant 0 : i32
    %c0_i32_0 = arith.constant 0 : i32
    %c0_i32_1 = arith.constant 0 : i32
    return %arg0, %c0_i32, %c0_i32_0 : i32, i32, i32
  }
  func.func @transform_1(%arg0: i32, %arg1: i32) -> (i32, i32, i32) {
    %c0_i32 = arith.constant 0 : i32
    %c0_i32_0 = arith.constant 0 : i32
    %c0_i32_1 = arith.constant 0 : i32
    return %c0_i32, %c0_i32_0, %arg1 : i32, i32, i32
  }
  func.func @transform_2(%arg0: i32, %arg1: i32) -> (i32, i32) {
    %c0_i32 = arith.constant 0 : i32
    %c0_i32_0 = arith.constant 0 : i32
    return %c0_i32, %arg1 : i32, i32
  }
  func.func @transform_3(%arg0: i32, %arg1: i32) -> (i32, i32, i32) {
    %c0_i32 = arith.constant 0 : i32
    %c0_i32_0 = arith.constant 0 : i32
    return %arg0, %c0_i32, %arg1 : i32, i32, i32
  }
}

module attributes {stable_mosaic.version = 11 : i64} {
  func.func @_conv_block_kernel(%arg0: i32, %arg1: i32, %arg2: memref<1x52x64xbf16, #tpu.memory_space<vmem>>, %arg3: memref<16x64x128xbf16, #tpu.memory_space<vmem>>, %arg4: memref<1x128xf32, #tpu.memory_space<vmem>>, %arg5: memref<1x28x128xf32, #tpu.memory_space<vmem>>) attributes {dimension_semantics = [#tpu.dimension_semantics<parallel>, #tpu.dimension_semantics<parallel>], iteration_bounds = array<i64: 2, 1>, scalar_prefetch = 0 : i64, scratch_operands = 0 : i64, tpu.core_type = #tpu.core_type<tc>, window_params = [{transform_indices = @transform_0, window_bounds = array<i64: 1, 52, 64>}, {transform_indices = @transform_1, window_bounds = array<i64: 16, 64, 128>}, {transform_indices = @transform_2, window_bounds = array<i64: 1, 128>}, {transform_indices = @transform_3, window_bounds = array<i64: 1, 28, 128>}]} {
    %cst = arith.constant 0.000000e+00 : f32
    %0 = vector.broadcast %cst : f32 to vector<28x128xf32>
    %c0 = arith.constant 0 : index
    %c0_0 = arith.constant 0 : index
    %c0_1 = arith.constant 0 : index
    %1 = vector.load %arg2[%c0, %c0_0, %c0_1] : memref<1x52x64xbf16, #tpu.memory_space<vmem>>, vector<1x28x64xbf16>
    %2 = vector.shape_cast %1 : vector<1x28x64xbf16> to vector<28x64xbf16>
    %c0_2 = arith.constant 0 : index
    %c0_3 = arith.constant 0 : index
    %c0_4 = arith.constant 0 : index
    %3 = vector.load %arg3[%c0_2, %c0_3, %c0_4] : memref<16x64x128xbf16, #tpu.memory_space<vmem>>, vector<1x64x128xbf16>
    %4 = vector.shape_cast %3 : vector<1x64x128xbf16> to vector<64x128xbf16>
    %cst_5 = arith.constant dense<0.000000e+00> : vector<28x128xf32>
    %5 = tpu.matmul %2, %4, %cst_5 {dimension_numbers = #tpu.dot_dimension_numbers<[1], [0], [0], [1], [0, 0, 1, 1], [], []>} : vector<28x64xbf16>, vector<64x128xbf16>, vector<28x128xf32> -> vector<28x128xf32>
    %6 = arith.addf %0, %5 : vector<28x128xf32>
    %c0_6 = arith.constant 0 : index
    %c1 = arith.constant 1 : index
    %c0_7 = arith.constant 0 : index
    %7 = vector.load %arg2[%c0_6, %c1, %c0_7] : memref<1x52x64xbf16, #tpu.memory_space<vmem>>, vector<1x28x64xbf16>
    %8 = vector.shape_cast %7 : vector<1x28x64xbf16> to vector<28x64xbf16>
    %c1_8 = arith.constant 1 : index
    %c0_9 = arith.constant 0 : index
    %c0_10 = arith.constant 0 : index
    %9 = vector.load %arg3[%c1_8, %c0_9, %c0_10] : memref<16x64x128xbf16, #tpu.memory_space<vmem>>, vector<1x64x128xbf16>
    %10 = vector.shape_cast %9 : vector<1x64x128xbf16> to vector<64x128xbf16>
    %cst_11 = arith.constant dense<0.000000e+00> : vector<28x128xf32>
    %11 = tpu.matmul %8, %10, %cst_11 {dimension_numbers = #tpu.dot_dimension_numbers<[1], [0], [0], [1], [0, 0, 1, 1], [], []>} : vector<28x64xbf16>, vector<64x128xbf16>, vector<28x128xf32> -> vector<28x128xf32>
    %12 = arith.addf %6, %11 : vector<28x128xf32>
    %c0_12 = arith.constant 0 : index
    %c2 = arith.constant 2 : index
    %c0_13 = arith.constant 0 : index
    %13 = vector.load %arg2[%c0_12, %c2, %c0_13] : memref<1x52x64xbf16, #tpu.memory_space<vmem>>, vector<1x28x64xbf16>
    %14 = vector.shape_cast %13 : vector<1x28x64xbf16> to vector<28x64xbf16>
    %c2_14 = arith.constant 2 : index
    %c0_15 = arith.constant 0 : index
    %c0_16 = arith.constant 0 : index
    %15 = vector.load %arg3[%c2_14, %c0_15, %c0_16] : memref<16x64x128xbf16, #tpu.memory_space<vmem>>, vector<1x64x128xbf16>
    %16 = vector.shape_cast %15 : vector<1x64x128xbf16> to vector<64x128xbf16>
    %cst_17 = arith.constant dense<0.000000e+00> : vector<28x128xf32>
    %17 = tpu.matmul %14, %16, %cst_17 {dimension_numbers = #tpu.dot_dimension_numbers<[1], [0], [0], [1], [0, 0, 1, 1], [], []>} : vector<28x64xbf16>, vector<64x128xbf16>, vector<28x128xf32> -> vector<28x128xf32>
    %18 = arith.addf %12, %17 : vector<28x128xf32>
    %c0_18 = arith.constant 0 : index
    %c3 = arith.constant 3 : index
    %c0_19 = arith.constant 0 : index
    %19 = vector.load %arg2[%c0_18, %c3, %c0_19] : memref<1x52x64xbf16, #tpu.memory_space<vmem>>, vector<1x28x64xbf16>
    %20 = vector.shape_cast %19 : vector<1x28x64xbf16> to vector<28x64xbf16>
    %c3_20 = arith.constant 3 : index
    %c0_21 = arith.constant 0 : index
    %c0_22 = arith.constant 0 : index
    %21 = vector.load %arg3[%c3_20, %c0_21, %c0_22] : memref<16x64x128xbf16, #tpu.memory_space<vmem>>, vector<1x64x128xbf16>
    %22 = vector.shape_cast %21 : vector<1x64x128xbf16> to vector<64x128xbf16>
    %cst_23 = arith.constant dense<0.000000e+00> : vector<28x128xf32>
    %23 = tpu.matmul %20, %22, %cst_23 {dimension_numbers = #tpu.dot_dimension_numbers<[1], [0], [0], [1], [0, 0, 1, 1], [], []>} : vector<28x64xbf16>, vector<64x128xbf16>, vector<28x128xf32> -> vector<28x128xf32>
    %24 = arith.addf %18, %23 : vector<28x128xf32>
    %c0_24 = arith.constant 0 : index
    %c7 = arith.constant 7 : index
    %c0_25 = arith.constant 0 : index
    %25 = vector.load %arg2[%c0_24, %c7, %c0_25] : memref<1x52x64xbf16, #tpu.memory_space<vmem>>, vector<1x28x64xbf16>
    %26 = vector.shape_cast %25 : vector<1x28x64xbf16> to vector<28x64xbf16>
    %c4 = arith.constant 4 : index
    %c0_26 = arith.constant 0 : index
    %c0_27 = arith.constant 0 : index
    %27 = vector.load %arg3[%c4, %c0_26, %c0_27] : memref<16x64x128xbf16, #tpu.memory_space<vmem>>, vector<1x64x128xbf16>
    %28 = vector.shape_cast %27 : vector<1x64x128xbf16> to vector<64x128xbf16>
    %cst_28 = arith.constant dense<0.000000e+00> : vector<28x128xf32>
    %29 = tpu.matmul %26, %28, %cst_28 {dimension_numbers = #tpu.dot_dimension_numbers<[1], [0], [0], [1], [0, 0, 1, 1], [], []>} : vector<28x64xbf16>, vector<64x128xbf16>, vector<28x128xf32> -> vector<28x128xf32>
    %30 = arith.addf %24, %29 : vector<28x128xf32>
    %c0_29 = arith.constant 0 : index
    %c8 = arith.constant 8 : index
    %c0_30 = arith.constant 0 : index
    %31 = vector.load %arg2[%c0_29, %c8, %c0_30] : memref<1x52x64xbf16, #tpu.memory_space<vmem>>, vector<1x28x64xbf16>
    %32 = vector.shape_cast %31 : vector<1x28x64xbf16> to vector<28x64xbf16>
    %c5 = arith.constant 5 : index
    %c0_31 = arith.constant 0 : index
    %c0_32 = arith.constant 0 : index
    %33 = vector.load %arg3[%c5, %c0_31, %c0_32] : memref<16x64x128xbf16, #tpu.memory_space<vmem>>, vector<1x64x128xbf16>
    %34 = vector.shape_cast %33 : vector<1x64x128xbf16> to vector<64x128xbf16>
    %cst_33 = arith.constant dense<0.000000e+00> : vector<28x128xf32>
    %35 = tpu.matmul %32, %34, %cst_33 {dimension_numbers = #tpu.dot_dimension_numbers<[1], [0], [0], [1], [0, 0, 1, 1], [], []>} : vector<28x64xbf16>, vector<64x128xbf16>, vector<28x128xf32> -> vector<28x128xf32>
    %36 = arith.addf %30, %35 : vector<28x128xf32>
    %c0_34 = arith.constant 0 : index
    %c9 = arith.constant 9 : index
    %c0_35 = arith.constant 0 : index
    %37 = vector.load %arg2[%c0_34, %c9, %c0_35] : memref<1x52x64xbf16, #tpu.memory_space<vmem>>, vector<1x28x64xbf16>
    %38 = vector.shape_cast %37 : vector<1x28x64xbf16> to vector<28x64xbf16>
    %c6 = arith.constant 6 : index
    %c0_36 = arith.constant 0 : index
    %c0_37 = arith.constant 0 : index
    %39 = vector.load %arg3[%c6, %c0_36, %c0_37] : memref<16x64x128xbf16, #tpu.memory_space<vmem>>, vector<1x64x128xbf16>
    %40 = vector.shape_cast %39 : vector<1x64x128xbf16> to vector<64x128xbf16>
    %cst_38 = arith.constant dense<0.000000e+00> : vector<28x128xf32>
    %41 = tpu.matmul %38, %40, %cst_38 {dimension_numbers = #tpu.dot_dimension_numbers<[1], [0], [0], [1], [0, 0, 1, 1], [], []>} : vector<28x64xbf16>, vector<64x128xbf16>, vector<28x128xf32> -> vector<28x128xf32>
    %42 = arith.addf %36, %41 : vector<28x128xf32>
    %c0_39 = arith.constant 0 : index
    %c10 = arith.constant 10 : index
    %c0_40 = arith.constant 0 : index
    %43 = vector.load %arg2[%c0_39, %c10, %c0_40] : memref<1x52x64xbf16, #tpu.memory_space<vmem>>, vector<1x28x64xbf16>
    %44 = vector.shape_cast %43 : vector<1x28x64xbf16> to vector<28x64xbf16>
    %c7_41 = arith.constant 7 : index
    %c0_42 = arith.constant 0 : index
    %c0_43 = arith.constant 0 : index
    %45 = vector.load %arg3[%c7_41, %c0_42, %c0_43] : memref<16x64x128xbf16, #tpu.memory_space<vmem>>, vector<1x64x128xbf16>
    %46 = vector.shape_cast %45 : vector<1x64x128xbf16> to vector<64x128xbf16>
    %cst_44 = arith.constant dense<0.000000e+00> : vector<28x128xf32>
    %47 = tpu.matmul %44, %46, %cst_44 {dimension_numbers = #tpu.dot_dimension_numbers<[1], [0], [0], [1], [0, 0, 1, 1], [], []>} : vector<28x64xbf16>, vector<64x128xbf16>, vector<28x128xf32> -> vector<28x128xf32>
    %48 = arith.addf %42, %47 : vector<28x128xf32>
    %c0_45 = arith.constant 0 : index
    %c14 = arith.constant 14 : index
    %c0_46 = arith.constant 0 : index
    %49 = vector.load %arg2[%c0_45, %c14, %c0_46] : memref<1x52x64xbf16, #tpu.memory_space<vmem>>, vector<1x28x64xbf16>
    %50 = vector.shape_cast %49 : vector<1x28x64xbf16> to vector<28x64xbf16>
    %c8_47 = arith.constant 8 : index
    %c0_48 = arith.constant 0 : index
    %c0_49 = arith.constant 0 : index
    %51 = vector.load %arg3[%c8_47, %c0_48, %c0_49] : memref<16x64x128xbf16, #tpu.memory_space<vmem>>, vector<1x64x128xbf16>
    %52 = vector.shape_cast %51 : vector<1x64x128xbf16> to vector<64x128xbf16>
    %cst_50 = arith.constant dense<0.000000e+00> : vector<28x128xf32>
    %53 = tpu.matmul %50, %52, %cst_50 {dimension_numbers = #tpu.dot_dimension_numbers<[1], [0], [0], [1], [0, 0, 1, 1], [], []>} : vector<28x64xbf16>, vector<64x128xbf16>, vector<28x128xf32> -> vector<28x128xf32>
    %54 = arith.addf %48, %53 : vector<28x128xf32>
    %c0_51 = arith.constant 0 : index
    %c15 = arith.constant 15 : index
    %c0_52 = arith.constant 0 : index
    %55 = vector.load %arg2[%c0_51, %c15, %c0_52] : memref<1x52x64xbf16, #tpu.memory_space<vmem>>, vector<1x28x64xbf16>
    %56 = vector.shape_cast %55 : vector<1x28x64xbf16> to vector<28x64xbf16>
    %c9_53 = arith.constant 9 : index
    %c0_54 = arith.constant 0 : index
    %c0_55 = arith.constant 0 : index
    %57 = vector.load %arg3[%c9_53, %c0_54, %c0_55] : memref<16x64x128xbf16, #tpu.memory_space<vmem>>, vector<1x64x128xbf16>
    %58 = vector.shape_cast %57 : vector<1x64x128xbf16> to vector<64x128xbf16>
    %cst_56 = arith.constant dense<0.000000e+00> : vector<28x128xf32>
    %59 = tpu.matmul %56, %58, %cst_56 {dimension_numbers = #tpu.dot_dimension_numbers<[1], [0], [0], [1], [0, 0, 1, 1], [], []>} : vector<28x64xbf16>, vector<64x128xbf16>, vector<28x128xf32> -> vector<28x128xf32>
    %60 = arith.addf %54, %59 : vector<28x128xf32>
    %c0_57 = arith.constant 0 : index
    %c16 = arith.constant 16 : index
    %c0_58 = arith.constant 0 : index
    %61 = vector.load %arg2[%c0_57, %c16, %c0_58] : memref<1x52x64xbf16, #tpu.memory_space<vmem>>, vector<1x28x64xbf16>
    %62 = vector.shape_cast %61 : vector<1x28x64xbf16> to vector<28x64xbf16>
    %c10_59 = arith.constant 10 : index
    %c0_60 = arith.constant 0 : index
    %c0_61 = arith.constant 0 : index
    %63 = vector.load %arg3[%c10_59, %c0_60, %c0_61] : memref<16x64x128xbf16, #tpu.memory_space<vmem>>, vector<1x64x128xbf16>
    %64 = vector.shape_cast %63 : vector<1x64x128xbf16> to vector<64x128xbf16>
    %cst_62 = arith.constant dense<0.000000e+00> : vector<28x128xf32>
    %65 = tpu.matmul %62, %64, %cst_62 {dimension_numbers = #tpu.dot_dimension_numbers<[1], [0], [0], [1], [0, 0, 1, 1], [], []>} : vector<28x64xbf16>, vector<64x128xbf16>, vector<28x128xf32> -> vector<28x128xf32>
    %66 = arith.addf %60, %65 : vector<28x128xf32>
    %c0_63 = arith.constant 0 : index
    %c17 = arith.constant 17 : index
    %c0_64 = arith.constant 0 : index
    %67 = vector.load %arg2[%c0_63, %c17, %c0_64] : memref<1x52x64xbf16, #tpu.memory_space<vmem>>, vector<1x28x64xbf16>
    %68 = vector.shape_cast %67 : vector<1x28x64xbf16> to vector<28x64xbf16>
    %c11 = arith.constant 11 : index
    %c0_65 = arith.constant 0 : index
    %c0_66 = arith.constant 0 : index
    %69 = vector.load %arg3[%c11, %c0_65, %c0_66] : memref<16x64x128xbf16, #tpu.memory_space<vmem>>, vector<1x64x128xbf16>
    %70 = vector.shape_cast %69 : vector<1x64x128xbf16> to vector<64x128xbf16>
    %cst_67 = arith.constant dense<0.000000e+00> : vector<28x128xf32>
    %71 = tpu.matmul %68, %70, %cst_67 {dimension_numbers = #tpu.dot_dimension_numbers<[1], [0], [0], [1], [0, 0, 1, 1], [], []>} : vector<28x64xbf16>, vector<64x128xbf16>, vector<28x128xf32> -> vector<28x128xf32>
    %72 = arith.addf %66, %71 : vector<28x128xf32>
    %c0_68 = arith.constant 0 : index
    %c21 = arith.constant 21 : index
    %c0_69 = arith.constant 0 : index
    %73 = vector.load %arg2[%c0_68, %c21, %c0_69] : memref<1x52x64xbf16, #tpu.memory_space<vmem>>, vector<1x28x64xbf16>
    %74 = vector.shape_cast %73 : vector<1x28x64xbf16> to vector<28x64xbf16>
    %c12 = arith.constant 12 : index
    %c0_70 = arith.constant 0 : index
    %c0_71 = arith.constant 0 : index
    %75 = vector.load %arg3[%c12, %c0_70, %c0_71] : memref<16x64x128xbf16, #tpu.memory_space<vmem>>, vector<1x64x128xbf16>
    %76 = vector.shape_cast %75 : vector<1x64x128xbf16> to vector<64x128xbf16>
    %cst_72 = arith.constant dense<0.000000e+00> : vector<28x128xf32>
    %77 = tpu.matmul %74, %76, %cst_72 {dimension_numbers = #tpu.dot_dimension_numbers<[1], [0], [0], [1], [0, 0, 1, 1], [], []>} : vector<28x64xbf16>, vector<64x128xbf16>, vector<28x128xf32> -> vector<28x128xf32>
    %78 = arith.addf %72, %77 : vector<28x128xf32>
    %c0_73 = arith.constant 0 : index
    %c22 = arith.constant 22 : index
    %c0_74 = arith.constant 0 : index
    %79 = vector.load %arg2[%c0_73, %c22, %c0_74] : memref<1x52x64xbf16, #tpu.memory_space<vmem>>, vector<1x28x64xbf16>
    %80 = vector.shape_cast %79 : vector<1x28x64xbf16> to vector<28x64xbf16>
    %c13 = arith.constant 13 : index
    %c0_75 = arith.constant 0 : index
    %c0_76 = arith.constant 0 : index
    %81 = vector.load %arg3[%c13, %c0_75, %c0_76] : memref<16x64x128xbf16, #tpu.memory_space<vmem>>, vector<1x64x128xbf16>
    %82 = vector.shape_cast %81 : vector<1x64x128xbf16> to vector<64x128xbf16>
    %cst_77 = arith.constant dense<0.000000e+00> : vector<28x128xf32>
    %83 = tpu.matmul %80, %82, %cst_77 {dimension_numbers = #tpu.dot_dimension_numbers<[1], [0], [0], [1], [0, 0, 1, 1], [], []>} : vector<28x64xbf16>, vector<64x128xbf16>, vector<28x128xf32> -> vector<28x128xf32>
    %84 = arith.addf %78, %83 : vector<28x128xf32>
    %c0_78 = arith.constant 0 : index
    %c23 = arith.constant 23 : index
    %c0_79 = arith.constant 0 : index
    %85 = vector.load %arg2[%c0_78, %c23, %c0_79] : memref<1x52x64xbf16, #tpu.memory_space<vmem>>, vector<1x28x64xbf16>
    %86 = vector.shape_cast %85 : vector<1x28x64xbf16> to vector<28x64xbf16>
    %c14_80 = arith.constant 14 : index
    %c0_81 = arith.constant 0 : index
    %c0_82 = arith.constant 0 : index
    %87 = vector.load %arg3[%c14_80, %c0_81, %c0_82] : memref<16x64x128xbf16, #tpu.memory_space<vmem>>, vector<1x64x128xbf16>
    %88 = vector.shape_cast %87 : vector<1x64x128xbf16> to vector<64x128xbf16>
    %cst_83 = arith.constant dense<0.000000e+00> : vector<28x128xf32>
    %89 = tpu.matmul %86, %88, %cst_83 {dimension_numbers = #tpu.dot_dimension_numbers<[1], [0], [0], [1], [0, 0, 1, 1], [], []>} : vector<28x64xbf16>, vector<64x128xbf16>, vector<28x128xf32> -> vector<28x128xf32>
    %90 = arith.addf %84, %89 : vector<28x128xf32>
    %c0_84 = arith.constant 0 : index
    %c24 = arith.constant 24 : index
    %c0_85 = arith.constant 0 : index
    %91 = vector.load %arg2[%c0_84, %c24, %c0_85] : memref<1x52x64xbf16, #tpu.memory_space<vmem>>, vector<1x28x64xbf16>
    %92 = vector.shape_cast %91 : vector<1x28x64xbf16> to vector<28x64xbf16>
    %c15_86 = arith.constant 15 : index
    %c0_87 = arith.constant 0 : index
    %c0_88 = arith.constant 0 : index
    %93 = vector.load %arg3[%c15_86, %c0_87, %c0_88] : memref<16x64x128xbf16, #tpu.memory_space<vmem>>, vector<1x64x128xbf16>
    %94 = vector.shape_cast %93 : vector<1x64x128xbf16> to vector<64x128xbf16>
    %cst_89 = arith.constant dense<0.000000e+00> : vector<28x128xf32>
    %95 = tpu.matmul %92, %94, %cst_89 {dimension_numbers = #tpu.dot_dimension_numbers<[1], [0], [0], [1], [0, 0, 1, 1], [], []>} : vector<28x64xbf16>, vector<64x128xbf16>, vector<28x128xf32> -> vector<28x128xf32>
    %96 = arith.addf %90, %95 : vector<28x128xf32>
    %c0_90 = arith.constant 0 : index
    %c0_91 = arith.constant 0 : index
    %97 = vector.load %arg4[%c0_90, %c0_91] : memref<1x128xf32, #tpu.memory_space<vmem>>, vector<1x128xf32>
    %98 = vector.broadcast %97 : vector<1x128xf32> to vector<28x128xf32>
    %99 = arith.addf %96, %98 : vector<28x128xf32>
    %c0_92 = arith.constant 0 : index
    %c0_93 = arith.constant 0 : index
    %c0_94 = arith.constant 0 : index
    %100 = vector.load %arg5[%c0_92, %c0_93, %c0_94] : memref<1x28x128xf32, #tpu.memory_space<vmem>>, vector<1x28x128xf32>
    %101 = vector.shape_cast %100 : vector<1x28x128xf32> to vector<28x128xf32>
    %102 = vector.shape_cast %99 : vector<28x128xf32> to vector<1x28x128xf32>
    tpu.vector_store %arg5[%c0_92, %c0_93, %c0_94], %102 {strides = array<i32>} : memref<1x28x128xf32, #tpu.memory_space<vmem>>, vector<1x28x128xf32>,
    return
  }
  func.func @transform_0(%arg0: i32, %arg1: i32) -> (i32, i32, i32) {
    %c0_i32 = arith.constant 0 : i32
    %c0_i32_0 = arith.constant 0 : i32
    %c0_i32_1 = arith.constant 0 : i32
    return %arg0, %c0_i32, %c0_i32_0 : i32, i32, i32
  }
  func.func @transform_1(%arg0: i32, %arg1: i32) -> (i32, i32, i32) {
    %c0_i32 = arith.constant 0 : i32
    %c0_i32_0 = arith.constant 0 : i32
    %c0_i32_1 = arith.constant 0 : i32
    return %c0_i32, %c0_i32_0, %arg1 : i32, i32, i32
  }
  func.func @transform_2(%arg0: i32, %arg1: i32) -> (i32, i32) {
    %c0_i32 = arith.constant 0 : i32
    %c0_i32_0 = arith.constant 0 : i32
    return %c0_i32, %arg1 : i32, i32
  }
  func.func @transform_3(%arg0: i32, %arg1: i32) -> (i32, i32, i32) {
    %c0_i32 = arith.constant 0 : i32
    %c0_i32_0 = arith.constant 0 : i32
    return %arg0, %c0_i32, %arg1 : i32, i32, i32
  }
}

</mosaic_0001>

<bundles_post_ra>
// kernel: _lambda_.5
= control target key start
LH: loop header
LB: loop body
LE: loop exit
PB: predicated region body
PF: predicated region fallthrough
CT: control target
= control target key end

     0   :  { %s2947_s12 = smov 0   ;;  %s2949_s13 = smov 0   ;;  %s3459_s0 = inlined_call_operand.vmem [shape: bf16[2,290,12], index: 0, kind: input, shape index: {}]   ;;  %s3460_s1 = inlined_call_operand.vmem [shape: bf16[4,12,128], index: 1, kind: input, shape index: {}]   ;;  %s3461_s2 = inlined_call_operand.vmem [shape: f32[1,128], index: 2, kind: input, shape index: {}]   ;;  %s3462_s3 = inlined_call_operand.vmem [shape: bf16[2,272,128], index: 3, kind: output, shape index: {}]  }
   0x1   :  { %s2951_s14 = smov 0  }
   0x2 LB: > { %s25_s15 = sadd.s32 1, %s2919_s13  ;;  %p2190_p0 = scmp.ge.s32.totalorder %s2923_s14, 1  ;;  %s2923_s14 = sphi %s2951_s14, %s13_s14   ;;  %s2919_s13 = sphi %s2949_s13, %s3464_s13   ;;  %s2915_s12 = sphi %s2947_s12, %s3463_s12  }
   0x3   : > { %p27_p1 = scmp.ge.s32.totalorder %s25_s15, 2  ;;  %p168_p2 = scmp.lt.s32.totalorder %s2923_s14, 3 }
   0x5   : > { %s3466_s15 = smov (%p27_p1, %s25_s15), 0  ;;  %p169_p3 = pnand %p2190_p0, %p168_p2 }
   0x6   : > { %vm549_vm0 = vcmask (!%p169_p3), 1045504   ;;  %v2925_v0 = vmov (!%p169_p3), 0.0   ;;  %v2860_v1 = vld [vmem:[%s3460_s1 + $0x8] sm:$0x3f] (!%p169_p3)   ;;  %v2861_v2 = vld [vmem:[%s3460_s1] sm:$0x3f] (!%p169_p3)  }
   0x7   : > { %172 = sbr.rel (%p169_p3) target bundleno = 516 (0x204), region = 32  ;;  %2552 = vmatprep.subr.bf16.mxu0 (!%p169_p3), %v2925_v0  ;;  %2622 = vmatprep.subr.bf16.mxu1 (!%p169_p3), %v2925_v0  ;;  %p202_p4 = scmp.lt.s32.totalorder (!%p169_p3), %s2915_s12, 1  ;;  %v551_v3 = vsel (!%p169_p3), %vm549_vm0, %v2860_v1, 0  ;;  %vm2926_vm1 = vmmov (!%p169_p3), 0   ;;  %v762_v4 = vsel (!%p169_p3), %vm549_vm0, %v2861_v2, 0  ;;  %vm497_vm2 = vcmask (!%p169_p3), 97280  }
   0x8   : > { %2624 = vmatprep.mubr.msk.bf16.mxu1 (!%p169_p3), %vm2926_vm1, %v2925_v0  ;;  %2554 = vmatprep.mubr.msk.bf16.mxu0 (!%p169_p3), %vm2926_vm1, %v2925_v0  ;;  %v2865_v5 = vld [vmem:[%s3460_s1 + $0x18] sm:$0x3f] (!%p169_p3)   ;;  %v2864_v12 = vld [vmem:[%s3460_s1 + $0x10] sm:$0x3f] (!%p169_p3)   ;;  %vm351_vm3 = vsmask.f32 (!%p169_p3), 7424 }
   0x9   : > { %2553 = vmatpush3.bf16.msra.mxu0 (!%p169_p3), %v551_v3  ;;  %2623 = vmatpush3.bf16.msra.mxu1 (!%p169_p3), %v762_v4  ;;  %v1561_v7 = vsel (!%p169_p3), %vm549_vm0, %v2865_v5, 0  ;;  %v1256_v19 = vsel (!%p169_p3), %vm549_vm0, %v2864_v12, 0  ;;  %vm1468_vm4 = vcmask (!%p169_p3), 1046528  }
   0xa   : > { %2692 = vmatprep.subr.bf16.mxu0 (!%p169_p3), %v2925_v0  ;;  %2762 = vmatprep.subr.bf16.mxu1 (!%p169_p3), %v2925_v0 }
   0xe   : > { %s3468_s12 = smov (!%p202_p4, %s2915_s12), 1 }
   0xf   : > { %s2832_s22 = smul.u32 148, %s3468_s12 }
  0x10   : > { %s2833_s30 = smul.u32 136, %s3468_s12 }
  0x11   : > { %s2990_s25 = scalar_lea.vmem %s3459_s0, %s2832_s22 }
  0x12   : > { %v2862_v6 = vld [vmem:[%s2990_s25] sm:$0xff]   ;;  %v2863_v8 = vld [vmem:[%s2990_s25 + $0x8] sm:$0xff]   ;;  %v2866_v13 = vld [vmem:[%s2990_s25 + $0x10] sm:$0xff]   ;;  %s3368_s6 = scalar_lea.vmem %s3462_s3, %s2833_s30 }
  0x13   : > { %2625 = vmatmul.mubr.msk.bf16.vlgmr.msra.gmra.mrb[0].mxu1 %vm497_vm2, %v2862_v6  ;;  %v353_v9 = vshrl.u32 %v2862_v6, 16  ;;  %v355_v10 = vshll.u32 %v2862_v6, 16  ;;  %v360_v11 = vshll.u32 %v2863_v8, 16  ;;  %v364_v17 = vshrl.u32 %v2863_v8, 16  ;;  %v2867_v23 = vld [vmem:[%s2990_s25 + $0x18] sm:$0xff]   ;;  %v2868_v29 = vld [vmem:[%s2990_s25 + $0x20] sm:$0xff]  }
  0x14   : > { %2763 = vmatpush3.bf16.msra.mxu1 %v1561_v7  ;;  %2628 = vmatprep.mubr.msk.bf16.mxu1 %vm2926_vm1, %v2925_v0  ;;  %v368_v18 = vshll.u32 %v2866_v13, 16  ;;  %v372_v25 = vshrl.u32 %v2866_v13, 16  ;;  %v376_v26 = vshll.u32 %v2867_v23, 16  ;;  %v380_v31 = vshrl.u32 %v2867_v23, 16  ;;  %v2869_v35 = vld [vmem:[%s2990_s25 + $0x28] sm:$0xff]   ;;  %v2870_v41 = vld [vmem:[%s2990_s25 + $0x30] sm:$0xff]  }
  0x15   : > { %v357_v14 = vrot.slane %v355_v10, 1  ;;  %v362_v15 = vrot.slane %v360_v11, 1  ;;  %v384_v32 = vshll.u32 %v2868_v29, 16  ;;  %v388_v37 = vshrl.u32 %v2868_v29, 16  ;;  %v2871_v47 = vld [vmem:[%s2990_s25 + $0x38] sm:$0xff]   ;;  %v2872_v53 = vld [vmem:[%s2990_s25 + $0x40] sm:$0xff]  }
  0x16   : > { %v370_v22 = vrot.slane %v368_v18, 1  ;;  %v378_v28 = vrot.slane %v376_v26, 1  ;;  %v392_v38 = vshll.u32 %v2869_v35, 16  ;;  %v396_v43 = vshrl.u32 %v2869_v35, 16  ;;  %v2873_v59 = vld [vmem:[%s2990_s25 + $0x48] sm:$0xff]   ;;  %v2874_v2 = vld [vmem:[%s2990_s25 + $0x50] sm:$0xff]  }
  0x17   : > { %v358_v16 = vor.u32 %v357_v14, %v353_v9  ;;  %v366_v21 = vor.u32 %v364_v17, %v362_v15  ;;  %v386_v34 = vrot.slane %v384_v32, 1  ;;  %v400_v44 = vshll.u32 %v2870_v41, 16  ;;  %v2876_v14 = vld [vmem:[%s2990_s25 + $0x60] sm:$0xff]   ;;  %v2878_v26 = vld [vmem:[%s2990_s25 + $0x70] sm:$0xff]   ;;  %v2879_v32 = vld [vmem:[%s2990_s25 + $0x78] sm:$0xff]  }
  0x18   : > { %v374_v27 = vor.u32 %v372_v25, %v370_v22  ;;  %v382_v33 = vor.u32 %v380_v31, %v378_v28  ;;  %v394_v40 = vrot.slane %v392_v38, 1  ;;  %v404_v49 = vshrl.u32 %v2870_v41, 16  ;;  %v2880_v38 = vld [vmem:[%s2990_s25 + $0x80] sm:$0xff]  }
  0x19   : > { %v363_v20 = vsel %vm351_vm3, %v358_v16, %v362_v15  ;;  %v371_v24 = vsel %vm351_vm3, %v366_v21, %v370_v22  ;;  %v390_v39 = vor.u32 %v388_v37, %v386_v34  ;;  %v402_v46 = vrot.slane %v400_v44, 1  ;;  %v2881_v44 = vld [vmem:[%s2990_s25 + $0x88] ss:$0 sps:$4 sm:$0x11]  }
  0x1a   : > { %2555 = vmatmul.mubr.msk.bf16.vlgmr.msra.gmra.mrb[0].mxu0 %vm497_vm2, %v363_v20  ;;  %v379_v30 = vsel %vm351_vm3, %v374_v27, %v378_v28  ;;  %v387_v36 = vsel %vm351_vm3, %v382_v33, %v386_v34  ;;  %v398_v45 = vor.u32 %v396_v43, %v394_v40  ;;  %v408_v50 = vshll.u32 %v2871_v47, 16  ;;  %v2877_v20 = vld [vmem:[%s2990_s25 + $0x68] sm:$0xff]  }
  0x1b   : > { %2693 = vmatpush3.bf16.msra.mxu0 %v1256_v19  ;;  %2558 = vmatprep.mubr.msk.bf16.mxu0 %vm2926_vm1, %v2925_v0  ;;  %v395_v42 = vsel %vm351_vm3, %v390_v39, %v394_v40  ;;  %v406_v51 = vor.u32 %v404_v49, %v402_v46  ;;  %v412_v55 = vshrl.u32 %v2871_v47, 16  ;;  %v416_v56 = vshll.u32 %v2872_v53, 16 }
  0x1c   : > { %2629 = vmatmul.mubr.msk.bf16.gmra.mrb[4].mxu1 %vm497_vm2, %v2863_v8  ;;  %v403_v48 = vsel %vm351_vm3, %v398_v45, %v402_v46  ;;  %v410_v52 = vrot.slane %v408_v50, 1  ;;  %v420_v61 = vshrl.u32 %v2872_v53, 16  ;;  %v424_v62 = vshll.u32 %v2873_v59, 16  ;;  %v2875_v8 = vld [vmem:[%s2990_s25 + $0x58] sm:$0xff]   ;;  %v933_v45 = vld [vmem:[%s2990_s25 + $0x8] sm:$0xf] }
  0x1d   : > { %2632 = vmatprep.mubr.msk.bf16.mxu1 %vm2926_vm1, %v2925_v0  ;;  %v418_v58 = vrot.slane %v416_v56, 1  ;;  %v428_v4 = vshrl.u32 %v2873_v59, 16  ;;  %v432_v5 = vshll.u32 %v2874_v2, 16  ;;  %v436_v10 = vshrl.u32 %v2874_v2, 16  ;;  %v934_v46 = vld [vmem:[%s2990_s25 + $0xc] sm:$0xf] }
  0x1e   : > { %v411_v54 = vsel %vm351_vm3, %v406_v51, %v410_v52  ;;  %v414_v57 = vor.u32 %v412_v55, %v410_v52  ;;  %v426_v1 = vrot.slane %v424_v62, 1  ;;  %v440_v11 = vshll.u32 %v2875_v8, 16  ;;  %v2883_v52 = vld [vmem:[%s2990_s25 + $0x10] sm:$0xff]  }
  0x1f   : > { %v422_v63 = vor.u32 %v420_v61, %v418_v58  ;;  %v434_v7 = vrot.slane %v432_v5, 1  ;;  %v444_v16 = vshrl.u32 %v2875_v8, 16  ;;  %v448_v17 = vshll.u32 %v2876_v14, 16 }
  0x20   : > { %v419_v60 = vsel %vm351_vm3, %v414_v57, %v418_v58  ;;  %v430_v6 = vor.u32 %v428_v4, %v426_v1  ;;  %v452_v22 = vshrl.u32 %v2876_v14, 16  ;;  %v460_v28 = vshrl.u32 %v2877_v20, 16 }
  0x21   : > { %v427_v3 = vsel %vm351_vm3, %v422_v63, %v426_v1  ;;  %v438_v12 = vor.u32 %v436_v10, %v434_v7  ;;  %v450_v19 = vrot.slane %v448_v17, 1  ;;  %v468_v34 = vshrl.u32 %v2878_v26, 16  ;;  %v2885_v1 = vld [vmem:[%s2990_s25 + $0x18] sm:$0xff]   ;;  %v2887_v17 = vld [vmem:[%s2990_s25 + $0x28] sm:$0xff]  }
  0x22   : > { %2559 = vmatmul.mubr.msk.bf16.gmra.mrb[4].mxu0 %vm497_vm2, %v371_v24  ;;  %v435_v9 = vsel %vm351_vm3, %v430_v6, %v434_v7  ;;  %v476_v40 = vshrl.u32 %v2879_v32, 16  ;;  %v484_v49 = vshrl.u32 %v2880_v38, 16  ;;  %v488_v50 = vshll.u32 %v2881_v44, 16 }
  0x23   : > { %2562 = vmatprep.mubr.msk.bf16.mxu0 %vm2926_vm1, %v2925_v0  ;;  %v454_v24 = vor.u32 %v452_v22, %v450_v19  ;;  %v2251_v51 = vcombine.low %v933_v45, %v934_v46  ;;  %v1470_v58 = vrot.slane %v2883_v52, 1  ;;  %v1067_v62 = vshll.u32 %v2883_v52, 16 }
  0x24   : > { %2633 = vmatmul.mubr.msk.bf16.gmra.mrb[8].mxu1 %vm497_vm2, %v2866_v13  ;;  %v442_v13 = vrot.slane %v440_v11, 1  ;;  %v490_v55 = vrot.slane %v488_v50, 1  ;;  %v1472_v4 = vrot.slane %v2885_v1, 1  ;;  %v1071_v6 = vshrl.u32 %v2883_v52, 16 }
  0x25   : > { %2636 = vmatprep.mubr.msk.bf16.mxu1 %vm2926_vm1, %v2925_v0  ;;  %v1062_v56 = vshll.u32 %v2251_v51, 16  ;;  %v1075_v7 = vshll.u32 %v2885_v1, 16 }
  0x26   : > { %v443_v15 = vsel %vm351_vm3, %v438_v12, %v442_v13  ;;  %v446_v18 = vor.u32 %v444_v16, %v442_v13 }
  0x27   : > { %v1064_v61 = vrot.slane %v1062_v56, 1  ;;  %v1077_v11 = vrot.slane %v1075_v7, 1 }
  0x28   : > { %v451_v21 = vsel %vm351_vm3, %v446_v18, %v450_v19 }
  0x2a   : > { %2563 = vmatmul.mubr.msk.bf16.gmra.mrb[8].mxu0 %vm497_vm2, %v379_v30 }
  0x2b   : > { %2566 = vmatprep.mubr.msk.bf16.mxu0 %vm2926_vm1, %v2925_v0 }
  0x2c   : > { %2637 = vmatmul.mubr.msk.bf16.gmra.mrb[12].mxu1 %vm497_vm2, %v2867_v23  ;;  %v456_v23 = vshll.u32 %v2877_v20, 16 }
  0x2d   : > { %2640 = vmatprep.mubr.msk.bf16.mxu1 %vm2926_vm1, %v2925_v0 }
  0x2e   : > { %v458_v25 = vrot.slane %v456_v23, 1  ;;  %v1091_v23 = vshll.u32 %v2887_v17, 16 }
  0x30   : > { %v459_v27 = vsel %vm351_vm3, %v454_v24, %v458_v25  ;;  %v462_v30 = vor.u32 %v460_v28, %v458_v25  ;;  %v2888_v25 = vld [vmem:[%s2990_s25 + $0x30] sm:$0xff]  }
  0x31   : > { %v1478_v28 = vrot.slane %v2888_v25, 1 }
  0x32   : > { %2567 = vmatmul.mubr.msk.bf16.gmra.mrb[12].mxu0 %vm497_vm2, %v387_v36 }
  0x33   : > { %2570 = vmatprep.mubr.msk.bf16.mxu0 %vm2926_vm1, %v2925_v0 }
  0x34   : > { %2641 = vmatmul.mubr.msk.bf16.gmra.mrb[16].mxu1 %vm497_vm2, %v2868_v29  ;;  %v464_v29 = vshll.u32 %v2878_v26, 16 }
  0x35   : > { %2644 = vmatprep.mubr.msk.bf16.mxu1 %vm2926_vm1, %v2925_v0 }
  0x36   : > { %v466_v31 = vrot.slane %v464_v29, 1 }
  0x38   : > { %v467_v33 = vsel %vm351_vm3, %v462_v30, %v466_v31  ;;  %v470_v36 = vor.u32 %v468_v34, %v466_v31  ;;  %v1095_v30 = vshrl.u32 %v2887_v17, 16  ;;  %v1099_v31 = vshll.u32 %v2888_v25, 16 }
  0x3a   : > { %2571 = vmatmul.mubr.msk.bf16.gmra.mrb[16].mxu0 %vm497_vm2, %v395_v42 }
  0x3b   : > { %2574 = vmatprep.mubr.msk.bf16.mxu0 %vm2926_vm1, %v2925_v0 }
  0x3c   : > { %2645 = vmatmul.mubr.msk.bf16.gmra.mrb[20].mxu1 %vm497_vm2, %v2869_v35  ;;  %v472_v35 = vshll.u32 %v2879_v32, 16 }
  0x3d   : > { %2648 = vmatprep.mubr.msk.bf16.mxu1 %vm2926_vm1, %v2925_v0 }
  0x3e   : > { %v474_v37 = vrot.slane %v472_v35, 1  ;;  %v1101_v35 = vrot.slane %v1099_v31, 1 }
  0x40   : > { %v475_v39 = vsel %vm351_vm3, %v470_v36, %v474_v37  ;;  %v478_v42 = vor.u32 %v476_v40, %v474_v37 }
  0x42   : > { %2575 = vmatmul.mubr.msk.bf16.gmra.mrb[20].mxu0 %vm497_vm2, %v403_v48 }
  0x43   : > { %2578 = vmatprep.mubr.msk.bf16.mxu0 %vm2926_vm1, %v2925_v0 }
  0x44   : > { %2649 = vmatmul.mubr.msk.bf16.gmra.mrb[24].mxu1 %vm497_vm2, %v2870_v41  ;;  %v480_v41 = vshll.u32 %v2880_v38, 16 }
  0x45   : > { %2652 = vmatprep.mubr.msk.bf16.mxu1 %vm2926_vm1, %v2925_v0 }
  0x46   : > { %v482_v43 = vrot.slane %v480_v41, 1  ;;  %v2890_v41 = vld [vmem:[%s2990_s25 + $0x40] sm:$0xff]  }
  0x47   : > { %v1482_v44 = vrot.slane %v2890_v41, 1 }
  0x48   : > { %v483_v48 = vsel %vm351_vm3, %v478_v42, %v482_v43 }
  0x4a   : > { %2579 = vmatmul.mubr.msk.bf16.gmra.mrb[24].mxu0 %vm497_vm2, %v411_v54  ;;  %v486_v54 = vor.u32 %v484_v49, %v482_v43  ;;  %v2891_v49 = vld [vmem:[%s2990_s25 + $0x48] sm:$0xff]  }
  0x4b   : > { %2582 = vmatprep.mubr.msk.bf16.mxu0 %vm2926_vm1, %v2925_v0  ;;  %v1484_v52 = vrot.slane %v2891_v49, 1 }
  0x4c   : > { %2653 = vmatmul.mubr.msk.bf16.gmra.mrb[28].mxu1 %vm497_vm2, %v2871_v47  ;;  %v1461_v47 = vld [vmem:[%s2990_s25 + $0x8] sm:$0xe] }
  0x4d   : > { %2656 = vmatprep.mubr.msk.bf16.mxu1 %vm2926_vm1, %v2925_v0  ;;  %v1485_v56 = vsel %vm1468_vm4, %v1482_v44, %v1484_v52 }
  0x52   : > { %2583 = vmatmul.mubr.msk.bf16.gmra.mrb[28].mxu0 %vm497_vm2, %v419_v60  ;;  %v1060_v60 = vshrl.u32 %v2251_v51, 16 }
  0x53   : > { %2586 = vmatprep.mubr.msk.bf16.mxu0 %vm2926_vm1, %v2925_v0 }
  0x54   : > { %2657 = vmatmul.mubr.msk.bf16.gmra.mrb[32].mxu1 %vm497_vm2, %v2872_v53  ;;  %v2289_v53 = vcombine.low %v1461_v47, %v934_v46  ;;  %v1115_v47 = vshll.u32 %v2890_v41, 16 }
  0x55   : > { %2660 = vmatprep.mubr.msk.bf16.mxu1 %vm2926_vm1, %v2925_v0 }
  0x56   : > { %v1469_v57 = vrot.slane %v2289_v53, 1  ;;  %v1117_v51 = vrot.slane %v1115_v47, 1 }
  0x58   : > { %v1471_v63 = vsel %vm1468_vm4, %v1469_v57, %v1470_v58  ;;  %v2892_v57 = vld [vmem:[%s2990_s25 + $0x50] sm:$0xff]  }
  0x59   : > { %v1135_v7 = vshrl.u32 %v2892_v57, 16 }
  0x5a   : > { %2587 = vmatmul.mubr.msk.bf16.gmra.mrb[32].mxu0 %vm497_vm2, %v427_v3  ;;  %v1069_v3 = vrot.slane %v1067_v62, 1  ;;  %v1127_v62 = vshrl.u32 %v2891_v49, 16 }
  0x5b   : > { %2590 = vmatprep.mubr.msk.bf16.mxu0 %vm2926_vm1, %v2925_v0 }
  0x5c   : > { %2661 = vmatmul.mubr.msk.bf16.gmra.mrb[36].mxu1 %vm497_vm2, %v2873_v59  ;;  %v491_v59 = vsel %vm351_vm3, %v486_v54, %v490_v55  ;;  %v1073_v10 = vor.u32 %v1071_v6, %v1069_v3  ;;  %v1119_v54 = vshrl.u32 %v2890_v41, 16  ;;  %v1123_v55 = vshll.u32 %v2891_v49, 16 }
  0x5d   : > { %2664 = vmatprep.mubr.msk.bf16.mxu1 %vm2926_vm1, %v2925_v0 }
  0x5e   : > { %v1078_v13 = vsel %vm351_vm3, %v1073_v10, %v1077_v11  ;;  %v2894_v10 = vld [vmem:[%s2990_s25 + $0x60] sm:$0xff]  }
  0x62   : > { %2591 = vmatmul.mubr.msk.bf16.gmra.mrb[36].mxu0 %vm497_vm2, %v435_v9  ;;  %v2886_v9 = vld [vmem:[%s2990_s25 + $0x20] sm:$0xff]  }
  0x63   : > { %2594 = vmatprep.mubr.msk.bf16.mxu0 %vm2926_vm1, %v2925_v0  ;;  %v1474_v12 = vrot.slane %v2886_v9, 1  ;;  %v1087_v22 = vshrl.u32 %v2886_v9, 16 }
  0x64   : > { %2665 = vmatmul.mubr.msk.bf16.gmra.mrb[40].mxu1 %vm497_vm2, %v2874_v2  ;;  %v1065_v2 = vor.u32 %v1064_v61, %v1060_v60  ;;  %v1486_v60 = vrot.slane %v2892_v57, 1 }
  0x65   : > { %2668 = vmatprep.mubr.msk.bf16.mxu1 %vm2926_vm1, %v2925_v0  ;;  %v1475_v16 = vsel %vm1468_vm4, %v1472_v4, %v1474_v12 }
  0x66   : > { %v1070_v5 = vsel %vm351_vm3, %v1065_v2, %v1069_v3  ;;  %v2893_v2 = vld [vmem:[%s2990_s25 + $0x58] sm:$0xff]  }
  0x6a   : > { %2595 = vmatmul.mubr.msk.bf16.gmra.mrb[40].mxu0 %vm497_vm2, %v443_v15  ;;  %v1083_v15 = vshll.u32 %v2886_v9, 16 }
  0x6b   : > { %2598 = vmatprep.mubr.msk.bf16.mxu0 %vm2926_vm1, %v2925_v0 }
  0x6c   : > { %2669 = vmatmul.mubr.msk.bf16.gmra.mrb[44].mxu1 %vm497_vm2, %v2875_v8  ;;  %v1473_v8 = vsel %vm1468_vm4, %v1470_v58, %v1472_v4  ;;  %v1085_v19 = vrot.slane %v1083_v15, 1  ;;  %v1121_v58 = vor.u32 %v1119_v54, %v1117_v51 }
  0x6d   : > { %2672 = vmatprep.mubr.msk.bf16.mxu1 %vm2926_vm1, %v2925_v0 }
  0x72   : > { %2599 = vmatmul.mubr.msk.bf16.gmra.mrb[44].mxu0 %vm497_vm2, %v451_v21 }
  0x73   : > { %2602 = vmatprep.mubr.msk.bf16.mxu0 %vm2926_vm1, %v2925_v0 }
  0x74   : > { %2673 = vmatmul.mubr.msk.bf16.gmra.mrb[48].mxu1 %vm497_vm2, %v2876_v14  ;;  %v1079_v14 = vshrl.u32 %v2885_v1, 16  ;;  %v1487_v1 = vsel %vm1468_vm4, %v1484_v52, %v1486_v60 }
  0x75   : > { %2676 = vmatprep.mubr.msk.bf16.mxu1 %vm2926_vm1, %v2925_v0 }
  0x76   : > { %v1081_v18 = vor.u32 %v1079_v14, %v1077_v11 }
  0x78   : > { %v1086_v21 = vsel %vm351_vm3, %v1081_v18, %v1085_v19  ;;  %v1147_v18 = vshll.u32 %v2894_v10, 16 }
  0x7a   : > { %2603 = vmatmul.mubr.msk.bf16.gmra.mrb[48].mxu0 %vm497_vm2, %v459_v27  ;;  %v1093_v27 = vrot.slane %v1091_v23, 1 }
  0x7b   : > { %2606 = vmatprep.mubr.msk.bf16.mxu0 %vm2926_vm1, %v2925_v0 }
  0x7c   : > { %2677 = vmatmul.mubr.msk.bf16.gmra.mrb[52].mxu1 %vm497_vm2, %v2877_v20  ;;  %v1476_v20 = vrot.slane %v2887_v17, 1  ;;  %v1097_v34 = vor.u32 %v1095_v30, %v1093_v27  ;;  %v1143_v17 = vshrl.u32 %v2893_v2, 16 }
  0x7d   : > { %2680 = vmatprep.mubr.msk.bf16.mxu1 %vm2926_vm1, %v2925_v0 }
  0x7e   : > { %v1477_v24 = vsel %vm1468_vm4, %v1474_v12, %v1476_v20  ;;  %v1102_v37 = vsel %vm351_vm3, %v1097_v34, %v1101_v35 }
  0x82   : > { %2607 = vmatmul.mubr.msk.bf16.gmra.mrb[52].mxu0 %vm497_vm2, %v467_v33  ;;  %v2889_v33 = vld [vmem:[%s2990_s25 + $0x38] sm:$0xff]  }
  0x83   : > { %2610 = vmatprep.mubr.msk.bf16.mxu0 %vm2926_vm1, %v2925_v0  ;;  %v1480_v36 = vrot.slane %v2889_v33, 1  ;;  %v1111_v46 = vshrl.u32 %v2889_v33, 16 }
  0x84   : > { %2681 = vmatmul.mubr.msk.bf16.gmra.mrb[56].mxu1 %vm497_vm2, %v2878_v26  ;;  %v1089_v26 = vor.u32 %v1087_v22, %v1085_v19  ;;  %v2895_v22 = vld [vmem:[%s2990_s25 + $0x68] sm:$0xff]  }
  0x85   : > { %2684 = vmatprep.mubr.msk.bf16.mxu1 %vm2926_vm1, %v2925_v0  ;;  %v1481_v40 = vsel %vm1468_vm4, %v1478_v28, %v1480_v36 }
  0x86   : > { %v1094_v29 = vsel %vm351_vm3, %v1089_v26, %v1093_v27  ;;  %v1492_v26 = vrot.slane %v2895_v22, 1 }
  0x8a   : > { %2611 = vmatmul.mubr.msk.bf16.gmra.mrb[56].mxu0 %vm497_vm2, %v475_v39  ;;  %v1107_v39 = vshll.u32 %v2889_v33, 16  ;;  %v1155_v33 = vshll.u32 %v2895_v22, 16 }
  0x8b   : > { %2614 = vmatprep.mubr.msk.bf16.mxu0 %vm2926_vm1, %v2925_v0 }
  0x8c   : > { %2685 = vmatmul.mubr.msk.bf16.gmra.mrb[60].mxu1 %vm497_vm2, %v2879_v32  ;;  %v1479_v32 = vsel %vm1468_vm4, %v1476_v20, %v1478_v28  ;;  %v1109_v43 = vrot.slane %v1107_v39, 1  ;;  %v2896_v39 = vld [vmem:[%s2990_s25 + $0x70] sm:$0xff]  }
  0x8d   : > { %2688 = vmatprep.mubr.msk.bf16.mxu1 %vm2926_vm1, %v2925_v0 }
  0x8e   : > { %v1113_v50 = vor.u32 %v1111_v46, %v1109_v43 }
  0x90   : > { %v1118_v53 = vsel %vm351_vm3, %v1113_v50, %v1117_v51  ;;  %v1159_v50 = vshrl.u32 %v2895_v22, 16  ;;  %v1163_v51 = vshll.u32 %v2896_v39, 16 }
  0x92   : > { %2615 = vmatmul.mubr.msk.bf16.gmra.mrb[60].mxu0 %vm497_vm2, %v483_v48  ;;  %v1483_v48 = vsel %vm1468_vm4, %v1480_v36, %v1482_v44  ;;  %v1494_v44 = vrot.slane %v2896_v39, 1 }
  0x93   : > { %2618 = vmatprep.mubr.msk.bf16.mxu0 %vm2926_vm1, %v2925_v0 }
  0x94   : > { %2689 = vmatmul.mubr.msk.bf16.gmra.mrb[64].mxu1 %vm497_vm2, %v2880_v38  ;;  %v1103_v38 = vshrl.u32 %v2888_v25, 16 }
  0x95   : > { %2764 = vmatprep.mubr.msk.bf16.mxu1 %vm2926_vm1, %v2925_v0 }
  0x96   : > { %v1105_v42 = vor.u32 %v1103_v38, %v1101_v35 }
  0x98   : > { %v1110_v45 = vsel %vm351_vm3, %v1105_v42, %v1109_v43  ;;  %v1157_v42 = vrot.slane %v1155_v33, 1 }
  0x9a   : > { %2619 = vmatmul.mubr.msk.bf16.gmra.mrb[64].mxu0 %vm497_vm2, %v491_v59  ;;  %v1125_v59 = vrot.slane %v1123_v55, 1 }
  0x9b   : > { %2694 = vmatprep.mubr.msk.bf16.mxu0 %vm2926_vm1, %v2925_v0 }
  0x9c   : > { %2765 = vmatmul.mubr.msk.bf16.vlgmr.msra.gmra.mrb[68].mxu1 %vm497_vm2, %v1471_v63  ;;  %v1126_v61 = vsel %vm351_vm3, %v1121_v58, %v1125_v59  ;;  %v1131_v63 = vshll.u32 %v2892_v57, 16  ;;  %v1129_v3 = vor.u32 %v1127_v62, %v1125_v59  ;;  %v2897_v57 = vld [vmem:[%s2990_s25 + $0x78] sm:$0xff]   ;;  %v1161_v59 = vor.u32 %v1159_v50, %v1157_v42 }
  0x9d   : > { %2768 = vmatprep.mubr.msk.bf16.mxu1 %vm2926_vm1, %v2925_v0  ;;  %v1496_v62 = vrot.slane %v2897_v57, 1 }
  0x9e   : > { %v1133_v4 = vrot.slane %v1131_v63, 1 }
  0xa0   : > { %v1134_v6 = vsel %vm351_vm3, %v1129_v3, %v1133_v4  ;;  %v1137_v11 = vor.u32 %v1135_v7, %v1133_v4 }
  0xa2   : > { %2695 = vmatmul.mubr.msk.bf16.vlgmr.msra.gmra.mrb[68].mxu0 %vm497_vm2, %v1070_v5  ;;  %v1488_v5 = vrot.slane %v2893_v2, 1 }
  0xa3   : > { %2698 = vmatprep.mubr.msk.bf16.mxu0 %vm2926_vm1, %v2925_v0 }
  0xa4   : > { %2769 = vmatmul.mubr.msk.bf16.gmra.mrb[72].mxu1 %vm497_vm2, %v1473_v8  ;;  %v1139_v8 = vshll.u32 %v2893_v2, 16  ;;  %v1489_v9 = vsel %vm1468_vm4, %v1486_v60, %v1488_v5  ;;  %v1165_v60 = vrot.slane %v1163_v51, 1  ;;  %v2900_v51 = vld [vmem:[%s2990_s25 + $0x90] ss:$0 sps:$4 sm:$0x11]  }
  0xa5   : > { %2772 = vmatprep.mubr.msk.bf16.mxu1 %vm2926_vm1, %v2925_v0 }
  0xa6   : > { %v1141_v12 = vrot.slane %v1139_v8, 1  ;;  %v1166_v3 = vsel %vm351_vm3, %v1161_v59, %v1165_v60 }
  0xa8   : > { %v1142_v15 = vsel %vm351_vm3, %v1137_v11, %v1141_v12  ;;  %v1145_v23 = vor.u32 %v1143_v17, %v1141_v12  ;;  %v1497_v11 = vsel %vm1468_vm4, %v1494_v44, %v1496_v62  ;;  %v2898_v12 = vld [vmem:[%s2990_s25 + $0x80] sm:$0xff]  }
  0xa9   : > { %v1498_v17 = vrot.slane %v2898_v12, 1 }
  0xaa   : > { %2699 = vmatmul.mubr.msk.bf16.gmra.mrb[72].mxu0 %vm497_vm2, %v1078_v13  ;;  %v1490_v13 = vrot.slane %v2894_v10, 1 }
  0xab   : > { %2702 = vmatprep.mubr.msk.bf16.mxu0 %vm2926_vm1, %v2925_v0 }
  0xac   : > { %2773 = vmatmul.mubr.msk.bf16.gmra.mrb[76].mxu1 %vm497_vm2, %v1475_v16  ;;  %v1493_v38 = vsel %vm1468_vm4, %v1490_v13, %v1492_v26 }
  0xad   : > { %2776 = vmatprep.mubr.msk.bf16.mxu1 %vm2926_vm1, %v2925_v0 }
  0xb2   : > { %2703 = vmatmul.mubr.msk.bf16.gmra.mrb[76].mxu0 %vm497_vm2, %v1086_v21  ;;  %v1491_v21 = vsel %vm1468_vm4, %v1488_v5, %v1490_v13  ;;  %v1167_v5 = vshrl.u32 %v2896_v39, 16 }
  0xb3   : > { %2706 = vmatprep.mubr.msk.bf16.mxu0 %vm2926_vm1, %v2925_v0 }
  0xb4   : > { %2777 = vmatmul.mubr.msk.bf16.gmra.mrb[80].mxu1 %vm497_vm2, %v1477_v24  ;;  %v1149_v24 = vrot.slane %v1147_v18, 1 }
  0xb5   : > { %2780 = vmatprep.mubr.msk.bf16.mxu1 %vm2926_vm1, %v2925_v0 }
  0xb6   : > { %v1150_v30 = vsel %vm351_vm3, %v1145_v23, %v1149_v24  ;;  %v1175_v23 = vshrl.u32 %v2897_v57, 16 }
  0xba   : > { %2707 = vmatmul.mubr.msk.bf16.gmra.mrb[80].mxu0 %vm497_vm2, %v1094_v29 }
  0xbb   : > { %2710 = vmatprep.mubr.msk.bf16.mxu0 %vm2926_vm1, %v2925_v0 }
  0xbc   : > { %2781 = vmatmul.mubr.msk.bf16.gmra.mrb[84].mxu1 %vm497_vm2, %v1479_v32  ;;  %v1151_v32 = vshrl.u32 %v2894_v10, 16 }
  0xbd   : > { %2784 = vmatprep.mubr.msk.bf16.mxu1 %vm2926_vm1, %v2925_v0 }
  0xbe   : > { %v1153_v41 = vor.u32 %v1151_v32, %v1149_v24  ;;  %v1179_v24 = vshll.u32 %v2898_v12, 16 }
  0xc2   : > { %2711 = vmatmul.mubr.msk.bf16.gmra.mrb[84].mxu0 %vm497_vm2, %v1102_v37 }
  0xc3   : > { %2714 = vmatprep.mubr.msk.bf16.mxu0 %vm2926_vm1, %v2925_v0 }
  0xc4   : > { %2785 = vmatmul.mubr.msk.bf16.gmra.mrb[88].mxu1 %vm497_vm2, %v1481_v40 }
  0xc5   : > { %2788 = vmatprep.mubr.msk.bf16.mxu1 %vm2926_vm1, %v2925_v0 }
  0xca   : > { %2715 = vmatmul.mubr.msk.bf16.gmra.mrb[88].mxu0 %vm497_vm2, %v1110_v45 }
  0xcb   : > { %2718 = vmatprep.mubr.msk.bf16.mxu0 %vm2926_vm1, %v2925_v0 }
  0xcc   : > { %2789 = vmatmul.mubr.msk.bf16.gmra.mrb[92].mxu1 %vm497_vm2, %v1483_v48  ;;  %v1158_v48 = vsel %vm351_vm3, %v1153_v41, %v1157_v42 }
  0xcd   : > { %2792 = vmatprep.mubr.msk.bf16.mxu1 %vm2926_vm1, %v2925_v0 }
  0xd2   : > { %2719 = vmatmul.mubr.msk.bf16.gmra.mrb[92].mxu0 %vm497_vm2, %v1118_v53 }
  0xd3   : > { %2722 = vmatprep.mubr.msk.bf16.mxu0 %vm2926_vm1, %v2925_v0 }
  0xd4   : > { %2793 = vmatmul.mubr.msk.bf16.gmra.mrb[96].mxu1 %vm497_vm2, %v1485_v56  ;;  %v1495_v56 = vsel %vm1468_vm4, %v1492_v26, %v1494_v44 }
  0xd5   : > { %2796 = vmatprep.mubr.msk.bf16.mxu1 %vm2926_vm1, %v2925_v0 }
  0xda   : > { %2723 = vmatmul.mubr.msk.bf16.gmra.mrb[96].mxu0 %vm497_vm2, %v1126_v61 }
  0xdb   : > { %2726 = vmatprep.mubr.msk.bf16.mxu0 %vm2926_vm1, %v2925_v0 }
  0xdc   : > { %2797 = vmatmul.mubr.msk.bf16.gmra.mrb[100].mxu1 %vm497_vm2, %v1487_v1 }
  0xdd   : > { %2800 = vmatprep.mubr.msk.bf16.mxu1 %vm2926_vm1, %v2925_v0 }
  0xe2   : > { %2727 = vmatmul.mubr.msk.bf16.gmra.mrb[100].mxu0 %vm497_vm2, %v1134_v6  ;;  %v1171_v6 = vshll.u32 %v2897_v57, 16  ;;  %v1502_v57 = vrot.slane %v2900_v51, 1 }
  0xe3   : > { %2730 = vmatprep.mubr.msk.bf16.mxu0 %vm2926_vm1, %v2925_v0 }
  0xe4   : > { %2801 = vmatmul.mubr.msk.bf16.gmra.mrb[104].mxu1 %vm497_vm2, %v1489_v9 }
  0xe5   : > { %2804 = vmatprep.mubr.msk.bf16.mxu1 %vm2926_vm1, %v2925_v0 }
  0xe6   : > { %v798_v14 = vpop.f32.mrb[0].mxu1 }
  0xe7   : > { %v2626_v16 = vpop.f32.mrb[1].mxu1 }
  0xe8   : > { %v801_v19 = vpop.f32.mrb[2].mxu1 }
  0xe9   : > { %v2627_v20 = vpop.f32.mrb[3].mxu1 }
  0xea   : > { %2731 = vmatmul.mubr.msk.bf16.gmra.mrb[104].mxu0 %vm497_vm2, %v1142_v15  ;;  %v1173_v15 = vrot.slane %v1171_v6, 1 }
  0xeb   : > { %2734 = vmatprep.mubr.msk.bf16.mxu0 %vm2926_vm1, %v2925_v0 }
  0xec   : > { %2805 = vmatmul.mubr.msk.bf16.gmra.mrb[108].mxu1 %vm497_vm2, %v1491_v21  ;;  %v1177_v33 = vor.u32 %v1175_v23, %v1173_v15 }
  0xed   : > { %v587_v25 = vpop.f32.mrb[0].mxu0  ;;  %2808 = vmatprep.mubr.msk.bf16.mxu1 %vm2926_vm1, %v2925_v0 }
  0xee   : > { %v3233_v27 = vadd.f32 %v798_v14, %v587_v25  ;;  %v2556_v28 = vpop.f32.mrb[1].mxu0  ;;  %v1169_v14 = vor.u32 %v1167_v5, %v1165_v60 }
  0xef   : > { %v590_v29 = vpop.f32.mrb[2].mxu0  ;;  %v806_v31 = vpop.f32.mrb[4].mxu1 }
  0xf0   : > { %v3236_v34 = vadd.f32 %v801_v19, %v590_v29  ;;  %v2557_v35 = vpop.f32.mrb[3].mxu0  ;;  %v2630_v36 = vpop.f32.mrb[5].mxu1  ;;  %v1174_v21 = vsel %vm351_vm3, %v1169_v14, %v1173_v15 }
  0xf1   : > { %v809_v37 = vpop.f32.mrb[6].mxu1  ;;  %v1181_v35 = vrot.slane %v1179_v24, 1 }
  0xf2   : > { %2735 = vmatmul.mubr.msk.bf16.gmra.mrb[108].mxu0 %vm497_vm2, %v1150_v30  ;;  %v2631_v40 = vpop.f32.mrb[7].mxu1  ;;  %v1499_v30 = vsel %vm1468_vm4, %v1496_v62, %v1498_v17 }
  0xf3   : > { %2738 = vmatprep.mubr.msk.bf16.mxu0 %vm2926_vm1, %v2925_v0  ;;  %v1182_v41 = vsel %vm351_vm3, %v1177_v33, %v1181_v35 }
  0xf4   : > { %2809 = vmatmul.mubr.msk.bf16.gmra.mrb[112].mxu1 %vm497_vm2, %v1493_v38 }
  0xf5   : > { %v595_v43 = vpop.f32.mrb[4].mxu0  ;;  %2812 = vmatprep.mubr.msk.bf16.mxu1 %vm2926_vm1, %v2925_v0 }
  0xf6   : > { %v3246_v45 = vadd.f32 %v806_v31, %v595_v43  ;;  %v2560_v46 = vpop.f32.mrb[5].mxu0  ;;  %v2899_v31 = vld [vmem:[%s2990_s25 + $0x88] sm:$0xff]   ;;  %v1183_v43 = vshrl.u32 %v2898_v12, 16 }
  0xf7   : > { %v598_v47 = vpop.f32.mrb[6].mxu0  ;;  %v814_v49 = vpop.f32.mrb[8].mxu1  ;;  %v1187_v44 = vshll.u32 %v2899_v31, 16 }
  0xf8   : > { %v3249_v52 = vadd.f32 %v809_v37, %v598_v47  ;;  %v2561_v53 = vpop.f32.mrb[7].mxu0  ;;  %v2634_v54 = vpop.f32.mrb[9].mxu1  ;;  %v1500_v37 = vrot.slane %v2899_v31, 1 }
  0xf9   : > { %v817_v55 = vpop.f32.mrb[10].mxu1  ;;  %v1185_v54 = vor.u32 %v1183_v43, %v1181_v35 }
  0xfa   : > { %2739 = vmatmul.mubr.msk.bf16.gmra.mrb[112].mxu0 %vm497_vm2, %v1158_v48  ;;  %v2635_v58 = vpop.f32.mrb[11].mxu1  ;;  %v1501_v50 = vsel %vm1468_vm4, %v1498_v17, %v1500_v37 }
  0xfb   : > { %2742 = vmatprep.mubr.msk.bf16.mxu0 %vm2926_vm1, %v2925_v0 }
  0xfc   : > { %2813 = vmatmul.mubr.msk.bf16.gmra.mrb[116].mxu1 %vm497_vm2, %v1495_v56 }
  0xfd   : > { %v603_v61 = vpop.f32.mrb[8].mxu0  ;;  %2816 = vmatprep.mubr.msk.bf16.mxu1 %vm2926_vm1, %v2925_v0 }
  0xfe   : > { %v3259_v63 = vadd.f32 %v814_v49, %v603_v61  ;;  %v2564_v1 = vpop.f32.mrb[9].mxu0 }
  0xff   : > { %v606_v2 = vpop.f32.mrb[10].mxu0  ;;  %v822_v4 = vpop.f32.mrb[12].mxu1  ;;  %v1191_v1 = vshrl.u32 %v2899_v31, 16 }
 0x100   : > { %v3262_v7 = vadd.f32 %v817_v55, %v606_v2  ;;  %v2565_v8 = vpop.f32.mrb[11].mxu0  ;;  %v2638_v9 = vpop.f32.mrb[13].mxu1  ;;  %v1189_v55 = vrot.slane %v1187_v44, 1  ;;  %v1195_v2 = vshll.u32 %v2900_v51, 16 }
 0x101   : > { %v825_v10 = vpop.f32.mrb[14].mxu1  ;;  %v1503_v8 = vsel %vm1468_vm4, %v1500_v37, %v1502_v57 }
 0x102   : > { %2743 = vmatmul.mubr.msk.bf16.gmra.mrb[116].mxu0 %vm497_vm2, %v1166_v3  ;;  %v2639_v13 = vpop.f32.mrb[15].mxu1  ;;  %v1190_v61 = vsel %vm351_vm3, %v1185_v54, %v1189_v55 }
 0x103   : > { %2746 = vmatprep.mubr.msk.bf16.mxu0 %vm2926_vm1, %v2925_v0 }
 0x104   : > { %2817 = vmatmul.mubr.msk.bf16.gmra.mrb[120].mxu1 %vm497_vm2, %v1497_v11  ;;  %v1197_v11 = vrot.slane %v1195_v2, 1 }
 0x105   : > { %v611_v16 = vpop.f32.mrb[12].mxu0  ;;  %2820 = vmatprep.mubr.msk.bf16.mxu1 %vm2926_vm1, %v2925_v0 }
 0x106   : > { %v3272_v18 = vadd.f32 %v822_v4, %v611_v16  ;;  %v2568_v19 = vpop.f32.mrb[13].mxu0 }
 0x107   : > { %v614_v20 = vpop.f32.mrb[14].mxu0  ;;  %v830_v22 = vpop.f32.mrb[16].mxu1 }
 0x108   : > { %v3275_v25 = vadd.f32 %v825_v10, %v614_v20  ;;  %v2569_v26 = vpop.f32.mrb[15].mxu0  ;;  %v2642_v28 = vpop.f32.mrb[17].mxu1  ;;  %v1193_v10 = vor.u32 %v1191_v1, %v1189_v55 }
 0x109   : > { %v833_v29 = vpop.f32.mrb[18].mxu1 }
 0x10a   : > { %2747 = vmatmul.mubr.msk.bf16.gmra.mrb[120].mxu0 %vm497_vm2, %v1174_v21  ;;  %v2643_v32 = vpop.f32.mrb[19].mxu1  ;;  %v1198_v16 = vsel %vm351_vm3, %v1193_v10, %v1197_v11 }
 0x10b   : > { %2750 = vmatprep.mubr.msk.bf16.mxu0 %vm2926_vm1, %v2925_v0 }
 0x10c   : > { %2821 = vmatmul.mubr.msk.bf16.gmra.mrb[124].mxu1 %vm497_vm2, %v1499_v30 }
 0x10d   : > { %v619_v36 = vpop.f32.mrb[16].mxu0  ;;  %2824 = vmatprep.mubr.msk.bf16.mxu1 %vm2926_vm1, %v2925_v0 }
 0x10e   : > { %v3285_v38 = vadd.f32 %v830_v22, %v619_v36  ;;  %v2572_v39 = vpop.f32.mrb[17].mxu0 }
 0x10f   : > { %v622_v40 = vpop.f32.mrb[18].mxu0  ;;  %v838_v42 = vpop.f32.mrb[20].mxu1 }
 0x110   : > { %v3288_v46 = vadd.f32 %v833_v29, %v622_v40  ;;  %v2573_v47 = vpop.f32.mrb[19].mxu0  ;;  %v2646_v48 = vpop.f32.mrb[21].mxu1 }
 0x111   : > { %v841_v49 = vpop.f32.mrb[22].mxu1 }
 0x112   : > { %2751 = vmatmul.mubr.msk.bf16.gmra.mrb[124].mxu0 %vm497_vm2, %v1182_v41  ;;  %v2647_v53 = vpop.f32.mrb[23].mxu1 }
 0x113   : > { %2754 = vmatprep.mubr.msk.bf16.mxu0 %vm2926_vm1, %v2925_v0 }
 0x114   : > { %2825 = vmatmul.mubr.msk.bf16.gmra.mrb[128].mxu1 %vm497_vm2, %v1501_v50 }
 0x115   : > { %v627_v56 = vpop.f32.mrb[20].mxu0  ;;  %2828 = vmatprep.mubr.msk.bf16.mxu1 %vm2926_vm1, %v2925_v0 }
 0x116   : > { %v3298_v58 = vadd.f32 %v838_v42, %v627_v56  ;;  %v2576_v59 = vpop.f32.mrb[21].mxu0 }
 0x117   : > { %v630_v60 = vpop.f32.mrb[22].mxu0  ;;  %v846_v62 = vpop.f32.mrb[24].mxu1 }
 0x118   : > { %v3301_v3 = vadd.f32 %v841_v49, %v630_v60  ;;  %v2577_v4 = vpop.f32.mrb[23].mxu0  ;;  %v2650_v5 = vpop.f32.mrb[25].mxu1 }
 0x119   : > { %v849_v6 = vpop.f32.mrb[26].mxu1 }
 0x11a   : > { %2755 = vmatmul.mubr.msk.bf16.gmra.mrb[128].mxu0 %vm497_vm2, %v1190_v61  ;;  %v2651_v9 = vpop.f32.mrb[27].mxu1 }
 0x11b   : > { %2758 = vmatprep.mubr.msk.bf16.mxu0 %vm2926_vm1, %v2925_v0 }
 0x11c   : > { %2829 = vmatmul.mubr.msk.bf16.gmra.mrb[132].mxu1 %vm497_vm2, %v1503_v8 }
 0x11d   : > { %v635_v12 = vpop.f32.mrb[24].mxu0 }
 0x11e   : > { %v3308_v13 = vadd.f32 %v846_v62, %v635_v12  ;;  %v2580_v14 = vpop.f32.mrb[25].mxu0 }
 0x11f   : > { %v638_v15 = vpop.f32.mrb[26].mxu0  ;;  %v854_v17 = vpop.f32.mrb[28].mxu1 }
 0x120   : > { %v3311_v19 = vadd.f32 %v849_v6, %v638_v15  ;;  %v2581_v20 = vpop.f32.mrb[27].mxu0  ;;  %v2654_v21 = vpop.f32.mrb[29].mxu1 }
 0x121   : > { %v857_v22 = vpop.f32.mrb[30].mxu1 }
 0x122   : > { %2759 = vmatmul.mubr.msk.bf16.gmra.mrb[132].mxu0 %vm497_vm2, %v1198_v16  ;;  %v2655_v0 = vpop.f32.mrb[31].mxu1 }
 0x125   : > { %v643_v23 = vpop.f32.mrb[28].mxu0 }
 0x126   : > { %v3314_v24 = vadd.f32 %v854_v17, %v643_v23  ;;  %v2584_v26 = vpop.f32.mrb[29].mxu0 }
 0x127   : > { %v646_v28 = vpop.f32.mrb[30].mxu0  ;;  %v862_v29 = vpop.f32.mrb[32].mxu1 }
 0x128   : > { %v3316_v30 = vadd.f32 %v857_v22, %v646_v28  ;;  %v2585_v31 = vpop.f32.mrb[31].mxu0  ;;  %v2658_v32 = vpop.f32.mrb[33].mxu1 }
 0x129   : > { %v865_v33 = vpop.f32.mrb[34].mxu1 }
 0x12a   : > { %v2659_v35 = vpop.f32.mrb[35].mxu1 }
 0x12d   : > { %v651_v36 = vpop.f32.mrb[32].mxu0 }
 0x12e   : > { %v3318_v37 = vadd.f32 %v862_v29, %v651_v36  ;;  %v2588_v39 = vpop.f32.mrb[33].mxu0 }
 0x12f   : > { %v654_v40 = vpop.f32.mrb[34].mxu0  ;;  %v870_v41 = vpop.f32.mrb[36].mxu1 }
 0x130   : > { %v3320_v42 = vadd.f32 %v865_v33, %v654_v40  ;;  %v2589_v43 = vpop.f32.mrb[35].mxu0  ;;  %v2662_v44 = vpop.f32.mrb[37].mxu1 }
 0x131   : > { %v873_v47 = vpop.f32.mrb[38].mxu1 }
 0x132   : > { %v2663_v48 = vpop.f32.mrb[39].mxu1 }
 0x135   : > { %v659_v49 = vpop.f32.mrb[36].mxu0 }
 0x136   : > { %v3322_v50 = vadd.f32 %v870_v41, %v659_v49  ;;  %v2592_v51 = vpop.f32.mrb[37].mxu0 }
 0x137   : > { %v662_v53 = vpop.f32.mrb[38].mxu0  ;;  %v878_v54 = vpop.f32.mrb[40].mxu1 }
 0x138   : > { %v3324_v55 = vadd.f32 %v873_v47, %v662_v53  ;;  %v2593_v56 = vpop.f32.mrb[39].mxu0  ;;  %v2666_v57 = vpop.f32.mrb[41].mxu1 }
 0x139   : > { %v881_v59 = vpop.f32.mrb[42].mxu1 }
 0x13a   : > { %v2667_v60 = vpop.f32.mrb[43].mxu1 }
 0x13d   : > { %v667_v61 = vpop.f32.mrb[40].mxu0 }
 0x13e   : > { %v3326_v62 = vadd.f32 %v878_v54, %v667_v61  ;;  %v2596_v1 = vpop.f32.mrb[41].mxu0 }
 0x13f   : > { %v670_v2 = vpop.f32.mrb[42].mxu0  ;;  %v886_v4 = vpop.f32.mrb[44].mxu1 }
 0x140   : > { %v3328_v5 = vadd.f32 %v881_v59, %v670_v2  ;;  %v2597_v6 = vpop.f32.mrb[43].mxu0  ;;  %v2670_v8 = vpop.f32.mrb[45].mxu1 }
 0x141   : > { %v889_v9 = vpop.f32.mrb[46].mxu1 }
 0x142   : > { %v2671_v10 = vpop.f32.mrb[47].mxu1 }
 0x145   : > { %v675_v11 = vpop.f32.mrb[44].mxu0 }
 0x146   : > { %v3330_v12 = vadd.f32 %v886_v4, %v675_v11  ;;  %v2600_v14 = vpop.f32.mrb[45].mxu0 }
 0x147   : > { %v678_v15 = vpop.f32.mrb[46].mxu0  ;;  %v894_v16 = vpop.f32.mrb[48].mxu1 }
 0x148   : > { %v3332_v17 = vadd.f32 %v889_v9, %v678_v15  ;;  %v2601_v20 = vpop.f32.mrb[47].mxu0  ;;  %v2674_v21 = vpop.f32.mrb[49].mxu1 }
 0x149   : > { %v897_v22 = vpop.f32.mrb[50].mxu1 }
 0x14a   : > { %v2675_v0 = vpop.f32.mrb[51].mxu1 }
 0x14d   : > { %v683_v23 = vpop.f32.mrb[48].mxu0 }
 0x14e   : > { %v3334_v26 = vadd.f32 %v894_v16, %v683_v23  ;;  %v2604_v28 = vpop.f32.mrb[49].mxu0 }
 0x14f   : > { %v686_v29 = vpop.f32.mrb[50].mxu0  ;;  %v902_v31 = vpop.f32.mrb[52].mxu1 }
 0x150   : > { %v3336_v32 = vadd.f32 %v897_v22, %v686_v29  ;;  %v2605_v33 = vpop.f32.mrb[51].mxu0  ;;  %v2678_v35 = vpop.f32.mrb[53].mxu1 }
 0x151   : > { %v905_v36 = vpop.f32.mrb[54].mxu1 }
 0x152   : > { %v2679_v39 = vpop.f32.mrb[55].mxu1 }
 0x155   : > { %v691_v40 = vpop.f32.mrb[52].mxu0 }
 0x156   : > { %v3338_v41 = vadd.f32 %v902_v31, %v691_v40  ;;  %v2608_v43 = vpop.f32.mrb[53].mxu0 }
 0x157   : > { %v694_v44 = vpop.f32.mrb[54].mxu0  ;;  %v910_v47 = vpop.f32.mrb[56].mxu1 }
 0x158   : > { %v3340_v48 = vadd.f32 %v905_v36, %v694_v44  ;;  %v2609_v49 = vpop.f32.mrb[55].mxu0  ;;  %v2682_v51 = vpop.f32.mrb[57].mxu1 }
 0x159   : > { %v913_v53 = vpop.f32.mrb[58].mxu1  ;;  %v3358_v51 = vld [vmem:[%s3461_s2] ss:$0 sm:$0xff] }
 0x15a   : > { %v2683_v54 = vpop.f32.mrb[59].mxu1 }
 0x15d   : > { %v699_v56 = vpop.f32.mrb[56].mxu0 }
 0x15e   : > { %v3342_v57 = vadd.f32 %v910_v47, %v699_v56  ;;  %v2612_v59 = vpop.f32.mrb[57].mxu0 }
 0x15f   : > { %v702_v60 = vpop.f32.mrb[58].mxu0  ;;  %v918_v61 = vpop.f32.mrb[60].mxu1 }
 0x160   : > { %v3344_v1 = vadd.f32 %v913_v53, %v702_v60  ;;  %v2613_v2 = vpop.f32.mrb[59].mxu0  ;;  %v2686_v4 = vpop.f32.mrb[61].mxu1 }
 0x161   : > { %v921_v6 = vpop.f32.mrb[62].mxu1 }
 0x162   : > { %v2687_v8 = vpop.f32.mrb[63].mxu1 }
 0x165   : > { %v707_v9 = vpop.f32.mrb[60].mxu0 }
 0x166   : > { %v3346_v10 = vadd.f32 %v918_v61, %v707_v9  ;;  %v2616_v11 = vpop.f32.mrb[61].mxu0 }
 0x167   : > { %v710_v14 = vpop.f32.mrb[62].mxu0  ;;  %v926_v15 = vpop.f32.mrb[64].mxu1 }
 0x168   : > { %v3348_v16 = vadd.f32 %v921_v6, %v710_v14  ;;  %v2617_v20 = vpop.f32.mrb[63].mxu0  ;;  %v2690_v21 = vpop.f32.mrb[65].mxu1 }
 0x169   : > { %v929_v22 = vpop.f32.mrb[66].mxu1 }
 0x16a   : > { %v2691_v0 = vpop.f32.mrb[67].mxu1 }
 0x16d   : > { %v715_v23 = vpop.f32.mrb[64].mxu0 }
 0x16e   : > { %v3350_v28 = vadd.f32 %v926_v15, %v715_v23  ;;  %v2620_v29 = vpop.f32.mrb[65].mxu0 }
 0x16f   : > { %v718_v31 = vpop.f32.mrb[66].mxu0  ;;  %v1597_v33 = vpop.f32.mrb[68].mxu1 }
 0x170   : > { %v3352_v35 = vadd.f32 %v929_v22, %v718_v31  ;;  %v2621_v36 = vpop.f32.mrb[67].mxu0  ;;  %v2766_v39 = vpop.f32.mrb[69].mxu1 }
 0x171   : > { %v1600_v40 = vpop.f32.mrb[70].mxu1 }
 0x172   : > { %v2767_v43 = vpop.f32.mrb[71].mxu1 }
 0x175   : > { %v1292_v44 = vpop.f32.mrb[68].mxu0 }
 0x176   : > { %v1427_v47 = vadd.f32 %v1292_v44, %v3233_v27  ;;  %v2696_v49 = vpop.f32.mrb[69].mxu0 }
 0x177   : > { %v1295_v53 = vpop.f32.mrb[70].mxu0  ;;  %v1605_v54 = vpop.f32.mrb[72].mxu1 }
 0x178   : > { %v1732_v56 = vadd.f32 %v1597_v33, %v1427_v47  ;;  %v1428_v59 = vadd.f32 %v1295_v53, %v3236_v34  ;;  %v2697_v60 = vpop.f32.mrb[71].mxu0  ;;  %v2770_v61 = vpop.f32.mrb[73].mxu1 }
 0x179   : > { %v1608_v2 = vpop.f32.mrb[74].mxu1 }
 0x17a   : > { %v1773_v4 = vadd.f32 %v3358_v51, %v1732_v56  ;;  %v1733_v6 = vadd.f32 %v1600_v40, %v1428_v59  ;;  %v2771_v8 = vpop.f32.mrb[75].mxu1 }
 0x17c   : > { %v1841_v9 = vmul.f32 0.2, %v1773_v4  ;;  %v1774_v27 = vadd.f32 %v3358_v51, %v1733_v6  ;;  %vm1807_vm5 = vcmp.ge.f32.partialorder %v1773_v4, 0.0 }
 0x17d   : > { %v1300_v11 = vpop.f32.mrb[72].mxu0 }
 0x17e   : > { %vm1808_vm6 = vcmp.ge.f32.partialorder %v1774_v27, 0.0  ;;  %v1842_v14 = vmul.f32 0.2, %v1774_v27  ;;  %v1429_v15 = vadd.f32 %v1300_v11, %v3246_v45  ;;  %v2700_v20 = vpop.f32.mrb[73].mxu0  ;;  %v1875_v22 = vsel %vm1807_vm5, %v1773_v4, %v1841_v9 }
 0x17f   : > { %v1303_v21 = vpop.f32.mrb[74].mxu0  ;;  %v1613_v34 = vpop.f32.mrb[76].mxu1 }
 0x180   : > { %v1876_v0 = vsel %vm1808_vm6, %v1774_v27, %v1842_v14  ;;  %v1734_v23 = vadd.f32 %v1605_v54, %v1429_v15  ;;  %v1430_v29 = vadd.f32 %v1303_v21, %v3249_v52  ;;  %v2701_v31 = vpop.f32.mrb[75].mxu0  ;;  %v2774_v33 = vpop.f32.mrb[77].mxu1 }
 0x181   : > { %v2382_v36 = vpack.c.bf16 %v1876_v0, %v1875_v22  ;;  %v1616_v39 = vpop.f32.mrb[78].mxu1 }
 0x182   : > { %v1775_v45 = vadd.f32 %v3358_v51, %v1734_v23  ;;  %v1735_v40 = vadd.f32 %v1608_v2, %v1430_v29  ;;  %v2775_v43 = vpop.f32.mrb[79].mxu1 }
 0x183   : > { %2383 = vst [vmem:[%s3368_s6] sm:$0xff] %v2382_v36  }
 0x184   : > { %v1843_v44 = vmul.f32 0.2, %v1775_v45  ;;  %v1776_v47 = vadd.f32 %v3358_v51, %v1735_v40  ;;  %vm1809_vm7 = vcmp.ge.f32.partialorder %v1775_v45, 0.0 }
 0x185   : > { %v1308_v49 = vpop.f32.mrb[76].mxu0 }
 0x186   : > { %vm1810_vm8 = vcmp.ge.f32.partialorder %v1776_v47, 0.0  ;;  %v1844_v53 = vmul.f32 0.2, %v1776_v47  ;;  %v1431_v54 = vadd.f32 %v1308_v49, %v3259_v63  ;;  %v2704_v52 = vpop.f32.mrb[77].mxu0  ;;  %v1877_v60 = vsel %vm1809_vm7, %v1775_v45, %v1843_v44 }
 0x187   : > { %v1311_v56 = vpop.f32.mrb[78].mxu0  ;;  %v1621_v59 = vpop.f32.mrb[80].mxu1 }
 0x188   : > { %v1878_v61 = vsel %vm1810_vm8, %v1776_v47, %v1844_v53  ;;  %v1736_v4 = vadd.f32 %v1613_v34, %v1431_v54  ;;  %v1432_v2 = vadd.f32 %v1311_v56, %v3262_v7  ;;  %v2705_v6 = vpop.f32.mrb[79].mxu0  ;;  %v2778_v8 = vpop.f32.mrb[81].mxu1 }
 0x189   : > { %v2387_v9 = vpack.c.bf16 %v1878_v61, %v1877_v60  ;;  %v1624_v27 = vpop.f32.mrb[82].mxu1 }
 0x18a   : > { %v1777_v11 = vadd.f32 %v3358_v51, %v1736_v4  ;;  %v1737_v14 = vadd.f32 %v1616_v39, %v1432_v2  ;;  %v2779_v15 = vpop.f32.mrb[83].mxu1 }
 0x18b   : > { %2464 = vst [vmem:[%s3368_s6 + $0x8] sm:$0xff] %v2387_v9  }
 0x18c   : > { %v1845_v20 = vmul.f32 0.2, %v1777_v11  ;;  %v1778_v63 = vadd.f32 %v3358_v51, %v1737_v14  ;;  %vm1811_vm9 = vcmp.ge.f32.partialorder %v1777_v11, 0.0 }
 0x18d   : > { %v1316_v21 = vpop.f32.mrb[80].mxu0 }
 0x18e   : > { %vm1812_vm10 = vcmp.ge.f32.partialorder %v1778_v63, 0.0  ;;  %v1846_v22 = vmul.f32 0.2, %v1778_v63  ;;  %v1433_v34 = vadd.f32 %v1316_v21, %v3272_v18  ;;  %v2708_v7 = vpop.f32.mrb[81].mxu0  ;;  %v1879_v29 = vsel %vm1811_vm9, %v1777_v11, %v1845_v20 }
 0x18f   : > { %v1319_v0 = vpop.f32.mrb[82].mxu0  ;;  %v1629_v23 = vpop.f32.mrb[84].mxu1 }
 0x190   : > { %v1880_v31 = vsel %vm1812_vm10, %v1778_v63, %v1846_v22  ;;  %v1738_v33 = vadd.f32 %v1621_v59, %v1433_v34  ;;  %v1434_v36 = vadd.f32 %v1319_v0, %v3275_v25  ;;  %v2709_v39 = vpop.f32.mrb[83].mxu0  ;;  %v2782_v45 = vpop.f32.mrb[85].mxu1 }
 0x191   : > { %v2392_v40 = vpack.c.bf16 %v1880_v31, %v1879_v29  ;;  %v1632_v43 = vpop.f32.mrb[86].mxu1 }
 0x192   : > { %v1779_v44 = vadd.f32 %v3358_v51, %v1738_v33  ;;  %v1739_v47 = vadd.f32 %v1624_v27, %v1434_v36  ;;  %v2783_v49 = vpop.f32.mrb[87].mxu1 }
 0x193   : > { %2465 = vst [vmem:[%s3368_s6 + $0x10] sm:$0xff] %v2392_v40  }
 0x194   : > { %v1847_v53 = vmul.f32 0.2, %v1779_v44  ;;  %v1780_v18 = vadd.f32 %v3358_v51, %v1739_v47  ;;  %vm1813_vm11 = vcmp.ge.f32.partialorder %v1779_v44, 0.0 }
 0x195   : > { %v1324_v54 = vpop.f32.mrb[84].mxu0 }
 0x196   : > { %vm1814_vm12 = vcmp.ge.f32.partialorder %v1780_v18, 0.0  ;;  %v1848_v52 = vmul.f32 0.2, %v1780_v18  ;;  %v1435_v56 = vadd.f32 %v1324_v54, %v3285_v38  ;;  %v2712_v25 = vpop.f32.mrb[85].mxu0  ;;  %v1881_v61 = vsel %vm1813_vm11, %v1779_v44, %v1847_v53 }
 0x197   : > { %v1327_v59 = vpop.f32.mrb[86].mxu0  ;;  %v1637_v60 = vpop.f32.mrb[88].mxu1 }
 0x198   : > { %v1882_v4 = vsel %vm1814_vm12, %v1780_v18, %v1848_v52  ;;  %v1740_v2 = vadd.f32 %v1629_v23, %v1435_v56  ;;  %v1436_v6 = vadd.f32 %v1327_v59, %v3288_v46  ;;  %v2713_v8 = vpop.f32.mrb[87].mxu0  ;;  %v2786_v9 = vpop.f32.mrb[89].mxu1 }
 0x199   : > { %v2397_v27 = vpack.c.bf16 %v1882_v4, %v1881_v61  ;;  %v1640_v11 = vpop.f32.mrb[90].mxu1 }
 0x19a   : > { %v1781_v14 = vadd.f32 %v3358_v51, %v1740_v2  ;;  %v1741_v15 = vadd.f32 %v1632_v43, %v1436_v6  ;;  %v2787_v20 = vpop.f32.mrb[91].mxu1 }
 0x19b   : > { %2466 = vst [vmem:[%s3368_s6 + $0x18] sm:$0xff] %v2397_v27  }
 0x19c   : > { %v1849_v63 = vmul.f32 0.2, %v1781_v14  ;;  %v1782_v38 = vadd.f32 %v3358_v51, %v1741_v15  ;;  %vm1815_vm13 = vcmp.ge.f32.partialorder %v1781_v14, 0.0 }
 0x19d   : > { %v1332_v21 = vpop.f32.mrb[88].mxu0 }
 0x19e   : > { %vm1816_vm14 = vcmp.ge.f32.partialorder %v1782_v38, 0.0  ;;  %v1850_v22 = vmul.f32 0.2, %v1782_v38  ;;  %v1437_v34 = vadd.f32 %v1332_v21, %v3298_v58  ;;  %v2716_v46 = vpop.f32.mrb[89].mxu0  ;;  %v1883_v23 = vsel %vm1815_vm13, %v1781_v14, %v1849_v63 }
 0x19f   : > { %v1335_v7 = vpop.f32.mrb[90].mxu0  ;;  %v1645_v0 = vpop.f32.mrb[92].mxu1 }
 0x1a0   : > { %v1884_v29 = vsel %vm1816_vm14, %v1782_v38, %v1850_v22  ;;  %v1742_v31 = vadd.f32 %v1637_v60, %v1437_v34  ;;  %v1438_v33 = vadd.f32 %v1335_v7, %v3301_v3  ;;  %v2717_v36 = vpop.f32.mrb[91].mxu0  ;;  %v2790_v39 = vpop.f32.mrb[93].mxu1 }
 0x1a1   : > { %v2402_v45 = vpack.c.bf16 %v1884_v29, %v1883_v23  ;;  %v1648_v40 = vpop.f32.mrb[94].mxu1 }
 0x1a2   : > { %v1783_v43 = vadd.f32 %v3358_v51, %v1742_v31  ;;  %v1743_v44 = vadd.f32 %v1640_v11, %v1438_v33  ;;  %v2791_v47 = vpop.f32.mrb[95].mxu1 }
 0x1a3   : > { %2467 = vst [vmem:[%s3368_s6 + $0x20] sm:$0xff] %v2402_v45  }
 0x1a4   : > { %v1851_v49 = vmul.f32 0.2, %v1783_v43  ;;  %v1784_v58 = vadd.f32 %v3358_v51, %v1743_v44  ;;  %vm1817_vm15 = vcmp.ge.f32.partialorder %v1783_v43, 0.0 }
 0x1a5   : > { %v1340_v53 = vpop.f32.mrb[92].mxu0 }
 0x1a6   : > { %vm1818_vm0 = vcmp.ge.f32.partialorder %v1784_v58, 0.0  ;;  %v1852_v18 = vmul.f32 0.2, %v1784_v58  ;;  %v1439_v54 = vadd.f32 %v1340_v53, %v3308_v13  ;;  %v2720_v3 = vpop.f32.mrb[93].mxu0  ;;  %v1885_v25 = vsel %vm1817_vm15, %v1783_v43, %v1851_v49 }
 0x1a7   : > { %v1343_v52 = vpop.f32.mrb[94].mxu0  ;;  %v1653_v56 = vpop.f32.mrb[96].mxu1 }
 0x1a8   : > { %v1886_v59 = vsel %vm1818_vm0, %v1784_v58, %v1852_v18  ;;  %v1744_v60 = vadd.f32 %v1645_v0, %v1439_v54  ;;  %v1440_v61 = vadd.f32 %v1343_v52, %v3311_v19  ;;  %v2721_v4 = vpop.f32.mrb[95].mxu0  ;;  %v2794_v2 = vpop.f32.mrb[97].mxu1 }
 0x1a9   : > { %v2407_v6 = vpack.c.bf16 %v1886_v59, %v1885_v25  ;;  %v1656_v8 = vpop.f32.mrb[98].mxu1 }
 0x1aa   : > { %v1785_v9 = vadd.f32 %v3358_v51, %v1744_v60  ;;  %v1745_v27 = vadd.f32 %v1648_v40, %v1440_v61  ;;  %v2795_v11 = vpop.f32.mrb[99].mxu1 }
 0x1ab   : > { %2468 = vst [vmem:[%s3368_s6 + $0x28] sm:$0xff] %v2407_v6  }
 0x1ac   : > { %v1853_v14 = vmul.f32 0.2, %v1785_v9  ;;  %v1786_v13 = vadd.f32 %v3358_v51, %v1745_v27  ;;  %vm1819_vm1 = vcmp.ge.f32.partialorder %v1785_v9, 0.0 }
 0x1ad   : > { %v1348_v15 = vpop.f32.mrb[96].mxu0 }
 0x1ae   : > { %vm1820_vm2 = vcmp.ge.f32.partialorder %v1786_v13, 0.0  ;;  %v1854_v20 = vmul.f32 0.2, %v1786_v13  ;;  %v1441_v63 = vadd.f32 %v1348_v15, %v3314_v24  ;;  %v2724_v19 = vpop.f32.mrb[97].mxu0  ;;  %v1887_v22 = vsel %vm1819_vm1, %v1785_v9, %v1853_v14 }
 0x1af   : > { %v1351_v38 = vpop.f32.mrb[98].mxu0  ;;  %v1661_v21 = vpop.f32.mrb[100].mxu1 }
 0x1b0   : > { %v1888_v34 = vsel %vm1820_vm2, %v1786_v13, %v1854_v20  ;;  %v1746_v46 = vadd.f32 %v1653_v56, %v1441_v63  ;;  %v1442_v7 = vadd.f32 %v1351_v38, %v3316_v30  ;;  %v2725_v0 = vpop.f32.mrb[99].mxu0  ;;  %v2798_v23 = vpop.f32.mrb[101].mxu1 }
 0x1b1   : > { %v2412_v29 = vpack.c.bf16 %v1888_v34, %v1887_v22  ;;  %v1664_v31 = vpop.f32.mrb[102].mxu1 }
 0x1b2   : > { %v1787_v33 = vadd.f32 %v3358_v51, %v1746_v46  ;;  %v1747_v36 = vadd.f32 %v1656_v8, %v1442_v7  ;;  %v2799_v39 = vpop.f32.mrb[103].mxu1 }
 0x1b3   : > { %2469 = vst [vmem:[%s3368_s6 + $0x30] sm:$0xff] %v2412_v29  }
 0x1b4   : > { %v1855_v45 = vmul.f32 0.2, %v1787_v33  ;;  %v1788_v24 = vadd.f32 %v3358_v51, %v1747_v36  ;;  %vm1821_vm3 = vcmp.ge.f32.partialorder %v1787_v33, 0.0 }
 0x1b5   : > { %v1356_v40 = vpop.f32.mrb[100].mxu0 }
 0x1b6   : > { %vm1822_vm4 = vcmp.ge.f32.partialorder %v1788_v24, 0.0  ;;  %v1856_v43 = vmul.f32 0.2, %v1788_v24  ;;  %v1443_v44 = vadd.f32 %v1356_v40, %v3318_v37  ;;  %v2728_v30 = vpop.f32.mrb[101].mxu0  ;;  %v1889_v58 = vsel %vm1821_vm3, %v1787_v33, %v1855_v45 }
 0x1b7   : > { %v1359_v47 = vpop.f32.mrb[102].mxu0  ;;  %v1669_v49 = vpop.f32.mrb[104].mxu1 }
 0x1b8   : > { %v1890_v53 = vsel %vm1822_vm4, %v1788_v24, %v1856_v43  ;;  %v1748_v18 = vadd.f32 %v1661_v21, %v1443_v44  ;;  %v1444_v54 = vadd.f32 %v1359_v47, %v3320_v42  ;;  %v2729_v3 = vpop.f32.mrb[103].mxu0  ;;  %v2802_v52 = vpop.f32.mrb[105].mxu1 }
 0x1b9   : > { %v2417_v56 = vpack.c.bf16 %v1890_v53, %v1889_v58  ;;  %v1672_v25 = vpop.f32.mrb[106].mxu1 }
 0x1ba   : > { %v1789_v59 = vadd.f32 %v3358_v51, %v1748_v18  ;;  %v1749_v60 = vadd.f32 %v1664_v31, %v1444_v54  ;;  %v2803_v61 = vpop.f32.mrb[107].mxu1 }
 0x1bb   : > { %2470 = vst [vmem:[%s3368_s6 + $0x38] sm:$0xff] %v2417_v56  }
 0x1bc   : > { %v1857_v4 = vmul.f32 0.2, %v1789_v59  ;;  %v1790_v37 = vadd.f32 %v3358_v51, %v1749_v60  ;;  %vm1823_vm5 = vcmp.ge.f32.partialorder %v1789_v59, 0.0 }
 0x1bd   : > { %v1364_v2 = vpop.f32.mrb[104].mxu0 }
 0x1be   : > { %vm1824_vm6 = vcmp.ge.f32.partialorder %v1790_v37, 0.0  ;;  %v1858_v6 = vmul.f32 0.2, %v1790_v37  ;;  %v1445_v8 = vadd.f32 %v1364_v2, %v3322_v50  ;;  %v2732_v42 = vpop.f32.mrb[105].mxu0  ;;  %v1891_v11 = vsel %vm1823_vm5, %v1789_v59, %v1857_v4 }
 0x1bf   : > { %v1367_v9 = vpop.f32.mrb[106].mxu0  ;;  %v1677_v27 = vpop.f32.mrb[108].mxu1 }
 0x1c0   : > { %v1892_v14 = vsel %vm1824_vm6, %v1790_v37, %v1858_v6  ;;  %v1750_v13 = vadd.f32 %v1669_v49, %v1445_v8  ;;  %v1446_v15 = vadd.f32 %v1367_v9, %v3324_v55  ;;  %v2733_v20 = vpop.f32.mrb[107].mxu0  ;;  %v2806_v63 = vpop.f32.mrb[109].mxu1 }
 0x1c1   : > { %v2422_v19 = vpack.c.bf16 %v1892_v14, %v1891_v11  ;;  %v1680_v38 = vpop.f32.mrb[110].mxu1 }
 0x1c2   : > { %v1791_v21 = vadd.f32 %v3358_v51, %v1750_v13  ;;  %v1751_v22 = vadd.f32 %v1672_v25, %v1446_v15  ;;  %v2807_v34 = vpop.f32.mrb[111].mxu1 }
 0x1c3   : > { %2471 = vst [vmem:[%s3368_s6 + $0x40] sm:$0xff] %v2422_v19  }
 0x1c4   : > { %v1859_v46 = vmul.f32 0.2, %v1791_v21  ;;  %v1792_v50 = vadd.f32 %v3358_v51, %v1751_v22  ;;  %vm1825_vm7 = vcmp.ge.f32.partialorder %v1791_v21, 0.0 }
 0x1c5   : > { %v1372_v7 = vpop.f32.mrb[108].mxu0 }
 0x1c6   : > { %vm1826_vm8 = vcmp.ge.f32.partialorder %v1792_v50, 0.0  ;;  %v1860_v0 = vmul.f32 0.2, %v1792_v50  ;;  %v1447_v23 = vadd.f32 %v1372_v7, %v3326_v62  ;;  %v2736_v55 = vpop.f32.mrb[109].mxu0  ;;  %v1893_v33 = vsel %vm1825_vm7, %v1791_v21, %v1859_v46 }
 0x1c7   : > { %v1375_v29 = vpop.f32.mrb[110].mxu0  ;;  %v1685_v31 = vpop.f32.mrb[112].mxu1 }
 0x1c8   : > { %v1894_v36 = vsel %vm1826_vm8, %v1792_v50, %v1860_v0  ;;  %v1752_v39 = vadd.f32 %v1677_v27, %v1447_v23  ;;  %v1448_v45 = vadd.f32 %v1375_v29, %v3328_v5  ;;  %v2737_v24 = vpop.f32.mrb[111].mxu0  ;;  %v2810_v40 = vpop.f32.mrb[113].mxu1 }
 0x1c9   : > { %v2427_v43 = vpack.c.bf16 %v1894_v36, %v1893_v33  ;;  %v1688_v44 = vpop.f32.mrb[114].mxu1 }
 0x1ca   : > { %v1793_v30 = vadd.f32 %v3358_v51, %v1752_v39  ;;  %v1753_v47 = vadd.f32 %v1680_v38, %v1448_v45  ;;  %v2811_v49 = vpop.f32.mrb[115].mxu1 }
 0x1cb   : > { %2472 = vst [vmem:[%s3368_s6 + $0x48] sm:$0xff] %v2427_v43  }
 0x1cc   : > { %v1861_v58 = vmul.f32 0.2, %v1793_v30  ;;  %v1794_v62 = vadd.f32 %v3358_v51, %v1753_v47  ;;  %vm1827_vm9 = vcmp.ge.f32.partialorder %v1793_v30, 0.0 }
 0x1cd   : > { %v1380_v53 = vpop.f32.mrb[112].mxu0 }
 0x1ce   : > { %vm1828_vm10 = vcmp.ge.f32.partialorder %v1794_v62, 0.0  ;;  %v1862_v18 = vmul.f32 0.2, %v1794_v62  ;;  %v1449_v54 = vadd.f32 %v1380_v53, %v3330_v12  ;;  %v2740_v5 = vpop.f32.mrb[113].mxu0  ;;  %v1895_v56 = vsel %vm1827_vm9, %v1793_v30, %v1861_v58 }
 0x1cf   : > { %v1383_v3 = vpop.f32.mrb[114].mxu0  ;;  %v1693_v52 = vpop.f32.mrb[116].mxu1 }
 0x1d0   : > { %v1896_v25 = vsel %vm1828_vm10, %v1794_v62, %v1862_v18  ;;  %v1754_v59 = vadd.f32 %v1685_v31, %v1449_v54  ;;  %v1450_v60 = vadd.f32 %v1383_v3, %v3332_v17  ;;  %v2741_v61 = vpop.f32.mrb[115].mxu0  ;;  %v2814_v4 = vpop.f32.mrb[117].mxu1 }
 0x1d1   : > { %v2432_v37 = vpack.c.bf16 %v1896_v25, %v1895_v56  ;;  %v1696_v2 = vpop.f32.mrb[118].mxu1 }
 0x1d2   : > { %v1795_v6 = vadd.f32 %v3358_v51, %v1754_v59  ;;  %v1755_v8 = vadd.f32 %v1688_v44, %v1450_v60  ;;  %v2815_v42 = vpop.f32.mrb[119].mxu1 }
 0x1d3   : > { %2473 = vst [vmem:[%s3368_s6 + $0x50] sm:$0xff] %v2432_v37  }
 0x1d4   : > { %v1863_v9 = vmul.f32 0.2, %v1795_v6  ;;  %v1796_v12 = vadd.f32 %v3358_v51, %v1755_v8  ;;  %vm1829_vm11 = vcmp.ge.f32.partialorder %v1795_v6, 0.0 }
 0x1d5   : > { %v1388_v27 = vpop.f32.mrb[116].mxu0 }
 0x1d6   : > { %vm1830_vm12 = vcmp.ge.f32.partialorder %v1796_v12, 0.0  ;;  %v1864_v11 = vmul.f32 0.2, %v1796_v12  ;;  %v1451_v14 = vadd.f32 %v1388_v27, %v3334_v26  ;;  %v2744_v17 = vpop.f32.mrb[117].mxu0  ;;  %v1897_v20 = vsel %vm1829_vm11, %v1795_v6, %v1863_v9 }
 0x1d7   : > { %v1391_v13 = vpop.f32.mrb[118].mxu0  ;;  %v1701_v15 = vpop.f32.mrb[120].mxu1 }
 0x1d8   : > { %v1898_v63 = vsel %vm1830_vm12, %v1796_v12, %v1864_v11  ;;  %v1756_v19 = vadd.f32 %v1693_v52, %v1451_v14  ;;  %v1452_v38 = vadd.f32 %v1391_v13, %v3336_v32  ;;  %v2745_v21 = vpop.f32.mrb[119].mxu0  ;;  %v2818_v22 = vpop.f32.mrb[121].mxu1 }
 0x1d9   : > { %v2437_v34 = vpack.c.bf16 %v1898_v63, %v1897_v20  ;;  %v1704_v46 = vpop.f32.mrb[122].mxu1 }
 0x1da   : > { %v1797_v50 = vadd.f32 %v3358_v51, %v1756_v19  ;;  %v1757_v7 = vadd.f32 %v1696_v2, %v1452_v38  ;;  %v2819_v0 = vpop.f32.mrb[123].mxu1 }
 0x1db   : > { %2474 = vst [vmem:[%s3368_s6 + $0x58] sm:$0xff] %v2437_v34  }
 0x1dc   : > { %v1865_v23 = vmul.f32 0.2, %v1797_v50  ;;  %v1798_v26 = vadd.f32 %v3358_v51, %v1757_v7  ;;  %vm1831_vm13 = vcmp.ge.f32.partialorder %v1797_v50, 0.0 }
 0x1dd   : > { %v1396_v55 = vpop.f32.mrb[120].mxu0 }
 0x1de   : > { %vm1832_vm14 = vcmp.ge.f32.partialorder %v1798_v26, 0.0  ;;  %v1866_v29 = vmul.f32 0.2, %v1798_v26  ;;  %v1453_v31 = vadd.f32 %v1396_v55, %v3338_v41  ;;  %v2748_v32 = vpop.f32.mrb[121].mxu0  ;;  %v1899_v39 = vsel %vm1831_vm13, %v1797_v50, %v1865_v23 }
 0x1df   : > { %v1399_v33 = vpop.f32.mrb[122].mxu0  ;;  %v1709_v36 = vpop.f32.mrb[124].mxu1 }
 0x1e0   : > { %v1900_v45 = vsel %vm1832_vm14, %v1798_v26, %v1866_v29  ;;  %v1758_v24 = vadd.f32 %v1701_v15, %v1453_v31  ;;  %v1454_v40 = vadd.f32 %v1399_v33, %v3340_v48  ;;  %v2749_v43 = vpop.f32.mrb[123].mxu0  ;;  %v2822_v44 = vpop.f32.mrb[125].mxu1 }
 0x1e1   : > { %v2442_v30 = vpack.c.bf16 %v1900_v45, %v1899_v39  ;;  %v1712_v47 = vpop.f32.mrb[126].mxu1 }
 0x1e2   : > { %v1799_v49 = vadd.f32 %v3358_v51, %v1758_v24  ;;  %v1759_v58 = vadd.f32 %v1704_v46, %v1454_v40  ;;  %v2823_v62 = vpop.f32.mrb[127].mxu1 }
 0x1e3   : > { %2475 = vst [vmem:[%s3368_s6 + $0x60] sm:$0xff] %v2442_v30  }
 0x1e4   : > { %v1867_v53 = vmul.f32 0.2, %v1799_v49  ;;  %v1800_v41 = vadd.f32 %v3358_v51, %v1759_v58  ;;  %vm1833_vm15 = vcmp.ge.f32.partialorder %v1799_v49, 0.0 }
 0x1e5   : > { %v1404_v18 = vpop.f32.mrb[124].mxu0 }
 0x1e6   : > { %vm1834_vm0 = vcmp.ge.f32.partialorder %v1800_v41, 0.0  ;;  %v1868_v54 = vmul.f32 0.2, %v1800_v41  ;;  %v1455_v5 = vadd.f32 %v1404_v18, %v3342_v57  ;;  %v2752_v48 = vpop.f32.mrb[125].mxu0  ;;  %v1901_v56 = vsel %vm1833_vm15, %v1799_v49, %v1867_v53 }
 0x1e7   : > { %v1407_v3 = vpop.f32.mrb[126].mxu0  ;;  %v1717_v52 = vpop.f32.mrb[128].mxu1 }
 0x1e8   : > { %v1902_v25 = vsel %vm1834_vm0, %v1800_v41, %v1868_v54  ;;  %v1760_v59 = vadd.f32 %v1709_v36, %v1455_v5  ;;  %v1456_v60 = vadd.f32 %v1407_v3, %v3344_v1  ;;  %v2753_v61 = vpop.f32.mrb[127].mxu0  ;;  %v2826_v4 = vpop.f32.mrb[129].mxu1 }
 0x1e9   : > { %v2447_v37 = vpack.c.bf16 %v1902_v25, %v1901_v56  ;;  %v1720_v2 = vpop.f32.mrb[130].mxu1 }
 0x1ea   : > { %v1801_v6 = vadd.f32 %v3358_v51, %v1760_v59  ;;  %v1761_v8 = vadd.f32 %v1712_v47, %v1456_v60  ;;  %v2827_v42 = vpop.f32.mrb[131].mxu1 }
 0x1eb   : > { %2476 = vst [vmem:[%s3368_s6 + $0x68] sm:$0xff] %v2447_v37  }
 0x1ec   : > { %v1869_v9 = vmul.f32 0.2, %v1801_v6  ;;  %v1802_v57 = vadd.f32 %v3358_v51, %v1761_v8  ;;  %vm1835_vm1 = vcmp.ge.f32.partialorder %v1801_v6, 0.0 }
 0x1ed   : > { %v1412_v12 = vpop.f32.mrb[128].mxu0 }
 0x1ee   : > { %vm1836_vm2 = vcmp.ge.f32.partialorder %v1802_v57, 0.0  ;;  %v1870_v27 = vmul.f32 0.2, %v1802_v57  ;;  %v1457_v11 = vadd.f32 %v1412_v12, %v3346_v10  ;;  %v2756_v1 = vpop.f32.mrb[129].mxu0  ;;  %v1903_v13 = vsel %vm1835_vm1, %v1801_v6, %v1869_v9 }
 0x1ef   : > { %v1415_v14 = vpop.f32.mrb[130].mxu0  ;;  %v1725_v17 = vpop.f32.mrb[132].mxu1 }
 0x1f0   : > { %v1904_v15 = vsel %vm1836_vm2, %v1802_v57, %v1870_v27  ;;  %v1762_v20 = vadd.f32 %v1717_v52, %v1457_v11  ;;  %v1458_v63 = vadd.f32 %v1415_v14, %v3348_v16  ;;  %v2757_v19 = vpop.f32.mrb[131].mxu0  ;;  %v2830_v38 = vpop.f32.mrb[133].mxu1 }
 0x1f1   : > { %v2452_v21 = vpack.c.bf16 %v1904_v15, %v1903_v13  ;;  %v1728_v22 = vpop.f32.mrb[134].mxu1 }
 0x1f2   : > { %v1803_v34 = vadd.f32 %v3358_v51, %v1762_v20  ;;  %v1763_v46 = vadd.f32 %v1720_v2, %v1458_v63  ;;  %v2831_v50 = vpop.f32.mrb[135].mxu1 }
 0x1f3   : > { %2477 = vst [vmem:[%s3368_s6 + $0x70] sm:$0xff] %v2452_v21  }
 0x1f4   : > { %v1871_v7 = vmul.f32 0.2, %v1803_v34  ;;  %v1804_v10 = vadd.f32 %v3358_v51, %v1763_v46  ;;  %vm1837_vm3 = vcmp.ge.f32.partialorder %v1803_v34, 0.0 }
 0x1f5   : > { %v1420_v0 = vpop.f32.mrb[132].mxu0 }
 0x1f6   : > { %vm1838_vm4 = vcmp.ge.f32.partialorder %v1804_v10, 0.0  ;;  %v1872_v23 = vmul.f32 0.2, %v1804_v10  ;;  %v1459_v26 = vadd.f32 %v1420_v0, %v3350_v28  ;;  %v2760_v16 = vpop.f32.mrb[133].mxu0  ;;  %v1905_v29 = vsel %vm1837_vm3, %v1803_v34, %v1871_v7 }
 0x1f7   : > { %v1423_v55 = vpop.f32.mrb[134].mxu0 }
 0x1f8   : > { %v1906_v31 = vsel %vm1838_vm4, %v1804_v10, %v1872_v23  ;;  %v1764_v32 = vadd.f32 %v1725_v17, %v1459_v26  ;;  %v1460_v33 = vadd.f32 %v1423_v55, %v3352_v35  ;;  %v2761_v36 = vpop.f32.mrb[135].mxu0 }
 0x1f9   : > { %v2457_v39 = vpack.c.bf16 %v1906_v31, %v1905_v29 }
 0x1fa   : > { %v1805_v45 = vadd.f32 %v3358_v51, %v1764_v32  ;;  %v1765_v24 = vadd.f32 %v1728_v22, %v1460_v33 }
 0x1fb   : > { %2478 = vst [vmem:[%s3368_s6 + $0x78] sm:$0xff] %v2457_v39  }
 0x1fc   : > { %v1873_v40 = vmul.f32 0.2, %v1805_v45  ;;  %v1806_v43 = vadd.f32 %v3358_v51, %v1765_v24  ;;  %vm1839_vm5 = vcmp.ge.f32.partialorder %v1805_v45, 0.0 }
 0x1fe   : > { %vm1840_vm6 = vcmp.ge.f32.partialorder %v1806_v43, 0.0  ;;  %v1874_v28 = vmul.f32 0.2, %v1806_v43  ;;  %v1907_v44 = vsel %vm1839_vm5, %v1805_v45, %v1873_v40 }
 0x200   : > { %v1908_v30 = vsel %vm1840_vm6, %v1806_v43, %v1874_v28 }
 0x201   : > { %v2462_v47 = vpack.c.bf16 %v1908_v30, %v1907_v44 }
 0x203   : > { %2479 = vst [vmem:[%s3368_s6 + $0x80] sm:$0xff] %v2462_v47  }
 0x204 PF: > { %s13_s14 = sadd.s32 1, %s2923_s14   ;;  %s3463_s12 = smov %s2919_s13 }
 0x205   : > { %p10_p5 = scmp.ge.s32.totalorder %s13_s14, 4   ;;  %s3464_s13 = smov %s3466_s15 }
 0x207   :  { %12 = sbr.rel (!%p10_p5) target bundleno = 2 (0x2), region = 71 }

// kernel: _lambda_.6
= control target key start
LH: loop header
LB: loop body
LE: loop exit
PB: predicated region body
PF: predicated region fallthrough
CT: control target
= control target key end

     0   :  { %s1653_s12 = smov 0   ;;  %s1655_s13 = smov 0   ;;  %s2018_s0 = inlined_call_operand.vmem [shape: bf16[2,82,32], index: 0, kind: input, shape index: {}]   ;;  %s2019_s1 = inlined_call_operand.vmem [shape: bf16[4,32,128], index: 1, kind: input, shape index: {}]   ;;  %s2020_s2 = inlined_call_operand.vmem [shape: f32[1,128], index: 2, kind: input, shape index: {}]   ;;  %s2021_s3 = inlined_call_operand.vmem [shape: bf16[2,72,128], index: 3, kind: output, shape index: {}]  }
   0x1   :  { %s1657_s14 = smov 0  }
   0x2 LB: > { %s25_s2 = sadd.s32 1, %s1625_s13  ;;  %p1259_p0 = scmp.ge.s32.totalorder %s1629_s14, 1  ;;  %s1629_s14 = sphi %s1657_s14, %s13_s14   ;;  %s1625_s13 = sphi %s1655_s13, %s2041_s13   ;;  %s1621_s12 = sphi %s1653_s12, %s2040_s12  }
   0x3   : > { %p27_p1 = scmp.ge.s32.totalorder %s25_s2, 2  ;;  %p168_p2 = scmp.lt.s32.totalorder %s1629_s14, 3 }
   0x5   : > { %s2043_s2 = smov (%p27_p1, %s25_s2), 0  ;;  %p169_p3 = pnand %p1259_p0, %p168_p2 }
   0x6   : > { %v1585_v0 = vld [vmem:[%s2019_s1 + $0x10] sm:$0xff] (!%p169_p3)   ;;  %v1631_v1 = vmov (!%p169_p3), 0.0   ;;  %v1586_v2 = vld [vmem:[%s2019_s1 + $0x20] sm:$0xff] (!%p169_p3)   ;;  %v1587_v3 = vld [vmem:[%s2019_s1 + $0x18] sm:$0xff] (!%p169_p3)   ;;  %vm1632_vm0 = vmmov (!%p169_p3), 0   ;;  %p202_p4 = scmp.lt.s32.totalorder (!%p169_p3), %s1621_s12, 1 }
   0x7   : > { %172 = sbr.rel (%p169_p3) target bundleno = 396 (0x18c), region = 32  ;;  %1394 = vmatprep.subr.bf16.mxu1 (!%p169_p3), %v1631_v1  ;;  %1442 = vmatprep.subr.bf16.mxu0 (!%p169_p3), %v1631_v1  ;;  %v1588_v4 = vld [vmem:[%s2019_s1 + $0x28] sm:$0xff] (!%p169_p3)   ;;  %vm267_vm1 = vsmask.f32 (!%p169_p3), 7424  ;;  %vm319_vm2 = vcmask (!%p169_p3), 261120   ;;  %v1591_v19 = vld [vmem:[%s2019_s1] sm:$0xff] (!%p169_p3)  }
   0x8   : > { %1395 = vmatpush3.bf16.msra.mxu1 (!%p169_p3), %v1585_v0  ;;  %1398 = vmatprep.mubr.msk.bf16.mxu1 (!%p169_p3), %vm1632_vm0, %v1631_v1  ;;  %v1594_v29 = vld [vmem:[%s2019_s1 + $0x30] sm:$0xff] (!%p169_p3)   ;;  %v1599_v32 = vld [vmem:[%s2019_s1 + $0x8] sm:$0xff] (!%p169_p3)   ;;  %v1600_v40 = vld [vmem:[%s2019_s1 + $0x38] sm:$0xff] (!%p169_p3)   ;;  %vm699_vm3 = vcmask (!%p169_p3), 1046528  }
   0x9   : > { %1443 = vmatpush3.bf16.msra.mxu0 (!%p169_p3), %v1586_v2  ;;  %1396 = vmatprep.subr.bf16.mxu1 (!%p169_p3), %v1631_v1 }
   0xa   : > { %1444 = vmatprep.subr.bf16.mxu0 (!%p169_p3), %v1631_v1  ;;  %1446 = vmatprep.mubr.msk.bf16.mxu0 (!%p169_p3), %vm1632_vm0, %v1631_v1 }
   0xc   : > { %1397 = vmatpush3.bf16.msra.mxu1 (!%p169_p3), %v1587_v3 }
   0xd   : > { %1445 = vmatpush3.bf16.msra.mxu0 (!%p169_p3), %v1588_v4  ;;  %1418 = vmatprep.subr.bf16.mxu1 (!%p169_p3), %v1631_v1 }
   0xe   : > { %s2045_s12 = smov (!%p202_p4, %s1621_s12), 1  ;;  %1466 = vmatprep.subr.bf16.mxu0 %v1631_v1 }
   0xf   : > { %s1539_s23 = smul.u32 44, %s2045_s12 }
  0x10   : > { %s1540_s8 = smul.u32 36, %s2045_s12 }
  0x11   : > { %s1699_s26 = scalar_lea.vmem %s2018_s0, %s1539_s23 }
  0x12   : > { %v1702_v5 = vld [vmem:[%s1699_s26] sm:$0xff]   ;;  %v1705_v6 = vld [vmem:[%s1699_s26 + $0x8] sm:$0xff]   ;;  %v1719_v14 = vld [vmem:[%s1699_s26 + $0x10] sm:$0xff]   ;;  %s221_s11 = scalar_lea.vmem %s2021_s3, %s1540_s8 }
  0x13   : > { %v503_v7 = vld [vmem:[%s1699_s26 + $0x4] sm:$0xf]  ;;  %v1709_v8 = vld [vmem:[%s1699_s26 + $0x8] sm:$0xf]  ;;  %v269_v9 = vshrl.u32 %v1702_v5, 16  ;;  %v271_v10 = vshll.u32 %v1702_v5, 16 }
  0x14   : > { %v276_v11 = vshll.u32 %v1705_v6, 16  ;;  %v1290_v12 = vcombine.low %v503_v7, %v1709_v8  ;;  %v1716_v13 = vld [vmem:[%s1699_s26 + $0xc] sm:$0xff]   ;;  %v280_v21 = vshrl.u32 %v1705_v6, 16  ;;  %v1727_v22 = vld [vmem:[%s1699_s26 + $0x14] sm:$0xff]   ;;  %v284_v25 = vshll.u32 %v1719_v14, 16  ;;  %v1751_v39 = vld [vmem:[%s1699_s26 + $0x1c] sm:$0xff]  }
  0x15   : > { %v273_v15 = vrot.slane %v271_v10, 1  ;;  %v551_v20 = vshll.u32 %v1716_v13, 16  ;;  %v555_v30 = vshrl.u32 %v1716_v13, 16  ;;  %v559_v31 = vshll.u32 %v1727_v22, 16  ;;  %v1744_v36 = vld [vmem:[%s1699_s26 + $0x18] sm:$0xff]  }
  0x16   : > { %v278_v16 = vrot.slane %v276_v11, 1  ;;  %v544_v17 = vshrl.u32 %v1290_v12, 16  ;;  %v546_v18 = vshll.u32 %v1290_v12, 16  ;;  %v286_v35 = vrot.slane %v284_v25, 1  ;;  %v1761_v44 = vld [vmem:[%s1699_s26 + $0x20] sm:$0xf] }
  0x17   : > { %v274_v23 = vor.u32 %v273_v15, %v269_v9  ;;  %v553_v26 = vrot.slane %v551_v20, 1  ;;  %v561_v38 = vrot.slane %v559_v31, 1  ;;  %v288_v42 = vshrl.u32 %v1719_v14, 16  ;;  %v236_v45 = vld [vmem:[%s1699_s26 + $0x24] sm:$0x1] }
  0x18   : > { %v548_v24 = vrot.slane %v546_v18, 1  ;;  %v282_v34 = vor.u32 %v280_v21, %v278_v16  ;;  %v292_v43 = vshll.u32 %v1744_v36, 16  ;;  %v563_v47 = vshrl.u32 %v1727_v22, 16  ;;  %v1602_v54 = vld [vmem:[%s1699_s26 + $0x24] sm:$0x1f]  }
  0x19   : > { %v279_v27 = vsel %vm267_vm1, %v274_v23, %v278_v16  ;;  %v557_v37 = vor.u32 %v555_v30, %v553_v26  ;;  %v567_v48 = vshll.u32 %v1751_v39, 16  ;;  %v290_v49 = vor.u32 %v288_v42, %v286_v35  ;;  %v690_v10 = vld [vmem:[%s1699_s26 + $0x4] sm:$0xe] }
  0x1a   : > { %v549_v28 = vor.u32 %v548_v24, %v544_v17  ;;  %1399 = vmatmul.mubr.msk.bf16.vlgmr.msra.gmra.mrb[0].mxu1 %vm319_vm2, %v279_v27  ;;  %v287_v41 = vsel %vm267_vm1, %v282_v34, %v286_v35  ;;  %v294_v50 = vrot.slane %v292_v43, 1  ;;  %v1270_v51 = vcombine.low %v1761_v44, %v236_v45 }
  0x1b   : > { %1419 = vmatpush3.bf16.msra.mxu1 %v1591_v19  ;;  %1402 = vmatprep.mubr.msk.bf16.mxu1 %vm1632_vm0, %v1631_v1  ;;  %v562_v46 = vsel %vm267_vm1, %v557_v37, %v561_v38  ;;  %v565_v52 = vor.u32 %v563_v47, %v561_v38  ;;  %v569_v53 = vrot.slane %v567_v48, 1  ;;  %v296_v56 = vshrl.u32 %v1744_v36, 16 }
  0x1c   : > { %v554_v33 = vsel %vm267_vm1, %v549_v28, %v553_v26  ;;  %1420 = vmatprep.subr.bf16.mxu1 %v1631_v1  ;;  %v295_v55 = vsel %vm267_vm1, %v290_v49, %v294_v50  ;;  %v300_v57 = vshll.u32 %v1270_v51, 16  ;;  %v571_v59 = vshrl.u32 %v1751_v39, 16 }
  0x1d   : > { %1447 = vmatmul.mubr.msk.bf16.vlgmr.msra.gmra.mrb[0].mxu0 %vm319_vm2, %v554_v33  ;;  %v570_v58 = vsel %vm267_vm1, %v565_v52, %v569_v53  ;;  %v575_v60 = vshll.u32 %v1602_v54, 16  ;;  %v298_v61 = vor.u32 %v296_v56, %v294_v50  ;;  %v304_v4 = vshrl.u32 %v1270_v51, 16 }
  0x1e   : > { %1467 = vmatpush3.bf16.msra.mxu0 %v1594_v29  ;;  %1450 = vmatprep.mubr.msk.bf16.mxu0 %vm1632_vm0, %v1631_v1  ;;  %v302_v62 = vrot.slane %v300_v57, 1  ;;  %v573_v63 = vor.u32 %v571_v59, %v569_v53  ;;  %v579_v7 = vshrl.u32 %v1602_v54, 16  ;;  %v1306_v12 = vcombine.low %v690_v10, %v1709_v8 }
  0x1f   : > { %1468 = vmatprep.subr.bf16.mxu0 %v1631_v1  ;;  %1421 = vmatpush3.bf16.msra.mxu1 %v1599_v32  ;;  %v577_v0 = vrot.slane %v575_v60, 1  ;;  %v701_v16 = vrot.slane %v1716_v13, 1  ;;  %v703_v8 = vrot.slane %v1727_v22, 1  ;;  %v817_v20 = vlaneseq }
  0x20   : > { %v303_v2 = vsel %vm267_vm1, %v298_v61, %v302_v62  ;;  %v306_v9 = vor.u32 %v304_v4, %v302_v62  ;;  %v700_v15 = vrot.slane %v1306_v12, 1 }
  0x21   : > { %v578_v3 = vsel %vm267_vm1, %v573_v63, %v577_v0  ;;  %v581_v11 = vor.u32 %v579_v7, %v577_v0  ;;  %v704_v18 = vsel %vm699_vm3, %v701_v16, %v703_v8  ;;  %v818_v21 = vshrl.u32 %v817_v20, 7 }
  0x22   : > { %1469 = vmatpush3.bf16.msra.mxu0 %v1600_v40  ;;  %1403 = vmatmul.mubr.msk.bf16.gmra.mrb[4].mxu1 %vm319_vm2, %v287_v41  ;;  %v702_v17 = vsel %vm699_vm3, %v700_v15, %v701_v16 }
  0x23   : > { %1406 = vmatprep.mubr.msk.bf16.mxu1 %vm1632_vm0, %v1631_v1  ;;  %v819_v22 = vadd.s32 8, %v818_v21  ;;  %v1840_v23 = vmul.u32.u64.low 3817748708, %v818_v21  ;;  %v1841_v24 = vmul.u32.u64.high 3817748708, %v818_v21, %v1840_v23  ;;  %v820_v27 = vadd.s32 16, %v818_v21 }
  0x24   : > { %v821_v28 = vadd.s32 24, %v818_v21  ;;  %v823_v38 = vadd.s32 40, %v818_v21  ;;  %v1862_v48 = vadd.s32 48, %v818_v21  ;;  %v1868_v52 = vadd.s32 56, %v818_v21 }
  0x25   : > { %1451 = vmatmul.mubr.msk.bf16.gmra.mrb[4].mxu0 %vm319_vm2, %v562_v46  ;;  %v1843_v25 = vmul.u32.u64.low 3817748708, %v819_v22  ;;  %v1844_v26 = vmul.u32.u64.high 3817748708, %v819_v22, %v1843_v25  ;;  %v833_v29 = vshrl.u32 %v1841_v24, 3 }
  0x26   : > { %1454 = vmatprep.mubr.msk.bf16.mxu0 %vm1632_vm0, %v1631_v1  ;;  %v1847_v30 = vmul.u32.u64.low 3817748708, %v820_v27  ;;  %v1848_v31 = vmul.u32.u64.high 3817748708, %v820_v27, %v1847_v30  ;;  %v1851_v33 = vmul.u32.u64.low 3817748708, %v821_v28  ;;  %v1852_v34 = vmul.u32.u64.high 3817748708, %v821_v28, %v1851_v33 }
  0x27   : > { %v844_v32 = vshrl.u32 %v1844_v26, 3  ;;  %v834_v35 = vmul.u32 9, %v833_v29  ;;  %v1859_v45 = vmul.u32.u64.low 3817748708, %v823_v38  ;;  %v1860_v46 = vmul.u32.u64.high 3817748708, %v823_v38, %v1859_v45 }
  0x28   : > { %v855_v40 = vshrl.u32 %v1848_v31, 3  ;;  %v1883_v62 = vmul.u32.u64.low 3817748708, %v1868_v52  ;;  %v1884_v63 = vmul.u32.u64.high 3817748708, %v1868_v52, %v1883_v62 }
  0x29   : > { %v845_v37 = vmul.u32 9, %v844_v32  ;;  %v888_v61 = vshrl.u32 %v1860_v46, 3 }
  0x2a   : > { %1407 = vmatmul.mubr.msk.bf16.gmra.mrb[8].mxu1 %vm319_vm2, %v295_v55  ;;  %v856_v47 = vmul.u32 9, %v855_v40  ;;  %v910_v26 = vshrl.u32 %v1884_v63, 3 }
  0x2b   : > { %1410 = vmatprep.mubr.msk.bf16.mxu1 %vm1632_vm0, %v1631_v1  ;;  %v846_v43 = vsub.s32 %v819_v22, %v845_v37  ;;  %v889_v10 = vmul.u32 9, %v888_v61 }
  0x2c   : > { %v857_v55 = vsub.s32 %v820_v27, %v856_v47 }
  0x2d   : > { %1455 = vmatmul.mubr.msk.bf16.gmra.mrb[8].mxu0 %vm319_vm2, %v570_v58  ;;  %vm927_vm6 = vcmp.ne.s32.totalorder %v846_v43, 0  ;;  %vm936_vm7 = vcmp.lt.s32.totalorder %v846_v43, 0  ;;  %v954_v53 = vadd.s32 9, %v846_v43  ;;  %v890_v25 = vsub.s32 %v823_v38, %v889_v10 }
  0x2e   : > { %1458 = vmatprep.mubr.msk.bf16.mxu0 %vm1632_vm0, %v1631_v1  ;;  %vm1870_vm9 = vmand %vm936_vm7, %vm927_vm6  ;;  %v1876_v57 = vmul.u32.u64.low 3817748708, %v1862_v48  ;;  %v1877_v58 = vmul.u32.u64.high 3817748708, %v1862_v48, %v1876_v57  ;;  %vm928_vm10 = vcmp.ne.s32.totalorder %v857_v55, 0  ;;  %vm937_vm11 = vcmp.lt.s32.totalorder %v857_v55, 0 }
  0x2f   : > { %v963_v0 = vsel %vm1870_vm9, %v954_v53, %v846_v43  ;;  %vm940_vm6 = vcmp.lt.s32.totalorder %v890_v25, 0 }
  0x30   : > { %vm972_vm15 = vcmp.lt.s32.totalorder %v963_v0, 8 }
  0x31   : > { %v1917_v23 = vsel %vm972_vm15, 1.0, %v1631_v1 }
  0x32   : > { %1411 = vmatmul.mubr.msk.bf16.gmra.mrb[12].mxu1 %vm319_vm2, %v303_v2 }
  0x33   : > { %1414 = vmatprep.mubr.msk.bf16.mxu1 %vm1632_vm0, %v1631_v1 }
  0x35   : > { %1459 = vmatmul.mubr.msk.bf16.gmra.mrb[12].mxu0 %vm319_vm2, %v578_v3  ;;  %v1888_v3 = vadd.s32 64, %v818_v21 }
  0x36   : > { %1462 = vmatprep.mubr.msk.bf16.mxu0 %vm1632_vm0, %v1631_v1 }
  0x3a   : > { %1415 = vmatmul.mubr.msk.bf16.gmra.mrb[16].mxu1 %vm319_vm2, %v306_v9  ;;  %v955_v9 = vadd.s32 9, %v857_v55 }
  0x3b   : > { %1422 = vmatprep.mubr.msk.bf16.mxu1 %vm1632_vm0, %v1631_v1 }
  0x3d   : > { %1463 = vmatmul.mubr.msk.bf16.gmra.mrb[16].mxu0 %vm319_vm2, %v581_v11 }
  0x3e   : > { %1470 = vmatprep.mubr.msk.bf16.mxu0 %vm1632_vm0, %v1631_v1 }
  0x42   : > { %1423 = vmatmul.mubr.msk.bf16.vlgmr.msra.gmra.mrb[0].mxu1 %vm319_vm2, %v1702_v5  ;;  %v705_v5 = vrot.slane %v1751_v39, 1  ;;  %v835_v39 = vsub.s32 %v818_v21, %v834_v35  ;;  %v911_v35 = vmul.u32 9, %v910_v26 }
  0x43   : > { %1426 = vmatprep.mubr.msk.bf16.mxu1 %vm1632_vm0, %v1631_v1 }
  0x44   : > { %v706_v13 = vsel %vm699_vm3, %v703_v8, %v705_v5  ;;  %vm926_vm4 = vcmp.ne.s32.totalorder %v835_v39, 0  ;;  %vm935_vm5 = vcmp.lt.s32.totalorder %v835_v39, 0  ;;  %v953_v49 = vadd.s32 9, %v835_v39 }
  0x45   : > { %1471 = vmatmul.mubr.msk.bf16.vlgmr.msra.gmra.mrb[0].mxu0 %vm319_vm2, %v702_v17  ;;  %vm1864_vm8 = vmand %vm935_vm5, %vm926_vm4  ;;  %vm931_vm5 = vcmp.ne.s32.totalorder %v890_v25, 0 }
  0x46   : > { %1474 = vmatprep.mubr.msk.bf16.mxu0 %vm1632_vm0, %v1631_v1  ;;  %v962_v59 = vsel %vm1864_vm8, %v953_v49, %v835_v39  ;;  %vm1944_vm9 = vmand %vm940_vm6, %vm931_vm5 }
  0x47   : > { %vm1890_vm12 = vcmp.lt.s32.totalorder %v962_v59, 8 }
  0x4a   : > { %1427 = vmatmul.mubr.msk.bf16.gmra.mrb[4].mxu1 %vm319_vm2, %v1705_v6  ;;  %v707_v6 = vrot.slane %v1602_v54, 1 }
  0x4b   : > { %1430 = vmatprep.mubr.msk.bf16.mxu1 %vm1632_vm0, %v1631_v1 }
  0x4c   : > { %v708_v19 = vsel %vm699_vm3, %v705_v5, %v707_v6 }
  0x4d   : > { %1475 = vmatmul.mubr.msk.bf16.gmra.mrb[4].mxu0 %vm319_vm2, %v704_v18  ;;  %v899_v18 = vshrl.u32 %v1877_v58, 3 }
  0x4e   : > { %1478 = vmatprep.mubr.msk.bf16.mxu0 %vm1632_vm0, %v1631_v1 }
  0x4f   : > { %v900_v30 = vmul.u32 9, %v899_v18 }
  0x51   : > { %v901_v43 = vsub.s32 %v1862_v48, %v900_v30  ;;  %v912_v48 = vsub.s32 %v1868_v52, %v911_v35 }
  0x52   : > { %1431 = vmatmul.mubr.msk.bf16.gmra.mrb[8].mxu1 %vm319_vm2, %v1719_v14  ;;  %v1278_v14 = vcombine.low %v1761_v44, %v1761_v44  ;;  %v866_v44 = vshrl.u32 %v1852_v34, 3 }
  0x53   : > { %1434 = vmatprep.mubr.msk.bf16.mxu1 %vm1632_vm0, %v1631_v1  ;;  %v959_v62 = vadd.s32 9, %v901_v43 }
  0x54   : > { %v867_v51 = vmul.u32 9, %v866_v44 }
  0x55   : > { %1479 = vmatmul.mubr.msk.bf16.gmra.mrb[8].mxu0 %vm319_vm2, %v706_v13  ;;  %v1900_v5 = vmul.u32.u64.low 3817748708, %v1888_v3  ;;  %v1901_v13 = vmul.u32.u64.high 3817748708, %v1888_v3, %v1900_v5 }
  0x56   : > { %1482 = vmatprep.mubr.msk.bf16.mxu0 %vm1632_vm0, %v1631_v1  ;;  %v868_v60 = vsub.s32 %v821_v28, %v867_v51 }
  0x57   : > { %v921_v44 = vshrl.u32 %v1901_v13, 3 }
  0x58   : > { %vm929_vm13 = vcmp.ne.s32.totalorder %v868_v60, 0  ;;  %vm938_vm14 = vcmp.lt.s32.totalorder %v868_v60, 0  ;;  %v956_v15 = vadd.s32 9, %v868_v60 }
  0x59   : > { %vm1912_vm1 = vmand %vm938_vm14, %vm929_vm13  ;;  %v922_v58 = vmul.u32 9, %v921_v44  ;;  %vm933_vm13 = vcmp.ne.s32.totalorder %v912_v48, 0  ;;  %vm942_vm14 = vcmp.lt.s32.totalorder %v912_v48, 0 }
  0x5a   : > { %1435 = vmatmul.mubr.msk.bf16.gmra.mrb[12].mxu1 %vm319_vm2, %v1744_v36  ;;  %v822_v36 = vadd.s32 32, %v818_v21  ;;  %v965_v29 = vsel %vm1912_vm1, %v956_v15, %v868_v60  ;;  %vm1970_vm1 = vmand %vm942_vm14, %vm933_vm13 }
  0x5b   : > { %1438 = vmatprep.mubr.msk.bf16.mxu1 %vm1632_vm0, %v1631_v1  ;;  %vm974_vm7 = vcmp.lt.s32.totalorder %v965_v29, 8  ;;  %v923_v10 = vsub.s32 %v1888_v3, %v922_v58 }
  0x5c   : > { %v1855_v41 = vmul.u32.u64.low 3817748708, %v822_v36  ;;  %v1856_v42 = vmul.u32.u64.high 3817748708, %v822_v36, %v1855_v41  ;;  %v1949_v51 = vsel %vm974_vm7, 1.0, %v1631_v1 }
  0x5d   : > { %1483 = vmatmul.mubr.msk.bf16.gmra.mrb[12].mxu0 %vm319_vm2, %v708_v19  ;;  %v1908_v19 = vsel %vm1890_vm12, 1.0, %v1631_v1 }
  0x5e   : > { %1486 = vmatprep.mubr.msk.bf16.mxu0 %vm1632_vm0, %v1631_v1  ;;  %v877_v56 = vshrl.u32 %v1856_v42, 3  ;;  %vm1894_vm0 = vmand %vm937_vm11, %vm928_vm10  ;;  %v958_v42 = vadd.s32 9, %v890_v25  ;;  %vm932_vm10 = vcmp.ne.s32.totalorder %v901_v43, 0  ;;  %vm941_vm11 = vcmp.lt.s32.totalorder %v901_v43, 0 }
  0x5f   : > { %v964_v24 = vsel %vm1894_vm0, %v955_v9, %v857_v55  ;;  %vm1962_vm0 = vmand %vm941_vm11, %vm932_vm10  ;;  %v960_v9 = vadd.s32 9, %v912_v48 }
  0x60   : > { %v878_v2 = vmul.u32 9, %v877_v56  ;;  %vm973_vm4 = vcmp.lt.s32.totalorder %v964_v24, 8  ;;  %v967_v57 = vsel %vm1944_vm9, %v958_v42, %v890_v25  ;;  %v968_v18 = vsel %vm1962_vm0, %v959_v62, %v901_v43 }
  0x61   : > { %v1936_v40 = vsel %vm973_vm4, 1.0, %v1631_v1  ;;  %vm976_vm15 = vcmp.lt.s32.totalorder %v967_v57, 8  ;;  %v969_v3 = vsel %vm1970_vm1, %v960_v9, %v912_v48  ;;  %vm977_vm4 = vcmp.lt.s32.totalorder %v968_v18, 8 }
  0x62   : > { %1439 = vmatmul.mubr.msk.bf16.gmra.mrb[16].mxu1 %vm319_vm2, %v1278_v14  ;;  %v879_v8 = vsub.s32 %v822_v36, %v878_v2  ;;  %v961_v24 = vadd.s32 9, %v923_v10  ;;  %vm978_vm5 = vcmp.lt.s32.totalorder %v969_v3, 8  ;;  %v1320_v29 = vsel %vm977_vm4, 1.0, %v1631_v1 }
  0x63   : > { %v1321_v35 = vsel %vm978_vm5, 1.0, %v1631_v1 }
  0x64   : > { %vm939_vm3 = vcmp.lt.s32.totalorder %v879_v8, 0  ;;  %v957_v34 = vadd.s32 9, %v879_v8 }
  0x65   : > { %1487 = vmatmul.mubr.msk.bf16.gmra.mrb[16].mxu0 %vm319_vm2, %v707_v6  ;;  %vm930_vm2 = vcmp.ne.s32.totalorder %v879_v8, 0 }
  0x66   : > { %vm1931_vm8 = vmand %vm939_vm3, %vm930_vm2  ;;  %vm934_vm2 = vcmp.ne.s32.totalorder %v923_v10, 0  ;;  %vm943_vm3 = vcmp.lt.s32.totalorder %v923_v10, 0 }
  0x67   : > { %v966_v53 = vsel %vm1931_vm8, %v957_v34, %v879_v8  ;;  %v1975_v8 = vsel %vm976_vm15, 1.0, %v1631_v1  ;;  %vm952_vm6 = vmand %vm943_vm3, %vm934_vm2 }
  0x68   : > { %vm975_vm12 = vcmp.lt.s32.totalorder %v966_v53, 8 }
  0x69   : > { %v1967_v4 = vsel %vm975_vm12, 1.0, %v1631_v1 }
 0x115   : > { %v465_v7 = vpop.f32.mrb[0].mxu1 }
 0x116   : > { %v1424_v11 = vpop.f32.mrb[1].mxu1 }
 0x117   : > { %v468_v17 = vpop.f32.mrb[2].mxu1 }
 0x118   : > { %v770_v16 = vpop.f32.mrb[0].mxu0  ;;  %v1425_v20 = vpop.f32.mrb[3].mxu1 }
 0x119   : > { %v1903_v6 = vadd.f32 %v770_v16, %v465_v7  ;;  %v1472_v14 = vpop.f32.mrb[1].mxu0 }
 0x11a   : > { %v773_v22 = vpop.f32.mrb[2].mxu0 }
 0x11b   : > { %v1922_v27 = vadd.f32 %v773_v22, %v468_v17  ;;  %v1473_v28 = vpop.f32.mrb[3].mxu0  ;;  %v998_v31 = vmul.f32 %v1903_v6, %v1908_v19 }
 0x11d   : > { %v999_v32 = vmul.f32 %v1922_v27, %v1917_v23  ;;  %v473_v33 = vpop.f32.mrb[4].mxu1 }
 0x11e   : > { %v1428_v37 = vpop.f32.mrb[5].mxu1 }
 0x11f   : > { %v1007_v36 = vadd.f32 %v999_v32, %v998_v31  ;;  %v476_v41 = vpop.f32.mrb[6].mxu1 }
 0x120   : > { %v778_v39 = vpop.f32.mrb[4].mxu0  ;;  %v1429_v47 = vpop.f32.mrb[7].mxu1 }
 0x121   : > { %v1940_v45 = vadd.f32 %v778_v39, %v473_v33  ;;  %v1476_v46 = vpop.f32.mrb[5].mxu0 }
 0x122   : > { %v781_v50 = vpop.f32.mrb[6].mxu0 }
 0x123   : > { %v1000_v54 = vmul.f32 %v1940_v45, %v1936_v40  ;;  %v1956_v55 = vadd.f32 %v781_v50, %v476_v41  ;;  %v1477_v56 = vpop.f32.mrb[7].mxu0 }
 0x125   : > { %v1008_v59 = vadd.f32 %v1007_v36, %v1000_v54  ;;  %v1001_v60 = vmul.f32 %v1956_v55, %v1949_v51  ;;  %v481_v61 = vpop.f32.mrb[8].mxu1  ;;  %v970_v36 = vsel %vm952_vm6, %v961_v24, %v923_v10 }
 0x126   : > { %v1432_v63 = vpop.f32.mrb[9].mxu1  ;;  %vm979_vm7 = vcmp.lt.s32.totalorder %v970_v36, 8 }
 0x127   : > { %v1009_v52 = vadd.f32 %v1008_v59, %v1001_v60  ;;  %v484_v7 = vpop.f32.mrb[10].mxu1  ;;  %v1322_v49 = vsel %vm979_vm7, 1.0, %v1631_v1 }
 0x128   : > { %v786_v2 = vpop.f32.mrb[8].mxu0  ;;  %v1433_v15 = vpop.f32.mrb[11].mxu1 }
 0x129   : > { %v1494_v11 = vadd.f32 %v786_v2, %v481_v61  ;;  %v1480_v12 = vpop.f32.mrb[9].mxu0 }
 0x12a   : > { %v789_v17 = vpop.f32.mrb[10].mxu0 }
 0x12b   : > { %v1002_v5 = vmul.f32 %v1494_v11, %v1967_v4  ;;  %v1495_v13 = vadd.f32 %v789_v17, %v484_v7  ;;  %v1481_v14 = vpop.f32.mrb[11].mxu0 }
 0x12d   : > { %v1010_v20 = vadd.f32 %v1009_v52, %v1002_v5  ;;  %v1003_v21 = vmul.f32 %v1495_v13, %v1975_v8  ;;  %v489_v22 = vpop.f32.mrb[12].mxu1 }
 0x12e   : > { %v1436_v26 = vpop.f32.mrb[13].mxu1 }
 0x12f   : > { %v1011_v25 = vadd.f32 %v1010_v20, %v1003_v21  ;;  %v492_v30 = vpop.f32.mrb[14].mxu1 }
 0x130   : > { %v794_v28 = vpop.f32.mrb[12].mxu0  ;;  %v1437_v33 = vpop.f32.mrb[15].mxu1 }
 0x131   : > { %v1496_v31 = vadd.f32 %v794_v28, %v489_v22  ;;  %v1484_v32 = vpop.f32.mrb[13].mxu0 }
 0x132   : > { %v797_v34 = vpop.f32.mrb[14].mxu0 }
 0x133   : > { %v1004_v37 = vmul.f32 %v1496_v31, %v1320_v29  ;;  %v1497_v38 = vadd.f32 %v797_v34, %v492_v30  ;;  %v1485_v39 = vpop.f32.mrb[15].mxu0 }
 0x135   : > { %v1012_v41 = vadd.f32 %v1011_v25, %v1004_v37  ;;  %v1005_v42 = vmul.f32 %v1497_v38, %v1321_v35  ;;  %v497_v43 = vpop.f32.mrb[16].mxu1 }
 0x136   : > { %v1440_v46 = vpop.f32.mrb[17].mxu1 }
 0x137   : > { %v1013_v44 = vadd.f32 %v1012_v41, %v1005_v42  ;;  %v500_v50 = vpop.f32.mrb[18].mxu1 }
 0x138   : > { %v802_v47 = vpop.f32.mrb[16].mxu0  ;;  %v1441_v54 = vpop.f32.mrb[19].mxu1 }
 0x139   : > { %v1498_v53 = vadd.f32 %v802_v47, %v497_v43  ;;  %v1488_v48 = vpop.f32.mrb[17].mxu0 }
 0x13a   : > { %v805_v56 = vpop.f32.mrb[18].mxu0 }
 0x13b   : > { %v1006_v57 = vmul.f32 %v1498_v53, %v1322_v49  ;;  %v1489_v58 = vpop.f32.mrb[19].mxu0 }
 0x13d   : > { %v1014_v59 = vadd.f32 %v1013_v44, %v1006_v57 }
 0x13f   : > { %v1015_v60 = vrot.slane %v1014_v59, 4 }
 0x141   : > { %v1016_v61 = vadd.f32 %v1015_v60, %v1014_v59 }
 0x143   : > { %v1017_v62 = vrot.slane %v1016_v61, 2 }
 0x145   : > { %v1018_v52 = vadd.f32 %v1017_v62, %v1016_v61 }
 0x147   : > { %v1019_v63 = vrot.slane %v1018_v52, 1 }
 0x149   : > { %v1020_v0 = vadd.f32 %v1019_v63, %v1018_v52 }
 0x14b   : > { %v1021_v2 = vmul.f32 0.015625, %v1020_v0 }
 0x14d   : > { %v1022_v7 = vsub.f32 %v1903_v6, %v1021_v2  ;;  %v1023_v9 = vsub.f32 %v1922_v27, %v1021_v2  ;;  %v1024_v1 = vsub.f32 %v1940_v45, %v1021_v2  ;;  %v1025_v10 = vsub.f32 %v1956_v55, %v1021_v2 }
 0x14e   : > { %v1026_v12 = vsub.f32 %v1494_v11, %v1021_v2  ;;  %v1027_v15 = vsub.f32 %v1495_v13, %v1021_v2  ;;  %v1028_v16 = vsub.f32 %v1496_v31, %v1021_v2  ;;  %v1029_v17 = vsub.f32 %v1497_v38, %v1021_v2 }
 0x14f   : > { %v1030_v18 = vsub.f32 %v1498_v53, %v1021_v2  ;;  %v1031_v5 = vmul.f32 %v1908_v19, %v1022_v7  ;;  %v1032_v14 = vmul.f32 %v1917_v23, %v1023_v9  ;;  %v1033_v3 = vmul.f32 %v1936_v40, %v1024_v1 }
 0x150   : > { %v1034_v20 = vmul.f32 %v1949_v51, %v1025_v10  ;;  %v1035_v27 = vmul.f32 %v1967_v4, %v1026_v12  ;;  %v1036_v55 = vmul.f32 %v1975_v8, %v1027_v15  ;;  %v1037_v24 = vmul.f32 %v1320_v29, %v1028_v16 }
 0x151   : > { %v1040_v6 = vmul.f32 %v1031_v5, %v1031_v5  ;;  %v1041_v21 = vmul.f32 %v1032_v14, %v1032_v14  ;;  %v1042_v45 = vmul.f32 %v1033_v3, %v1033_v3  ;;  %v1038_v19 = vmul.f32 %v1321_v35, %v1029_v17 }
 0x152   : > { %v1043_v11 = vmul.f32 %v1034_v20, %v1034_v20  ;;  %v1044_v25 = vmul.f32 %v1035_v27, %v1035_v27  ;;  %v1045_v28 = vmul.f32 %v1036_v55, %v1036_v55  ;;  %v1039_v30 = vmul.f32 %v1322_v49, %v1030_v18 }
 0x153   : > { %v1049_v22 = vadd.f32 %v1041_v21, %v1040_v6  ;;  %v1046_v40 = vmul.f32 %v1037_v24, %v1037_v24  ;;  %v1047_v51 = vmul.f32 %v1038_v19, %v1038_v19 }
 0x154   : > { %v1048_v33 = vmul.f32 %v1039_v30, %v1039_v30 }
 0x155   : > { %v1050_v13 = vadd.f32 %v1049_v22, %v1042_v45 }
 0x157   : > { %v1051_v26 = vadd.f32 %v1050_v13, %v1043_v11 }
 0x159   : > { %v1052_v23 = vadd.f32 %v1051_v26, %v1044_v25 }
 0x15b   : > { %v1053_v31 = vadd.f32 %v1052_v23, %v1045_v28 }
 0x15d   : > { %v1054_v32 = vadd.f32 %v1053_v31, %v1046_v40 }
 0x15f   : > { %v1055_v34 = vadd.f32 %v1054_v32, %v1047_v51 }
 0x161   : > { %v1056_v4 = vadd.f32 %v1055_v34, %v1048_v33 }
 0x163   : > { %v1057_v36 = vrot.slane %v1056_v4, 4 }
 0x165   : > { %v1058_v37 = vadd.f32 %v1057_v36, %v1056_v4 }
 0x167   : > { %v1059_v38 = vrot.slane %v1058_v37, 2 }
 0x169   : > { %v1060_v8 = vadd.f32 %v1059_v38, %v1058_v37 }
 0x16b   : > { %v1061_v39 = vrot.slane %v1060_v8, 1 }
 0x16d   : > { %v1062_v41 = vadd.f32 %v1061_v39, %v1060_v8 }
 0x16f   : > { %v1063_v29 = vmul.f32 0.015625, %v1062_v41 }
 0x171   : > { %v1064_v42 = vadd.f32 1e-05, %v1063_v29 }
 0x173   : > { %1605 = vrsqrt.f32 %v1064_v42 }
 0x17d   : > { %v1606_v35 = vpop.eup %1605 }
 0x17e   : > { %v1066_v43 = vmul.f32 %v1606_v35, %v1022_v7  ;;  %v1067_v44 = vmul.f32 %v1606_v35, %v1023_v9  ;;  %v1068_v46 = vmul.f32 %v1606_v35, %v1024_v1  ;;  %v1069_v47 = vmul.f32 %v1606_v35, %v1025_v10 }
 0x17f   : > { %v1070_v49 = vmul.f32 %v1606_v35, %v1026_v12  ;;  %v1071_v50 = vmul.f32 %v1606_v35, %v1027_v15  ;;  %v1072_v53 = vmul.f32 %v1606_v35, %v1028_v16  ;;  %v1073_v48 = vmul.f32 %v1606_v35, %v1029_v17 }
 0x180   : > { %v1074_v54 = vmul.f32 %v1606_v35, %v1030_v18  ;;  %vm1075_vm8 = vcmp.ge.f32.partialorder %v1066_v43, 0.0  ;;  %vm1076_vm9 = vcmp.ge.f32.partialorder %v1067_v44, 0.0  ;;  %vm1077_vm10 = vcmp.ge.f32.partialorder %v1068_v46, 0.0 }
 0x181   : > { %vm1078_vm11 = vcmp.ge.f32.partialorder %v1069_v47, 0.0  ;;  %vm1079_vm12 = vcmp.ge.f32.partialorder %v1070_v49, 0.0  ;;  %vm1080_vm13 = vcmp.ge.f32.partialorder %v1071_v50, 0.0  ;;  %vm1081_vm14 = vcmp.ge.f32.partialorder %v1072_v53, 0.0 }
 0x182   : > { %vm1082_vm15 = vcmp.ge.f32.partialorder %v1073_v48, 0.0  ;;  %vm1083_vm0 = vcmp.ge.f32.partialorder %v1074_v54, 0.0  ;;  %v1084_v56 = vmul.f32 0.2, %v1066_v43  ;;  %v1085_v57 = vmul.f32 0.2, %v1067_v44 }
 0x183   : > { %v1086_v58 = vmul.f32 0.2, %v1068_v46  ;;  %v1087_v59 = vmul.f32 0.2, %v1069_v47  ;;  %v1088_v60 = vmul.f32 0.2, %v1070_v49 }
 0x184   : > { %v1089_v61 = vmul.f32 0.2, %v1071_v50  ;;  %v1090_v62 = vmul.f32 0.2, %v1072_v53  ;;  %v1091_v52 = vmul.f32 0.2, %v1073_v48  ;;  %v1093_v63 = vsel %vm1075_vm8, %v1066_v43, %v1084_v56 }
 0x185   : > { %v1092_v0 = vmul.f32 0.2, %v1074_v54  ;;  %v1094_v2 = vsel %vm1076_vm9, %v1067_v44, %v1085_v57  ;;  %v1095_v7 = vsel %vm1077_vm10, %v1068_v46, %v1086_v58  ;;  %v1096_v9 = vsel %vm1078_vm11, %v1069_v47, %v1087_v59 }
 0x186   : > { %v1097_v1 = vsel %vm1079_vm12, %v1070_v49, %v1088_v60  ;;  %v1098_v10 = vsel %vm1080_vm13, %v1071_v50, %v1089_v61  ;;  %v1099_v12 = vsel %vm1081_vm14, %v1072_v53, %v1090_v62  ;;  %v1100_v15 = vsel %vm1082_vm15, %v1073_v48, %v1091_v52 }
 0x187   : > { %v1101_v16 = vsel %vm1083_vm0, %v1074_v54, %v1092_v0  ;;  %v1346_v17 = vpack.c.bf16 %v1094_v2, %v1093_v63  ;;  %v1351_v18 = vpack.c.bf16 %v1096_v9, %v1095_v7  ;;  %v1356_v5 = vpack.c.bf16 %v1098_v10, %v1097_v1 }
 0x188   : > { %v1342_v14 = vpack.c.bf16 %v1101_v16, %v1101_v16  ;;  %v1361_v3 = vpack.c.bf16 %v1100_v15, %v1099_v12 }
 0x189   : > { %1347 = vst [vmem:[%s221_s11] sm:$0xff] %v1346_v17   ;;  %1363 = vst [vmem:[%s221_s11 + $0x8] sm:$0xff] %v1351_v18  }
 0x18a   : > { %1364 = vst [vmem:[%s221_s11 + $0x10] sm:$0xff] %v1356_v5   ;;  %1365 = vst [vmem:[%s221_s11 + $0x18] sm:$0xff] %v1361_v3  }
 0x18b   : > { %1147 = vst [vmem:[%s221_s11 + $0x20] sm:$0xf] %v1342_v14 }
 0x18c PF: > { %s13_s14 = sadd.s32 1, %s1629_s14   ;;  %s2040_s12 = smov %s1625_s13 }
 0x18d   : > { %p10_p5 = scmp.ge.s32.totalorder %s13_s14, 4   ;;  %s2041_s13 = smov %s2043_s2 }
 0x18f   :  { %12 = sbr.rel (!%p10_p5) target bundleno = 2 (0x2), region = 71 }

// kernel: _lambda_.7
= control target key start
LH: loop header
LB: loop body
LE: loop exit
PB: predicated region body
PF: predicated region fallthrough
CT: control target
= control target key end

     0   :  { %s1141_s12 = smov 0   ;;  %s1143_s13 = smov 0   ;;  %s1258_s0 = inlined_call_operand.vmem [shape: bf16[2,26,64], index: 0, kind: input, shape index: {}]   ;;  %s1259_s1 = inlined_call_operand.vmem [shape: bf16[4,64,128], index: 1, kind: input, shape index: {}]   ;;  %s1260_s2 = inlined_call_operand.vmem [shape: f32[1,128], index: 2, kind: input, shape index: {}]   ;;  %s1261_s3 = inlined_call_operand.vmem [shape: bf16[2,20,128], index: 3, kind: output, shape index: {}]  }
   0x1   :  { %s1145_s14 = smov 0  }
   0x2 LB: > { %s25_s2 = sadd.s32 1, %s1114_s13  ;;  %p882_p0 = scmp.ge.s32.totalorder %s1118_s14, 1  ;;  %s1118_s14 = sphi %s1145_s14, %s13_s14   ;;  %s1114_s13 = sphi %s1143_s13, %s1263_s13   ;;  %s1110_s12 = sphi %s1141_s12, %s1262_s12  }
   0x3   : > { %p27_p1 = scmp.ge.s32.totalorder %s25_s2, 2  ;;  %p168_p2 = scmp.lt.s32.totalorder %s1118_s14, 3 }
   0x5   : > { %s1265_s2 = smov (%p27_p1, %s25_s2), 0  ;;  %p169_p3 = pnand %p882_p0, %p168_p2 }
   0x6   : > { %v1072_v0 = vld [vmem:[%s1259_s1 + $0x20] sm:$0xff] (!%p169_p3)   ;;  %p202_p4 = scmp.lt.s32.totalorder (!%p169_p3), %s1110_s12, 1  ;;  %v1074_v2 = vld [vmem:[%s1259_s1 + $0x28] sm:$0xff] (!%p169_p3)   ;;  %v1076_v4 = vld [vmem:[%s1259_s1 + $0x30] sm:$0xff] (!%p169_p3)   ;;  %vm252_vm0 = vsmask.f32 (!%p169_p3), 7424  ;;  %v647_v48 = vlaneseq (!%p169_p3) }
   0x7   : > { %172 = sbr.rel (%p169_p3) target bundleno = 329 (0x149), region = 32  ;;  %v1073_v1 = vld [vmem:[%s1259_s1 + $0x40] sm:$0xff] (!%p169_p3)   ;;  %981 = vmatprep.subr.bf16.mxu1 (!%p169_p3), %v1072_v0  ;;  %v1075_v3 = vld [vmem:[%s1259_s1 + $0x48] sm:$0xff] (!%p169_p3)   ;;  %v1077_v5 = vld [vmem:[%s1259_s1 + $0x50] sm:$0xff] (!%p169_p3)   ;;  %vm292_vm1 = vcmask (!%p169_p3), 523264   ;;  %vm562_vm3 = vcmask (!%p169_p3), 1044480  }
   0x8   : > { %1005 = vmatprep.subr.bf16.mxu0 (!%p169_p3), %v1073_v1  ;;  %982 = vmatpush3.bf16.msra.mxu1 (!%p169_p3), %v1072_v0  ;;  %v1078_v6 = vld [vmem:[%s1259_s1 + $0x38] sm:$0xff] (!%p169_p3)   ;;  %v1082_v10 = vld [vmem:[%s1259_s1] sm:$0xff] (!%p169_p3)   ;;  %v1086_v28 = vld [vmem:[%s1259_s1 + $0x8] sm:$0xff] (!%p169_p3)   ;;  %vm450_vm2 = vsmask.f32 (!%p169_p3), 5376  ;;  %v648_v49 = vshrl.u32 (!%p169_p3), %v647_v48, 7 }
   0x9   : > { %1006 = vmatpush3.bf16.msra.mxu0 (!%p169_p3), %v1073_v1  ;;  %983 = vmatprep.subr.bf16.mxu1 (!%p169_p3), %v1074_v2  ;;  %v1079_v7 = vld [vmem:[%s1259_s1 + $0x58] sm:$0xff] (!%p169_p3)   ;;  %v1085_v21 = vld [vmem:[%s1259_s1 + $0x60] sm:$0xff] (!%p169_p3)   ;;  %v1088_v36 = vld [vmem:[%s1259_s1 + $0x10] sm:$0xff] (!%p169_p3)  }
   0xa   : > { %1007 = vmatprep.subr.bf16.mxu0 (!%p169_p3), %v1075_v3  ;;  %v1087_v39 = vld [vmem:[%s1259_s1 + $0x68] sm:$0xff] (!%p169_p3)   ;;  %v1090_v43 = vld [vmem:[%s1259_s1 + $0x18] sm:$0xff] (!%p169_p3)   ;;  %v1089_v44 = vld [vmem:[%s1259_s1 + $0x70] sm:$0xff] (!%p169_p3)   ;;  %v650_v50 = vadd.s32 (!%p169_p3), 16, %v648_v49  ;;  %v649_v51 = vadd.s32 (!%p169_p3), 8, %v648_v49 }
   0xb   : > { %v1091_v46 = vld [vmem:[%s1259_s1 + $0x78] sm:$0xff] (!%p169_p3)   ;;  %v1234_v54 = vmul.u32.u64.low (!%p169_p3), 3435973837, %v648_v49  ;;  %v1235_v55 = vmul.u32.u64.high 3435973837, %v648_v49, %v1234_v54 }
   0xc   : > { %984 = vmatpush3.bf16.msra.mxu1 (!%p169_p3), %v1074_v2  ;;  %v1231_v52 = vmul.u32.u64.low (!%p169_p3), 3435973837, %v650_v50  ;;  %v1232_v53 = vmul.u32.u64.high 3435973837, %v650_v50, %v1231_v52  ;;  %v1237_v56 = vmul.u32.u64.low (!%p169_p3), 3435973837, %v649_v51  ;;  %v1238_v57 = vmul.u32.u64.high 3435973837, %v649_v51, %v1237_v56 }
   0xd   : > { %1008 = vmatpush3.bf16.msra.mxu0 (!%p169_p3), %v1075_v3  ;;  %985 = vmatprep.subr.bf16.mxu1 (!%p169_p3), %v1076_v4  ;;  %v657_v59 = vshrl.u32 (!%p169_p3), %v1235_v55, 2 }
   0xe   : > { %s1267_s12 = smov (!%p202_p4, %s1110_s12), 1  ;;  %1009 = vmatprep.subr.bf16.mxu0 %v1077_v5  ;;  %v679_v58 = vshrl.u32 %v1232_v53, 2  ;;  %v668_v60 = vshrl.u32 %v1238_v57, 2 }
   0xf   : > { %s948_s25 = sshll.u32 %s1267_s12, 4  ;;  %v658_v62 = vmul.u32 5, %v657_v59  ;;  %s1040_s27 = smul.u32 12, %s1267_s12 }
  0x10   : > { %s1183_s30 = scalar_lea.vmem %s1258_s0, %s948_s25  ;;  %986 = vmatpush3.bf16.msra.mxu1 %v1076_v4  ;;  %v680_v61 = vmul.u32 5, %v679_v58  ;;  %v669_v63 = vmul.u32 5, %v668_v60 }
  0x11   : > { %v1080_v8 = vld [vmem:[%s1183_s30] sm:$0xff]   ;;  %v1081_v9 = vld [vmem:[%s1183_s30 + $0x8] ss:$0 sps:$4 sm:$0x77]   ;;  %1010 = vmatpush3.bf16.msra.mxu0 %v1077_v5  ;;  %987 = vmatprep.subr.bf16.mxu1 %v1078_v6  ;;  %v659_v1 = vsub.s32 %v648_v49, %v658_v62 }
  0x12   : > { %v254_v11 = vshrl.u32 %v1080_v8, 16  ;;  %v256_v12 = vshll.u32 %v1080_v8, 16  ;;  %v261_v13 = vshll.u32 %v1081_v9, 16  ;;  %v265_v14 = vshrl.u32 %v1081_v9, 16  ;;  %v427_v15 = vld [vmem:[%s1183_s30] sm:$0xc]  ;;  %1011 = vmatprep.subr.bf16.mxu0 %v1079_v7 }
  0x13   : > { %v428_v16 = vld [vmem:[%s1183_s30 + $0x4] sm:$0xf]  ;;  %v1084_v20 = vld [vmem:[%s1183_s30 + $0x8] sm:$0x1f]   ;;  %v549_v37 = vld [vmem:[%s1183_s30] sm:$0x8]  ;;  %v681_v0 = vsub.s32 %v650_v50, %v680_v61  ;;  %v670_v2 = vsub.s32 %v649_v51, %v669_v63 }
  0x14   : > { %v258_v17 = vrot.slane %v256_v12, 1  ;;  %v263_v18 = vrot.slane %v261_v13, 1  ;;  %v917_v19 = vcombine.low %v427_v15, %v428_v16  ;;  %988 = vmatpush3.bf16.msra.mxu1 %v1078_v6  ;;  %v460_v26 = vshrl.u32 %v1084_v20, 16  ;;  %v1093_v47 = vld [vmem:[%s1183_s30 + $0x8] ss:$0 sps:$4 sm:$0x33]   ;;  %s221_s30 = scalar_lea.vmem %s1261_s3, %s1040_s27 }
  0x15   : > { %1012 = vmatpush3.bf16.msra.mxu0 %v1079_v7  ;;  %993 = vmatprep.subr.bf16.mxu1 %v1082_v10  ;;  %v463_v27 = vshll.u32 %v1084_v20, 16  ;;  %v933_v40 = vcombine.low %v549_v37, %v428_v16  ;;  %v564_v41 = vrot.slane %v1084_v20, 3  ;;  %vm686_vm4 = vcmp.ne.s32.totalorder %v681_v0, 0 }
  0x16   : > { %v259_v22 = vor.u32 %v258_v17, %v254_v11  ;;  %v267_v23 = vor.u32 %v265_v14, %v263_v18  ;;  %v452_v24 = vshrl.u32 %v917_v19, 16  ;;  %v455_v25 = vshll.u32 %v917_v19, 16  ;;  %1017 = vmatprep.subr.bf16.mxu0 %v1085_v21 }
  0x17   : > { %v462_v32 = vrot.slane %v460_v26, 2  ;;  %v465_v33 = vrot.slane %v463_v27, 3  ;;  %v563_v42 = vrot.slane %v933_v40, 3  ;;  %vm689_vm5 = vcmp.lt.s32.totalorder %v681_v0, 0 }
  0x18   : > { %v264_v29 = vsel %vm252_vm0, %v259_v22, %v263_v18  ;;  %v454_v30 = vrot.slane %v452_v24, 2  ;;  %v457_v31 = vrot.slane %v455_v25, 3  ;;  %vm684_vm6 = vcmp.ne.s32.totalorder %v659_v1, 0  ;;  %vm692_vm10 = vmand %vm689_vm5, %vm686_vm4 }
  0x19   : > { %989 = vmatprep.mubr.msk.bf16.mxu1 %vm292_vm1, %v264_v29  ;;  %v466_v35 = vor.u32 %v465_v33, %v462_v32  ;;  %v565_v45 = vsel %vm562_vm3, %v563_v42, %v564_v41  ;;  %vm687_vm7 = vcmp.lt.s32.totalorder %v659_v1, 0  ;;  %vm685_vm8 = vcmp.ne.s32.totalorder %v670_v2, 0 }
  0x1a   : > { %v458_v34 = vor.u32 %v457_v31, %v454_v30  ;;  %990 = vmatmul.mubr.msk.bf16.vlgmr.msra.gmra.mrb[0].mxu1 %vm292_vm1, %v267_v23  ;;  %vm688_vm9 = vcmp.lt.s32.totalorder %v670_v2, 0  ;;  %v695_v3 = vadd.s32 5, %v681_v0  ;;  %vm690_vm11 = vmand %vm687_vm7, %vm684_vm6  ;;  %v693_v4 = vadd.s32 5, %v659_v1 }
  0x1b   : > { %994 = vmatpush3.bf16.msra.mxu1 %v1082_v10  ;;  %1001 = vmatprep.mubr.msk.bf16.mxu1 %vm292_vm1, %v1080_v8  ;;  %v694_v5 = vadd.s32 5, %v670_v2  ;;  %vm691_vm12 = vmand %vm688_vm9, %vm685_vm8  ;;  %v1120_v16 = vmov 0.0   ;;  %vm712_vm0 = vcmask 1043456  }
  0x1c   : > { %995 = vmatprep.subr.bf16.mxu1 %v1086_v28  ;;  %v467_v38 = vsel %vm450_vm2, %v458_v34, %v466_v35  ;;  %v698_v7 = vsel %vm692_vm10, %v695_v3, %v681_v0  ;;  %v696_v9 = vsel %vm690_vm11, %v693_v4, %v659_v1 }
  0x1d   : > { %1013 = vmatprep.mubr.msk.bf16.mxu0 %vm292_vm1, %v467_v38  ;;  %v697_v11 = vsel %vm691_vm12, %v694_v5, %v670_v2  ;;  %vm701_vm13 = vcmp.lt.s32.totalorder %v698_v7, 4  ;;  %vm699_vm14 = vcmp.lt.s32.totalorder %v696_v9, 4 }
  0x1e   : > { %1014 = vmatmul.mubr.msk.bf16.vlgmr.msra.gmra.mrb[0].mxu0 %vm292_vm1, %v466_v35  ;;  %vm700_vm15 = vcmp.lt.s32.totalorder %v697_v11, 4  ;;  %v942_v17 = vsel %vm701_vm13, 1.0, %v1120_v16  ;;  %v940_v20 = vsel %vm699_vm14, 1.0, %v1120_v16 }
  0x1f   : > { %996 = vmatpush3.bf16.msra.mxu1 %v1086_v28  ;;  %1018 = vmatpush3.bf16.msra.mxu0 %v1085_v21  ;;  %v941_v22 = vsel %vm700_vm15, 1.0, %v1120_v16 }
  0x20   : > { %997 = vmatprep.subr.bf16.mxu1 %v1088_v36  ;;  %1019 = vmatprep.subr.bf16.mxu0 %v1087_v39 }
  0x21   : > { %1025 = vmatprep.mubr.msk.bf16.mxu0 %vm292_vm1, %v565_v45 }
  0x23   : > { %998 = vmatpush3.bf16.msra.mxu1 %v1088_v36  ;;  %1020 = vmatpush3.bf16.msra.mxu0 %v1087_v39 }
  0x24   : > { %999 = vmatprep.subr.bf16.mxu1 %v1090_v43  ;;  %1021 = vmatprep.subr.bf16.mxu0 %v1089_v44 }
  0x27   : > { %1000 = vmatpush3.bf16.msra.mxu1 %v1090_v43  ;;  %1022 = vmatpush3.bf16.msra.mxu0 %v1089_v44 }
  0x28   : > { %1023 = vmatprep.subr.bf16.mxu0 %v1091_v46 }
  0x2a   : > { %1002 = vmatmul.mubr.msk.bf16.vlgmr.msra.gmra.mrb[0].mxu1 %vm292_vm1, %v1093_v47 }
  0x2b   : > { %1024 = vmatpush3.bf16.msra.mxu0 %v1091_v46 }
  0x2e   : > { %1026 = vmatmul.mubr.msk.bf16.vlgmr.msra.gmra.mrb[0].mxu0 %vm292_vm1, %v564_v41 }
  0xfd   : > { %v1003_v6 = vpop.f32.mrb[0].mxu1 }
  0xfe   : > { %v413_v8 = vpop.f32.mrb[1].mxu1 }
  0xff   : > { %v1004_v10 = vpop.f32.mrb[2].mxu1 }
 0x100   : > { %v416_v12 = vpop.f32.mrb[3].mxu1 }
 0x101   : > { %v1027_v13 = vpop.f32.mrb[0].mxu0 }
 0x102   : > { %v1029_v14 = vadd.f32 %v1027_v13, %v1003_v6  ;;  %v630_v15 = vpop.f32.mrb[1].mxu0 }
 0x103   : > { %v1030_v18 = vadd.f32 %v630_v15, %v413_v8  ;;  %v1028_v19 = vpop.f32.mrb[2].mxu0 }
 0x104   : > { %v633_v21 = vpop.f32.mrb[3].mxu0  ;;  %v710_v24 = vmul.f32 %v1029_v14, %v942_v17 }
 0x105   : > { %v1031_v23 = vadd.f32 %v633_v21, %v416_v12  ;;  %v708_v25 = vmul.f32 %v1030_v18, %v940_v20 }
 0x106   : > { %v713_v28 = vsel %vm712_vm0, %v710_v24, 0.0 }
 0x107   : > { %v709_v26 = vmul.f32 %v1031_v23, %v941_v22 }
 0x109   : > { %v711_v27 = vadd.f32 %v709_v26, %v708_v25 }
 0x10b   : > { %v714_v29 = vadd.f32 %v713_v28, %v711_v27 }
 0x10d   : > { %v715_v30 = vrot.slane %v714_v29, 4 }
 0x10f   : > { %v716_v31 = vadd.f32 %v715_v30, %v714_v29 }
 0x111   : > { %v717_v32 = vrot.slane %v716_v31, 2 }
 0x113   : > { %v718_v33 = vadd.f32 %v717_v32, %v716_v31 }
 0x115   : > { %v719_v34 = vrot.slane %v718_v33, 1 }
 0x117   : > { %v720_v35 = vadd.f32 %v719_v34, %v718_v33 }
 0x119   : > { %v721_v36 = vmul.f32 0.0625, %v720_v35 }
 0x11b   : > { %v722_v37 = vsub.f32 %v1030_v18, %v721_v36  ;;  %v723_v38 = vsub.f32 %v1031_v23, %v721_v36  ;;  %v724_v39 = vsub.f32 %v1029_v14, %v721_v36 }
 0x11d   : > { %v725_v40 = vmul.f32 %v940_v20, %v722_v37  ;;  %v726_v41 = vmul.f32 %v941_v22, %v723_v38  ;;  %v727_v42 = vmul.f32 %v942_v17, %v724_v39 }
 0x11f   : > { %v728_v43 = vmul.f32 %v725_v40, %v725_v40  ;;  %v729_v44 = vmul.f32 %v726_v41, %v726_v41  ;;  %v730_v45 = vmul.f32 %v727_v42, %v727_v42 }
 0x121   : > { %v731_v46 = vadd.f32 %v729_v44, %v728_v43  ;;  %v732_v47 = vsel %vm712_vm0, %v730_v45, 0.0 }
 0x123   : > { %v733_v48 = vadd.f32 %v732_v47, %v731_v46 }
 0x125   : > { %v734_v49 = vrot.slane %v733_v48, 4 }
 0x127   : > { %v735_v50 = vadd.f32 %v734_v49, %v733_v48 }
 0x129   : > { %v736_v51 = vrot.slane %v735_v50, 2 }
 0x12b   : > { %v737_v52 = vadd.f32 %v736_v51, %v735_v50 }
 0x12d   : > { %v738_v53 = vrot.slane %v737_v52, 1 }
 0x12f   : > { %v739_v54 = vadd.f32 %v738_v53, %v737_v52 }
 0x131   : > { %v740_v55 = vmul.f32 0.0625, %v739_v54 }
 0x133   : > { %v741_v56 = vadd.f32 1e-05, %v740_v55 }
 0x135   : > { %1094 = vrsqrt.f32 %v741_v56 }
 0x13f   : > { %v1095_v57 = vpop.eup %1094 }
 0x140   : > { %v743_v58 = vmul.f32 %v1095_v57, %v722_v37  ;;  %v744_v59 = vmul.f32 %v1095_v57, %v723_v38  ;;  %v745_v60 = vmul.f32 %v1095_v57, %v724_v39 }
 0x142   : > { %vm746_vm1 = vcmp.ge.f32.partialorder %v743_v58, 0.0  ;;  %vm747_vm2 = vcmp.ge.f32.partialorder %v744_v59, 0.0  ;;  %vm748_vm3 = vcmp.ge.f32.partialorder %v745_v60, 0.0  ;;  %v749_v61 = vmul.f32 0.2, %v743_v58 }
 0x143   : > { %v750_v62 = vmul.f32 0.2, %v744_v59  ;;  %v751_v63 = vmul.f32 0.2, %v745_v60 }
 0x144   : > { %v752_v0 = vsel %vm746_vm1, %v743_v58, %v749_v61 }
 0x145   : > { %v753_v1 = vsel %vm747_vm2, %v744_v59, %v750_v62  ;;  %v754_v2 = vsel %vm748_vm3, %v745_v60, %v751_v63 }
 0x146   : > { %v951_v3 = vpack.c.bf16 %v754_v2, %v754_v2  ;;  %v955_v4 = vpack.c.bf16 %v753_v1, %v752_v0 }
 0x148   : > { %956 = vst [vmem:[%s221_s30] sm:$0xff] %v955_v4   ;;  %770 = vst [vmem:[%s221_s30 + $0x8] sm:$0x3] %v951_v3 }
 0x149 PF: > { %s13_s14 = sadd.s32 1, %s1118_s14   ;;  %s1262_s12 = smov %s1114_s13 }
 0x14a   : > { %p10_p5 = scmp.ge.s32.totalorder %s13_s14, 4   ;;  %s1263_s13 = smov %s1265_s2 }
 0x14c   :  { %12 = sbr.rel (!%p10_p5) target bundleno = 2 (0x2), region = 71 }

// kernel: _lambda_.8
= control target key start
LH: loop header
LB: loop body
LE: loop exit
PB: predicated region body
PF: predicated region fallthrough
CT: control target
= control target key end

     0   :  { %s2413_s12 = smov 0   ;;  %s2415_s13 = smov 0   ;;  %s2695_s0 = inlined_call_operand.vmem [shape: bf16[2,51,32], index: 0, kind: input, shape index: {}]   ;;  %s2696_s1 = inlined_call_operand.vmem [shape: bf16[16,32,128], index: 1, kind: input, shape index: {}]   ;;  %s2697_s2 = inlined_call_operand.vmem [shape: f32[1,128], index: 2, kind: input, shape index: {}]   ;;  %s2698_s3 = inlined_call_operand.vmem [shape: bf16[2,24,128], index: 3, kind: output, shape index: {}]  }
   0x1   :  { %s2417_s14 = smov 0  }
   0x2 LB: > { %s25_s2 = sadd.s32 1, %s2386_s13  ;;  %p1867_p0 = scmp.ge.s32.totalorder %s2390_s14, 1  ;;  %s2390_s14 = sphi %s2417_s14, %s13_s14   ;;  %s2386_s13 = sphi %s2415_s13, %s2700_s13   ;;  %s2382_s12 = sphi %s2413_s12, %s2699_s12  }
   0x3   : > { %p27_p1 = scmp.ge.s32.totalorder %s25_s2, 2  ;;  %p168_p2 = scmp.lt.s32.totalorder %s2390_s14, 3 }
   0x5   : > { %s2702_s2 = smov (%p27_p1, %s25_s2), 0  ;;  %p169_p3 = pnand %p1867_p0, %p168_p2 }
   0x6   : > { %v2311_v0 = vld [vmem:[%s2696_s1 + $0x80] sm:$0xff] (!%p169_p3)   ;;  %p202_p4 = scmp.lt.s32.totalorder (!%p169_p3), %s2382_s12, 1  ;;  %v2312_v1 = vld [vmem:[%s2696_s1 + $0x88] sm:$0xff] (!%p169_p3)   ;;  %v2313_v2 = vld [vmem:[%s2696_s1 + $0x10] sm:$0xff] (!%p169_p3)   ;;  %vm274_vm0 = vcmask (!%p169_p3), 261120   ;;  %vm404_vm2 = vcmask (!%p169_p3), 1046528  }
   0x7   : > { %172 = sbr.rel (%p169_p3) target bundleno = 397 (0x18d), region = 32  ;;  %2161 = vmatprep.subr.bf16.mxu0 (!%p169_p3), %v2311_v0  ;;  %v2320_v3 = vld [vmem:[%s2696_s1 + $0x18] sm:$0xff] (!%p169_p3)   ;;  %2097 = vmatprep.subr.bf16.mxu1 (!%p169_p3), %v2313_v2  ;;  %v2321_v4 = vld [vmem:[%s2696_s1 + $0x90] sm:$0xff] (!%p169_p3)   ;;  %v2324_v5 = vld [vmem:[%s2696_s1] sm:$0xff] (!%p169_p3)   ;;  %vm246_vm1 = vsmask.f32 (!%p169_p3), 7424 }
   0x8   : > { %2162 = vmatpush3.bf16.msra.mxu0 (!%p169_p3), %v2311_v0  ;;  %2098 = vmatpush3.bf16.msra.mxu1 (!%p169_p3), %v2313_v2  ;;  %v2325_v19 = vld [vmem:[%s2696_s1 + $0x98] sm:$0xff] (!%p169_p3)   ;;  %v2329_v32 = vld [vmem:[%s2696_s1 + $0xa0] sm:$0xff] (!%p169_p3)   ;;  %v2328_v43 = vld [vmem:[%s2696_s1 + $0x8] sm:$0xff] (!%p169_p3)   ;;  %vm486_vm3 = vsmask.f32 (!%p169_p3), 6400 }
   0x9   : > { %2163 = vmatprep.subr.bf16.mxu0 (!%p169_p3), %v2312_v1  ;;  %2099 = vmatprep.subr.bf16.mxu1 (!%p169_p3), %v2320_v3  ;;  %v2332_v51 = vld [vmem:[%s2696_s1 + $0xa8] sm:$0xff] (!%p169_p3)   ;;  %v2330_v53 = vld [vmem:[%s2696_s1 + $0x20] sm:$0xff] (!%p169_p3)   ;;  %v2335_v59 = vld [vmem:[%s2696_s1 + $0xb0] sm:$0xff] (!%p169_p3)  }
   0xc   : > { %2164 = vmatpush3.bf16.msra.mxu0 (!%p169_p3), %v2312_v1  ;;  %2100 = vmatpush3.bf16.msra.mxu1 (!%p169_p3), %v2320_v3 }
   0xd   : > { %2169 = vmatprep.subr.bf16.mxu0 (!%p169_p3), %v2321_v4  ;;  %2105 = vmatprep.subr.bf16.mxu1 (!%p169_p3), %v2324_v5 }
   0xe   : > { %s2704_s12 = smov (!%p202_p4, %s2382_s12), 1 }
   0xf   : > { %s2284_s23 = smul.u32 28, %s2704_s12 }
  0x10   : > { %s2285_s9 = smul.u32 12, %s2704_s12 }
  0x11   : > { %s2452_s28 = scalar_lea.vmem %s2695_s0, %s2284_s23 }
  0x12   : > { %v2458_v6 = vld [vmem:[%s2452_s28 + $0x8] sm:$0xf]  ;;  %v2461_v7 = vld [vmem:[%s2452_s28 + $0xc] sm:$0xf]  ;;  %v755_v8 = vld [vmem:[%s2452_s28 + $0x4] sm:$0xe]  ;;  %s221_s15 = scalar_lea.vmem %s2698_s3, %s2285_s9 }
  0x13   : > { %v836_v9 = vld [vmem:[%s2452_s28 + $0x10] sm:$0x3]  ;;  %v1945_v10 = vcombine.low %v2458_v6, %v2461_v7  ;;  %v2468_v11 = vcombine.low %v755_v8, %v2458_v6  ;;  %v223_v14 = vld [vmem:[%s2452_s28] sm:$0xf]  ;;  %v2477_v15 = vld [vmem:[%s2452_s28 + $0x4] sm:$0xf] }
  0x14   : > { %v2471_v12 = vcombine.low %v2461_v7, %v836_v9  ;;  %v2319_v13 = vld [vmem:[%s2452_s28 + $0x10] ss:$0 sps:$4 sm:$0xff]   ;;  %v2480_v16 = vld [vmem:[%s2452_s28 + $0x8] sm:$0xf]  ;;  %v230_v17 = vld [vmem:[%s2452_s28 + $0xc] sm:$0x1]  ;;  %v1874_v18 = vcombine.low %v223_v14, %v2477_v15 }
  0x15   : > { %2165 = vmatprep.mubr.msk.bf16.mxu0 %vm274_vm0, %v1945_v10  ;;  %v2489_v20 = vcombine.low %v2480_v16, %v230_v17  ;;  %v1010_v21 = vld [vmem:[%s2452_s28 + $0x8] sm:$0xf]  ;;  %v2493_v22 = vld [vmem:[%s2452_s28 + $0xc] sm:$0xf]  ;;  %v2496_v25 = vld [vmem:[%s2452_s28 + $0x10] sm:$0xf] }
  0x16   : > { %2166 = vmatmul.mubr.msk.bf16.vlgmr.msra.gmra.mrb[0].mxu0 %vm274_vm0, %v2319_v13  ;;  %v248_v23 = vshrl.u32 %v1874_v18, 16  ;;  %v250_v24 = vshll.u32 %v1874_v18, 16  ;;  %v1013_v28 = vld [vmem:[%s2452_s28 + $0x14] sm:$0x1]  ;;  %v1955_v29 = vcombine.low %v1010_v21, %v2493_v22  ;;  %v1113_v44 = vld [vmem:[%s2452_s28 + $0x8] sm:$0xe] }
  0x17   : > { %2170 = vmatpush3.bf16.msra.mxu0 %v2321_v4  ;;  %v255_v26 = vshll.u32 %v2489_v20, 16  ;;  %v259_v27 = vshrl.u32 %v2489_v20, 16  ;;  %v2503_v31 = vcombine.low %v2496_v25, %v1013_v28  ;;  %v1965_v46 = vcombine.low %v1113_v44, %v2493_v22  ;;  %v395_v49 = vld [vmem:[%s2452_s28] sm:$0xe]  ;;  %v1194_v57 = vld [vmem:[%s2452_s28 + $0x14] sm:$0x3] }
  0x18   : > { %2171 = vmatprep.subr.bf16.mxu0 %v2325_v19  ;;  %v252_v30 = vrot.slane %v250_v24, 1  ;;  %v1030_v34 = vshrl.u32 %v1955_v29, 16  ;;  %v1032_v35 = vshll.u32 %v1955_v29, 16  ;;  %v1889_v54 = vcombine.low %v395_v49, %v2477_v15  ;;  %v477_v3 = vld [vmem:[%s2452_s28 + $0xc] sm:$0x3]  ;;  %v2338_v24 = vld [vmem:[%s2696_s1 + $0xb8] sm:$0xff]  }
  0x19   : > { %v257_v33 = vrot.slane %v255_v26, 1  ;;  %v1037_v37 = vshll.u32 %v2503_v31, 16  ;;  %v1041_v38 = vshrl.u32 %v2503_v31, 16  ;;  %v1123_v47 = vrot.slane %v2503_v31, 1  ;;  %v2334_v13 = vld [vmem:[%s2696_s1 + $0x28] sm:$0xff]  }
  0x1a   : > { %v253_v36 = vor.u32 %v252_v30, %v248_v23  ;;  %v1034_v40 = vrot.slane %v1032_v35, 1  ;;  %v1122_v52 = vrot.slane %v1965_v46, 1  ;;  %v1204_v55 = vshrl.u32 %v1965_v46, 16  ;;  %v2337_v23 = vld [vmem:[%s2696_s1 + $0x30] sm:$0xff]   ;;  %v1368_v35 = vld [vmem:[%s2452_s28 + $0xc] sm:$0xf] }
  0x1b   : > { %2172 = vmatpush3.bf16.msra.mxu0 %v2325_v19  ;;  %v261_v39 = vor.u32 %v259_v27, %v257_v33  ;;  %v1039_v42 = vrot.slane %v1037_v37, 1  ;;  %v1207_v58 = vshll.u32 %v1965_v46, 16  ;;  %v1974_v60 = vcombine.low %v2496_v25, %v1194_v57  ;;  %v1371_v44 = vld [vmem:[%s2452_s28 + $0x18] sm:$0x1] }
  0x1c   : > { %2177 = vmatprep.subr.bf16.mxu0 %v2329_v32  ;;  %v258_v41 = vsel %vm246_vm1, %v253_v36, %v257_v33  ;;  %v1035_v45 = vor.u32 %v1034_v40, %v1030_v34  ;;  %v1124_v56 = vsel %vm404_vm2, %v1122_v52, %v1123_v47  ;;  %v1206_v61 = vrot.slane %v1204_v55, 1  ;;  %v2564_v36 = vld [vmem:[%s2452_s28 + $0x10] sm:$0xf]  ;;  %v2571_v40 = vld [vmem:[%s2452_s28 + $0x14] sm:$0xf] }
  0x1d   : > { %2101 = vmatprep.mubr.msk.bf16.mxu1 %vm274_vm0, %v258_v41  ;;  %v1043_v48 = vor.u32 %v1041_v38, %v1039_v42  ;;  %v1209_v62 = vrot.slane %v1207_v58, 2  ;;  %v405_v63 = vrot.slane %v1889_v54, 1  ;;  %v406_v0 = vrot.slane %v2489_v20, 1  ;;  %v652_v52 = vld [vmem:[%s2452_s28 + $0x4] sm:$0xf] }
  0x1e   : > { %2102 = vmatmul.mubr.msk.bf16.vlgmr.msra.gmra.mrb[0].mxu1 %vm274_vm0, %v261_v39  ;;  %v1040_v50 = vsel %vm246_vm1, %v1035_v45, %v1039_v42  ;;  %v1212_v1 = vshrl.u32 %v1974_v60, 16  ;;  %v1215_v2 = vshll.u32 %v1974_v60, 16  ;;  %v1898_v4 = vcombine.low %v2480_v16, %v477_v3  ;;  %v2340_v39 = vld [vmem:[%s2696_s1 + $0x38] sm:$0xff]  }
  0x1f   : > { %2106 = vmatpush3.bf16.msra.mxu1 %v2324_v5  ;;  %2109 = vmatprep.mubr.msk.bf16.mxu1 %vm274_vm0, %v1874_v18  ;;  %v1880_v5 = vcombine.low %v2480_v16, %v2480_v16  ;;  %v488_v10 = vshrl.u32 %v1889_v54, 16  ;;  %v1210_v14 = vor.u32 %v1209_v62, %v1206_v61  ;;  %v491_v17 = vshll.u32 %v1889_v54, 16 }
  0x20   : > { %2173 = vmatprep.mubr.msk.bf16.mxu0 %vm274_vm0, %v1040_v50  ;;  %2107 = vmatprep.subr.bf16.mxu1 %v2328_v43  ;;  %v1214_v8 = vrot.slane %v1212_v1, 1  ;;  %v1217_v9 = vrot.slane %v1215_v2, 2  ;;  %v496_v18 = vshrl.u32 %v1898_v4, 16  ;;  %v499_v19 = vshll.u32 %v1898_v4, 16  ;;  %v2347_v2 = vld [vmem:[%s2452_s28 + $0x14] ss:$0 sps:$4 sm:$0xff]  }
  0x21   : > { %v407_v20 = vsel %vm404_vm2, %v405_v63, %v406_v0  ;;  %v490_v27 = vrot.slane %v488_v10, 1  ;;  %v493_v28 = vrot.slane %v491_v17, 2  ;;  %v854_v31 = vshrl.u32 %v2471_v12, 16  ;;  %v2350_v4 = vld [vmem:[%s2696_s1 + $0x50] sm:$0xff]   ;;  %v1552_v17 = vld [vmem:[%s2452_s28 + $0x18] sm:$0x3] }
  0x22   : > { %2174 = vmatmul.mubr.msk.bf16.vlgmr.msra.gmra.mrb[0].mxu0 %vm274_vm0, %v1043_v48  ;;  %v1218_v21 = vor.u32 %v1217_v9, %v1214_v8  ;;  %v498_v29 = vrot.slane %v496_v18, 1  ;;  %v501_v30 = vrot.slane %v499_v19, 2  ;;  %v857_v37 = vshll.u32 %v2471_v12, 16  ;;  %v1471_v8 = vld [vmem:[%s2452_s28 + $0xc] sm:$0xe]  ;;  %v2356_v9 = vld [vmem:[%s2696_s1 + $0xe0] sm:$0xff]  }
  0x23   : > { %2178 = vmatpush3.bf16.msra.mxu0 %v2329_v32  ;;  %2181 = vmatprep.mubr.msk.bf16.mxu0 %vm274_vm0, %v1124_v56  ;;  %v2341_v32 = vld [vmem:[%s2696_s1 + $0xc0] sm:$0xff]   ;;  %v494_v33 = vor.u32 %v493_v28, %v490_v27  ;;  %v856_v38 = vrot.slane %v854_v31, 1  ;;  %v1993_v41 = vcombine.low %v1368_v35, %v2564_v36  ;;  %v846_v42 = vshrl.u32 %v2468_v11, 16  ;;  %v2351_v19 = vld [vmem:[%s2452_s28 + $0xc] ss:$0 sps:$4 sm:$0xff]  }
  0x24   : > { %2108 = vmatpush3.bf16.msra.mxu1 %v2328_v43  ;;  %2179 = vmatprep.subr.bf16.mxu0 %v2332_v51  ;;  %v1219_v26 = vsel %vm486_vm3, %v1210_v14, %v1218_v21  ;;  %v502_v34 = vor.u32 %v501_v30, %v498_v29  ;;  %v859_v45 = vrot.slane %v857_v37, 2  ;;  %v849_v12 = vshll.u32 %v2468_v11, 16  ;;  %v2358_v29 = vld [vmem:[%s2696_s1 + $0xe8] sm:$0xff]  }
  0x25   : > { %2113 = vmatprep.subr.bf16.mxu1 %v2330_v53  ;;  %v1983_v46 = vcombine.low %v2493_v22, %v2496_v25  ;;  %v2586_v48 = vcombine.low %v2571_v40, %v1371_v44  ;;  %v1390_v49 = vshll.u32 %v1993_v41, 16  ;;  %v848_v50 = vrot.slane %v846_v42, 1 }
  0x26   : > { %v503_v43 = vsel %vm486_vm3, %v494_v33, %v502_v34  ;;  %v851_v22 = vrot.slane %v849_v12, 2  ;;  %v2593_v25 = vor.u32 %v859_v45, %v856_v38  ;;  %v1388_v54 = vshrl.u32 %v1993_v41, 16  ;;  %v2360_v12 = vld [vmem:[%s2696_s1 + $0x68] sm:$0xff]  }
  0x27   : > { %2180 = vmatpush3.bf16.msra.mxu0 %v2332_v51  ;;  %v2343_v51 = vld [vmem:[%s2696_s1 + $0x40] sm:$0xff]   ;;  %v1392_v55 = vrot.slane %v1390_v49, 1  ;;  %v1395_v56 = vshll.u32 %v2586_v48, 16  ;;  %v1917_v58 = vcombine.low %v652_v52, %v2458_v6  ;;  %v1907_v61 = vcombine.low %v2477_v15, %v2480_v16  ;;  %v2346_v6 = vld [vmem:[%s2696_s1 + $0x48] sm:$0xff]   ;;  %v2352_v15 = vld [vmem:[%s2696_s1 + $0xd8] sm:$0xff]  }
  0x28   : > { %2185 = vmatprep.subr.bf16.mxu0 %v2335_v59  ;;  %v852_v57 = vor.u32 %v851_v22, %v848_v50  ;;  %v2003_v10 = vcombine.low %v1471_v8, %v2564_v36  ;;  %v1399_v18 = vshrl.u32 %v2586_v48, 16  ;;  %v2361_v36 = vld [vmem:[%s2696_s1 + $0xf0] sm:$0xff]   ;;  %v764_v41 = vrot.slane %v2468_v11, 1  ;;  %v2363_v11 = vld [vmem:[%s2696_s1 + $0xf8] sm:$0xff]  }
  0x29   : > { %v1393_v62 = vor.u32 %v1392_v55, %v1388_v54  ;;  %v1397_v63 = vrot.slane %v1395_v56, 1  ;;  %v674_v1 = vshll.u32 %v1917_v58, 16  ;;  %v672_v3 = vshrl.u32 %v1917_v58, 16  ;;  %v2365_v49 = vld [vmem:[%s2696_s1 + $0x78] sm:$0xff]  }
  0x2a   : > { %2110 = vmatmul.mubr.msk.bf16.vlgmr.msra.gmra.mrb[0].mxu1 %vm274_vm0, %v1880_v5  ;;  %v2604_v60 = vsel %vm486_vm3, %v852_v57, %v2593_v25  ;;  %v1562_v28 = vshrl.u32 %v2003_v10, 16  ;;  %v1565_v31 = vshll.u32 %v2003_v10, 16  ;;  %v1647_v50 = vlaneseq }
  0x2b   : > { %2114 = vmatpush3.bf16.msra.mxu1 %v2330_v53  ;;  %2117 = vmatprep.mubr.msk.bf16.mxu1 %vm274_vm0, %v407_v20  ;;  %v2348_v53 = vld [vmem:[%s2696_s1 + $0xd0] sm:$0xff]   ;;  %v1398_v16 = vsel %vm246_vm1, %v1393_v62, %v1397_v63  ;;  %v1480_v20 = vrot.slane %v2003_v10, 1  ;;  %v1401_v27 = vor.u32 %v1399_v18, %v1397_v63 }
  0x2c   : > { %2115 = vmatprep.subr.bf16.mxu1 %v2334_v13  ;;  %v1564_v37 = vrot.slane %v1562_v28, 1  ;;  %v1567_v38 = vrot.slane %v1565_v31, 2 }
  0x2e   : > { %2182 = vmatmul.mubr.msk.bf16.vlgmr.msra.gmra.mrb[0].mxu0 %vm274_vm0, %v1123_v47  ;;  %v2344_v47 = vld [vmem:[%s2696_s1 + $0xc8] sm:$0xff]   ;;  %v1568_v44 = vor.u32 %v1567_v38, %v1564_v37 }
  0x2f   : > { %2186 = vmatpush3.bf16.msra.mxu0 %v2335_v59  ;;  %2189 = vmatprep.mubr.msk.bf16.mxu0 %vm274_vm0, %v1219_v26  ;;  %v655_v59 = vld [vmem:[%s2452_s28 + $0x10] sm:$0x1] }
  0x30   : > { %2116 = vmatpush3.bf16.msra.mxu1 %v2334_v13  ;;  %2187 = vmatprep.subr.bf16.mxu0 %v2338_v24 }
  0x31   : > { %2121 = vmatprep.subr.bf16.mxu1 %v2337_v23 }
  0x33   : > { %2188 = vmatpush3.bf16.msra.mxu0 %v2338_v24  ;;  %v2355_v24 = vld [vmem:[%s2696_s1 + $0x58] sm:$0xff]  }
  0x34   : > { %2193 = vmatprep.subr.bf16.mxu0 %v2341_v32 }
  0x36   : > { %2118 = vmatmul.mubr.msk.bf16.vlgmr.msra.gmra.mrb[0].mxu1 %vm274_vm0, %v406_v0  ;;  %v2609_v0 = vcombine.low %v2461_v7, %v655_v59  ;;  %v676_v7 = vrot.slane %v674_v1, 1 }
  0x37   : > { %2122 = vmatpush3.bf16.msra.mxu1 %v2337_v23  ;;  %2125 = vmatprep.mubr.msk.bf16.mxu1 %vm274_vm0, %v503_v43  ;;  %v2012_v23 = vcombine.low %v2571_v40, %v1552_v17 }
  0x38   : > { %2123 = vmatprep.subr.bf16.mxu1 %v2340_v39  ;;  %v679_v5 = vshll.u32 %v2609_v0, 16  ;;  %v677_v13 = vor.u32 %v676_v7, %v672_v3  ;;  %v683_v35 = vshrl.u32 %v2609_v0, 16  ;;  %v765_v42 = vrot.slane %v2609_v0, 1 }
  0x39   : > { %v1573_v33 = vshll.u32 %v2012_v23, 16 }
  0x3a   : > { %2190 = vmatmul.mubr.msk.bf16.vlgmr.msra.gmra.mrb[0].mxu0 %vm274_vm0, %v1218_v21  ;;  %v681_v14 = vrot.slane %v679_v5, 1  ;;  %v1481_v21 = vrot.slane %v2586_v48, 1  ;;  %v2362_v48 = vld [vmem:[%s2696_s1 + $0x70] sm:$0xff]  }
  0x3b   : > { %2194 = vmatpush3.bf16.msra.mxu0 %v2341_v32  ;;  %2197 = vmatprep.mubr.msk.bf16.mxu0 %vm274_vm0, %v1983_v46  ;;  %v1570_v32 = vshrl.u32 %v2012_v23, 16  ;;  %v1575_v40 = vrot.slane %v1573_v33, 2  ;;  %v766_v46 = vsel %vm404_vm2, %v764_v41, %v765_v42 }
  0x3c   : > { %2124 = vmatpush3.bf16.msra.mxu1 %v2340_v39  ;;  %2195 = vmatprep.subr.bf16.mxu0 %v2344_v47  ;;  %v682_v26 = vsel %vm246_vm1, %v677_v13, %v681_v14  ;;  %v1482_v30 = vsel %vm404_vm2, %v1480_v20, %v1481_v21  ;;  %v685_v43 = vor.u32 %v683_v35, %v681_v14 }
  0x3d   : > { %2129 = vmatprep.subr.bf16.mxu1 %v2343_v51  ;;  %v1572_v39 = vrot.slane %v1570_v32, 1 }
  0x3f   : > { %2196 = vmatpush3.bf16.msra.mxu0 %v2344_v47  ;;  %v1576_v45 = vor.u32 %v1575_v40, %v1572_v39 }
  0x40   : > { %2201 = vmatprep.subr.bf16.mxu0 %v2348_v53 }
  0x41   : > { %v1577_v47 = vsel %vm486_vm3, %v1568_v44, %v1576_v45 }
  0x42   : > { %2126 = vmatmul.mubr.msk.bf16.vlgmr.msra.gmra.mrb[0].mxu1 %vm274_vm0, %v502_v34  ;;  %v2357_v34 = vld [vmem:[%s2696_s1 + $0x60] sm:$0xff]  }
  0x43   : > { %2130 = vmatpush3.bf16.msra.mxu1 %v2343_v51  ;;  %2133 = vmatprep.mubr.msk.bf16.mxu1 %vm274_vm0, %v1907_v61  ;;  %v1648_v51 = vshrl.u32 %v1647_v50, 7 }
  0x44   : > { %2131 = vmatprep.subr.bf16.mxu1 %v2346_v6 }
  0x45   : > { %v1650_v56 = vadd.s32 16, %v1648_v51  ;;  %v1655_v57 = vand.u32 7, %v1648_v51 }
  0x46   : > { %2198 = vmatmul.mubr.msk.bf16.vlgmr.msra.gmra.mrb[0].mxu0 %vm274_vm0, %v2347_v2 }
  0x47   : > { %2202 = vmatpush3.bf16.msra.mxu0 %v2348_v53  ;;  %2205 = vmatprep.mubr.msk.bf16.mxu0 %vm274_vm0, %v1398_v16  ;;  %v1649_v53 = vadd.s32 8, %v1648_v51  ;;  %v1669_v59 = vand.u32 7, %v1650_v56  ;;  %vm1687_vm4 = vcmp.lt.s32.totalorder %v1655_v57, 5 }
  0x48   : > { %2132 = vmatpush3.bf16.msra.mxu1 %v2346_v6  ;;  %2203 = vmatprep.subr.bf16.mxu0 %v2352_v15 }
  0x49   : > { %2137 = vmatprep.subr.bf16.mxu1 %v2350_v4  ;;  %v1662_v58 = vand.u32 7, %v1649_v53  ;;  %vm1689_vm6 = vcmp.lt.s32.totalorder %v1669_v59, 5 }
  0x4b   : > { %2204 = vmatpush3.bf16.msra.mxu0 %v2352_v15  ;;  %vm1688_vm5 = vcmp.lt.s32.totalorder %v1662_v58, 5 }
  0x4c   : > { %2209 = vmatprep.subr.bf16.mxu0 %v2356_v9 }
  0x4e   : > { %2134 = vmatmul.mubr.msk.bf16.vlgmr.msra.gmra.mrb[0].mxu1 %vm274_vm0, %v2351_v19 }
  0x4f   : > { %2138 = vmatpush3.bf16.msra.mxu1 %v2350_v4  ;;  %2141 = vmatprep.mubr.msk.bf16.mxu1 %vm274_vm0, %v682_v26 }
  0x50   : > { %2139 = vmatprep.subr.bf16.mxu1 %v2355_v24 }
  0x52   : > { %2206 = vmatmul.mubr.msk.bf16.vlgmr.msra.gmra.mrb[0].mxu0 %vm274_vm0, %v1401_v27 }
  0x53   : > { %2210 = vmatpush3.bf16.msra.mxu0 %v2356_v9  ;;  %2213 = vmatprep.mubr.msk.bf16.mxu0 %vm274_vm0, %v1482_v30 }
  0x54   : > { %2140 = vmatpush3.bf16.msra.mxu1 %v2355_v24  ;;  %2211 = vmatprep.subr.bf16.mxu0 %v2358_v29 }
  0x55   : > { %2145 = vmatprep.subr.bf16.mxu1 %v2357_v34 }
  0x57   : > { %2212 = vmatpush3.bf16.msra.mxu0 %v2358_v29 }
  0x58   : > { %2217 = vmatprep.subr.bf16.mxu0 %v2361_v36 }
  0x5a   : > { %2142 = vmatmul.mubr.msk.bf16.vlgmr.msra.gmra.mrb[0].mxu1 %vm274_vm0, %v685_v43 }
  0x5b   : > { %2146 = vmatpush3.bf16.msra.mxu1 %v2357_v34  ;;  %2149 = vmatprep.mubr.msk.bf16.mxu1 %vm274_vm0, %v766_v46 }
  0x5c   : > { %2147 = vmatprep.subr.bf16.mxu1 %v2360_v12 }
  0x5e   : > { %2214 = vmatmul.mubr.msk.bf16.vlgmr.msra.gmra.mrb[0].mxu0 %vm274_vm0, %v1481_v21 }
  0x5f   : > { %2218 = vmatpush3.bf16.msra.mxu0 %v2361_v36  ;;  %2221 = vmatprep.mubr.msk.bf16.mxu0 %vm274_vm0, %v1577_v47 }
  0x60   : > { %2148 = vmatpush3.bf16.msra.mxu1 %v2360_v12  ;;  %2219 = vmatprep.subr.bf16.mxu0 %v2363_v11 }
  0x61   : > { %2153 = vmatprep.subr.bf16.mxu1 %v2362_v48 }
  0x63   : > { %2220 = vmatpush3.bf16.msra.mxu0 %v2363_v11 }
  0x66   : > { %2150 = vmatmul.mubr.msk.bf16.vlgmr.msra.gmra.mrb[0].mxu1 %vm274_vm0, %v765_v42 }
  0x67   : > { %2154 = vmatpush3.bf16.msra.mxu1 %v2362_v48  ;;  %2157 = vmatprep.mubr.msk.bf16.mxu1 %vm274_vm0, %v2604_v60 }
  0x68   : > { %2155 = vmatprep.subr.bf16.mxu1 %v2365_v49 }
  0x6a   : > { %2222 = vmatmul.mubr.msk.bf16.vlgmr.msra.gmra.mrb[0].mxu0 %vm274_vm0, %v1576_v45 }
  0x6b   : > { %2156 = vmatpush3.bf16.msra.mxu1 %v2365_v49 }
  0x72   : > { %2158 = vmatmul.mubr.msk.bf16.vlgmr.msra.gmra.mrb[0].mxu1 %vm274_vm0, %v2593_v25  ;;  %v2392_v25 = vmov 0.0  }
  0x73   : > { %v2017_v1 = vsel %vm1687_vm4, 1.0, %v2392_v25  ;;  %v2018_v2 = vsel %vm1688_vm5, 1.0, %v2392_v25  ;;  %v2019_v16 = vsel %vm1689_vm6, 1.0, %v2392_v25 }
 0x13d   : > { %v2223_v52 = vpop.f32.mrb[0].mxu0 }
 0x13e   : > { %v1630_v22 = vpop.f32.mrb[1].mxu0 }
 0x13f   : > { %v2224_v54 = vpop.f32.mrb[2].mxu0 }
 0x140   : > { %v1633_v55 = vpop.f32.mrb[3].mxu0 }
 0x145   : > { %v2159_v61 = vpop.f32.mrb[0].mxu1 }
 0x146   : > { %v2225_v60 = vadd.f32 %v2223_v52, %v2159_v61  ;;  %v914_v62 = vpop.f32.mrb[1].mxu1 }
 0x147   : > { %v2226_v63 = vadd.f32 %v1630_v22, %v914_v62  ;;  %v2160_v0 = vpop.f32.mrb[2].mxu1 }
 0x148   : > { %v917_v6 = vpop.f32.mrb[3].mxu1  ;;  %v1698_v4 = vmul.f32 %v2225_v60, %v2019_v16 }
 0x149   : > { %v2227_v15 = vadd.f32 %v1633_v55, %v917_v6  ;;  %v1696_v3 = vmul.f32 %v2226_v63, %v2017_v1 }
 0x14b   : > { %v1697_v7 = vmul.f32 %v2227_v15, %v2018_v2 }
 0x14d   : > { %v1699_v5 = vadd.f32 %v1697_v7, %v1696_v3 }
 0x14f   : > { %v1700_v8 = vadd.f32 %v1699_v5, %v1698_v4 }
 0x151   : > { %v1701_v9 = vrot.slane %v1700_v8, 4 }
 0x153   : > { %v1702_v10 = vadd.f32 %v1701_v9, %v1700_v8 }
 0x155   : > { %v1703_v13 = vrot.slane %v1702_v10, 2 }
 0x157   : > { %v1704_v14 = vadd.f32 %v1703_v13, %v1702_v10 }
 0x159   : > { %v1705_v17 = vrot.slane %v1704_v14, 1 }
 0x15b   : > { %v1706_v18 = vadd.f32 %v1705_v17, %v1704_v14 }
 0x15d   : > { %v1707_v19 = vmul.f32 0.06666667, %v1706_v18 }
 0x15f   : > { %v1708_v20 = vsub.f32 %v2226_v63, %v1707_v19  ;;  %v1709_v21 = vsub.f32 %v2227_v15, %v1707_v19  ;;  %v1710_v23 = vsub.f32 %v2225_v60, %v1707_v19 }
 0x161   : > { %v1711_v24 = vmul.f32 %v2017_v1, %v1708_v20  ;;  %v1712_v26 = vmul.f32 %v2018_v2, %v1709_v21  ;;  %v1713_v27 = vmul.f32 %v2019_v16, %v1710_v23 }
 0x163   : > { %v1714_v28 = vmul.f32 %v1711_v24, %v1711_v24  ;;  %v1715_v29 = vmul.f32 %v1712_v26, %v1712_v26  ;;  %v1716_v30 = vmul.f32 %v1713_v27, %v1713_v27 }
 0x165   : > { %v1717_v31 = vadd.f32 %v1715_v29, %v1714_v28 }
 0x167   : > { %v1718_v32 = vadd.f32 %v1717_v31, %v1716_v30 }
 0x169   : > { %v1719_v33 = vrot.slane %v1718_v32, 4 }
 0x16b   : > { %v1720_v34 = vadd.f32 %v1719_v33, %v1718_v32 }
 0x16d   : > { %v1721_v35 = vrot.slane %v1720_v34, 2 }
 0x16f   : > { %v1722_v36 = vadd.f32 %v1721_v35, %v1720_v34 }
 0x171   : > { %v1723_v37 = vrot.slane %v1722_v36, 1 }
 0x173   : > { %v1724_v38 = vadd.f32 %v1723_v37, %v1722_v36 }
 0x175   : > { %v1725_v39 = vmul.f32 0.06666667, %v1724_v38 }
 0x177   : > { %v1726_v40 = vadd.f32 1e-05, %v1725_v39 }
 0x179   : > { %2366 = vrsqrt.f32 %v1726_v40 }
 0x183   : > { %v2367_v41 = vpop.eup %2366 }
 0x184   : > { %v1728_v42 = vmul.f32 %v2367_v41, %v1708_v20  ;;  %v1729_v43 = vmul.f32 %v2367_v41, %v1709_v21  ;;  %v1730_v44 = vmul.f32 %v2367_v41, %v1710_v23 }
 0x186   : > { %vm1731_vm7 = vcmp.ge.f32.partialorder %v1728_v42, 0.0  ;;  %vm1732_vm8 = vcmp.ge.f32.partialorder %v1729_v43, 0.0  ;;  %vm1733_vm9 = vcmp.ge.f32.partialorder %v1730_v44, 0.0  ;;  %v1734_v45 = vmul.f32 0.2, %v1728_v42 }
 0x187   : > { %v1735_v12 = vmul.f32 0.2, %v1729_v43  ;;  %v1736_v46 = vmul.f32 0.2, %v1730_v44 }
 0x188   : > { %v1737_v11 = vsel %vm1731_vm7, %v1728_v42, %v1734_v45 }
 0x189   : > { %v1738_v47 = vsel %vm1732_vm8, %v1729_v43, %v1735_v12  ;;  %v1739_v48 = vsel %vm1733_vm9, %v1730_v44, %v1736_v46 }
 0x18a   : > { %v2027_v49 = vpack.c.bf16 %v1739_v48, %v1739_v48  ;;  %v2031_v50 = vpack.c.bf16 %v1738_v47, %v1737_v11 }
 0x18c   : > { %2032 = vst [vmem:[%s221_s15] sm:$0xff] %v2031_v50   ;;  %1755 = vst [vmem:[%s221_s15 + $0x8] sm:$0xf] %v2027_v49 }
 0x18d PF: > { %s13_s14 = sadd.s32 1, %s2390_s14   ;;  %s2699_s12 = smov %s2386_s13 }
 0x18e   : > { %p10_p5 = scmp.ge.s32.totalorder %s13_s14, 4   ;;  %s2700_s13 = smov %s2702_s2 }
 0x190   :  { %12 = sbr.rel (!%p10_p5) target bundleno = 2 (0x2), region = 83 }

// kernel: _lambda_.9
= control target key start
LH: loop header
LB: loop body
LE: loop exit
PB: predicated region body
PF: predicated region fallthrough
CT: control target
= control target key end

     0   :  { %s2856_s12 = smov 0   ;;  %s2858_s13 = smov 0   ;;  %s3270_s0 = inlined_call_operand.vmem [shape: bf16[2,52,64], index: 0, kind: input, shape index: {}]   ;;  %s3271_s1 = inlined_call_operand.vmem [shape: bf16[16,64,128], index: 1, kind: input, shape index: {}]   ;;  %s3272_s2 = inlined_call_operand.vmem [shape: f32[1,128], index: 2, kind: input, shape index: {}]   ;;  %s3273_s3 = inlined_call_operand.vmem [shape: f32[2,28,128], index: 3, kind: output, shape index: {}]  }
   0x1   :  { %s2860_s14 = smov 0  }
   0x2 LB: > { %s25_s15 = sadd.s32 1, %s2830_s13  ;;  %p2099_p0 = scmp.ge.s32.totalorder %s2834_s14, 1  ;;  %s2834_s14 = sphi %s2860_s14, %s13_s14   ;;  %s2830_s13 = sphi %s2858_s13, %s3275_s13   ;;  %s2826_s12 = sphi %s2856_s12, %s3274_s12  }
   0x3   : > { %p27_p1 = scmp.ge.s32.totalorder %s25_s15, 2  ;;  %p168_p2 = scmp.lt.s32.totalorder %s2834_s14, 3 }
   0x5   : > { %s3277_s15 = smov (%p27_p1, %s25_s15), 0  ;;  %p169_p3 = pnand %p2099_p0, %p168_p2 }
   0x6   : > { %v2722_v0 = vld [vmem:[%s3271_s1 + $0x20] sm:$0xff] (!%p169_p3)   ;;  %p202_p4 = scmp.lt.s32.totalorder (!%p169_p3), %s2826_s12, 1  ;;  %v2724_v2 = vld [vmem:[%s3271_s1 + $0x28] sm:$0xff] (!%p169_p3)   ;;  %v2726_v4 = vld [vmem:[%s3271_s1 + $0x30] sm:$0xff] (!%p169_p3)   ;;  %vm255_vm0 = vsmask.f32 (!%p169_p3), 7424 }
   0x7   : > { %172 = sbr.rel (%p169_p3) target bundleno = 361 (0x169), region = 32  ;;  %v2723_v1 = vld [vmem:[%s3271_s1 + $0x100] sm:$0xff] (!%p169_p3)   ;;  %2445 = vmatprep.subr.bf16.mxu1 (!%p169_p3), %v2722_v0  ;;  %v2725_v3 = vld [vmem:[%s3271_s1 + $0x108] sm:$0xff] (!%p169_p3)   ;;  %v2727_v5 = vld [vmem:[%s3271_s1 + $0x110] sm:$0xff] (!%p169_p3)   ;;  %vm295_vm1 = vcmask (!%p169_p3), 523264   ;;  %vm1113_vm2 = vcmask (!%p169_p3), 1044480  }
   0x8   : > { %2541 = vmatprep.subr.bf16.mxu0 (!%p169_p3), %v2723_v1  ;;  %2446 = vmatpush3.bf16.msra.mxu1 (!%p169_p3), %v2722_v0  ;;  %v2728_v6 = vld [vmem:[%s3271_s1 + $0x38] sm:$0xff] (!%p169_p3)   ;;  %v2732_v14 = vld [vmem:[%s3271_s1] sm:$0xff] (!%p169_p3)   ;;  %v2737_v32 = vld [vmem:[%s3271_s1 + $0x8] sm:$0xff] (!%p169_p3)   ;;  %vm673_vm3 = vsmask.f32 (!%p169_p3), 4352  ;;  %vm445_vm4 = vcmask (!%p169_p3), 1046528  }
   0x9   : > { %2542 = vmatpush3.bf16.msra.mxu0 (!%p169_p3), %v2723_v1  ;;  %2447 = vmatprep.subr.bf16.mxu1 (!%p169_p3), %v2724_v2  ;;  %v2729_v7 = vld [vmem:[%s3271_s1 + $0x118] sm:$0xff] (!%p169_p3)   ;;  %v2735_v26 = vld [vmem:[%s3271_s1 + $0x120] sm:$0xff] (!%p169_p3)   ;;  %v2738_v35 = vld [vmem:[%s3271_s1 + $0x128] sm:$0xff] (!%p169_p3)   ;;  %vm545_vm5 = vsmask.f32 (!%p169_p3), 6400 }
   0xa   : > { %2543 = vmatprep.subr.bf16.mxu0 (!%p169_p3), %v2725_v3  ;;  %v2739_v42 = vld [vmem:[%s3271_s1 + $0x10] sm:$0xff] (!%p169_p3)   ;;  %v2741_v47 = vld [vmem:[%s3271_s1 + $0x18] sm:$0xff] (!%p169_p3)   ;;  %v2743_v57 = vld [vmem:[%s3271_s1 + $0x40] sm:$0xff] (!%p169_p3)   ;;  %vm1555_vm6 = vsmask.f32 (!%p169_p3), 5376 }
   0xb   : > { %v2740_v43 = vld [vmem:[%s3271_s1 + $0x130] sm:$0xff] (!%p169_p3)   ;;  %v2742_v48 = vld [vmem:[%s3271_s1 + $0x138] sm:$0xff] (!%p169_p3)   ;;  %v2744_v58 = vld [vmem:[%s3271_s1 + $0x140] sm:$0xff] (!%p169_p3)  }
   0xc   : > { %2448 = vmatpush3.bf16.msra.mxu1 (!%p169_p3), %v2724_v2 }
   0xd   : > { %2544 = vmatpush3.bf16.msra.mxu0 (!%p169_p3), %v2725_v3  ;;  %2449 = vmatprep.subr.bf16.mxu1 (!%p169_p3), %v2726_v4 }
   0xe   : > { %s3279_s12 = smov (!%p202_p4, %s2826_s12), 1  ;;  %2545 = vmatprep.subr.bf16.mxu0 %v2727_v5 }
   0xf   : > { %s2697_s26 = smul.u32 28, %s3279_s12  ;;  %s2348_s10 = sshll.u32 %s3279_s12, 5 }
  0x10   : > { %2450 = vmatpush3.bf16.msra.mxu1 %v2726_v4  ;;  %s221_s19 = scalar_lea.vmem %s3273_s3, %s2348_s10 }
  0x11   : > { %s2901_s6 = scalar_lea.vmem %s3270_s0, %s2697_s26  ;;  %2546 = vmatpush3.bf16.msra.mxu0 %v2727_v5  ;;  %2451 = vmatprep.subr.bf16.mxu1 %v2728_v6  ;;  %v2747_v5 = vld [vmem:[%s3271_s1 + $0x48] sm:$0xff]  }
  0x12   : > { %v223_v8 = vld [vmem:[%s2901_s6] sm:$0xf]  ;;  %v2908_v9 = vld [vmem:[%s2901_s6 + $0x4] sm:$0xf]  ;;  %v2911_v10 = vld [vmem:[%s2901_s6 + $0x8] sm:$0xf]  ;;  %2547 = vmatprep.subr.bf16.mxu0 %v2729_v7 }
  0x13   : > { %v235_v11 = vld [vmem:[%s2901_s6 + $0xc] sm:$0x7]  ;;  %v2111_v12 = vcombine.low %v223_v8, %v2908_v9  ;;  %v1086_v15 = vld [vmem:[%s2901_s6 + $0x4] sm:$0x8]  ;;  %v2923_v18 = vld [vmem:[%s2901_s6 + $0x8] sm:$0xf] }
  0x14   : > { %v2916_v13 = vcombine.low %v2911_v10, %v235_v11  ;;  %v2926_v19 = vld [vmem:[%s2901_s6 + $0xc] sm:$0xf]  ;;  %v2931_v22 = vld [vmem:[%s2901_s6 + $0x10] sm:$0xf]  ;;  %v2227_v23 = vcombine.low %v1086_v15, %v2923_v18  ;;  %2452 = vmatpush3.bf16.msra.mxu1 %v2728_v6  ;;  %v2967_v49 = vld [vmem:[%s2901_s6 + $0x14] sm:$0x3] }
  0x15   : > { %v257_v16 = vshrl.u32 %v2111_v12, 16  ;;  %v259_v17 = vshll.u32 %v2111_v12, 16  ;;  %v2228_v25 = vcombine.low %v2926_v19, %v2931_v22  ;;  %v2736_v29 = vld [vmem:[%s2901_s6 + $0x14] ss:$0 sps:$4 sm:$0x11]   ;;  %2548 = vmatpush3.bf16.msra.mxu0 %v2729_v7  ;;  %2457 = vmatprep.subr.bf16.mxu1 %v2732_v14  ;;  %v2244_v53 = vcombine.low %v2967_v49, %v2967_v49  ;;  %v2748_v6 = vld [vmem:[%s3271_s1 + $0x148] sm:$0xff]  }
  0x16   : > { %v264_v20 = vshll.u32 %v2916_v13, 16  ;;  %v268_v21 = vshrl.u32 %v2916_v13, 16  ;;  %v1114_v28 = vrot.slane %v2227_v23, 3  ;;  %v1117_v34 = vrot.slane %v2736_v29, 3  ;;  %2553 = vmatprep.subr.bf16.mxu0 %v2735_v26  ;;  %v226_v60 = vld [vmem:[%s2901_s6 + $0xc] sm:$0x3] }
  0x17   : > { %v261_v24 = vrot.slane %v259_v17, 1  ;;  %v1115_v31 = vrot.slane %v2228_v25, 3  ;;  %v1216_v39 = vshrl.u32 %v2227_v23, 16  ;;  %v1219_v40 = vshll.u32 %v2227_v23, 16  ;;  %v432_v0 = vld [vmem:[%s2901_s6] sm:$0xe] }
  0x18   : > { %v266_v27 = vrot.slane %v264_v20, 1  ;;  %v1224_v45 = vshrl.u32 %v2228_v25, 16  ;;  %v1227_v46 = vshll.u32 %v2228_v25, 16  ;;  %v1233_v55 = vshrl.u32 %v2244_v53, 16  ;;  %v2749_v11 = vld [vmem:[%s3271_s1 + $0x50] sm:$0xff]   ;;  %v2751_v20 = vld [vmem:[%s3271_s1 + $0x58] sm:$0xff]  }
  0x19   : > { %v262_v30 = vor.u32 %v261_v24, %v257_v16  ;;  %v1116_v37 = vsel %vm1113_vm2, %v1114_v28, %v1115_v31  ;;  %v1118_v38 = vsel %vm1113_vm2, %v1115_v31, %v1117_v34  ;;  %v1218_v41 = vrot.slane %v1216_v39, 3  ;;  %v532_v16 = vld [vmem:[%s2901_s6 + $0xc] sm:$0xf]  ;;  %v2752_v24 = vld [vmem:[%s3271_s1 + $0x158] sm:$0xff]  }
  0x1a   : > { %v270_v33 = vor.u32 %v268_v21, %v266_v27  ;;  %2549 = vmatprep.mubr.msk.bf16.mxu0 %vm295_vm1, %v1116_v37  ;;  %v1221_v44 = vrot.slane %v1219_v40, 4  ;;  %v1226_v51 = vrot.slane %v1224_v45, 3  ;;  %v1229_v52 = vrot.slane %v1227_v46, 4  ;;  %v1418_v21 = vld [vmem:[%s2901_s6 + $0x14] sm:$0x7] }
  0x1b   : > { %v267_v36 = vsel %vm255_vm0, %v262_v30, %v266_v27  ;;  %2550 = vmatmul.mubr.msk.bf16.vlgmr.msra.gmra.mrb[0].mxu0 %vm295_vm1, %v1118_v38  ;;  %v1236_v56 = vshll.u32 %v2244_v53, 16  ;;  %v1235_v61 = vrot.slane %v1233_v55, 3  ;;  %v2119_v1 = vcombine.low %v2911_v10, %v226_v60  ;;  %v1528_v46 = vld [vmem:[%s2901_s6 + $0x8] sm:$0xc] }
  0x1c   : > { %2453 = vmatprep.mubr.msk.bf16.mxu1 %vm295_vm1, %v267_v36  ;;  %2554 = vmatpush3.bf16.msra.mxu0 %v2735_v26  ;;  %v1222_v50 = vor.u32 %v1221_v44, %v1218_v41  ;;  %v1230_v54 = vor.u32 %v1229_v52, %v1226_v51  ;;  %v2134_v2 = vcombine.low %v432_v0, %v2908_v9  ;;  %v447_v3 = vrot.slane %v2916_v13, 1  ;;  %v2759_v36 = vld [vmem:[%s3271_s1 + $0x168] sm:$0xff]   ;;  %v3037_v41 = vld [vmem:[%s2901_s6 + $0x4] sm:$0xf]  ;;  %v2760_v51 = vld [vmem:[%s3271_s1 + $0x70] sm:$0xff]  }
  0x1d   : > { %2454 = vmatmul.mubr.msk.bf16.vlgmr.msra.gmra.mrb[0].mxu1 %vm295_vm1, %v270_v33  ;;  %2555 = vmatprep.subr.bf16.mxu0 %v2738_v35  ;;  %v1238_v62 = vrot.slane %v1236_v56, 4  ;;  %v2259_v8 = vcombine.low %v2923_v18, %v2926_v19  ;;  %v2149_v17 = vcombine.low %v2911_v10, %v532_v16  ;;  %v3016_v10 = vcombine.low %v2931_v22, %v1418_v21  ;;  %v2756_v33 = vld [vmem:[%s3271_s1 + $0x160] sm:$0xff]   ;;  %v2761_v13 = vld [vmem:[%s3271_s1 + $0x170] sm:$0xff]   ;;  %v2763_v0 = vld [vmem:[%s3271_s1 + $0x178] sm:$0xff]  }
  0x1e   : > { %2458 = vmatpush3.bf16.msra.mxu1 %v2732_v14  ;;  %2465 = vmatprep.mubr.msk.bf16.mxu1 %vm295_vm1, %v2111_v12  ;;  %v1231_v59 = vsel %vm673_vm3, %v1222_v50, %v1230_v54  ;;  %v446_v7 = vrot.slane %v2134_v2, 1  ;;  %v2750_v14 = vld [vmem:[%s3271_s1 + $0x150] sm:$0xff]   ;;  %v547_v15 = vshrl.u32 %v2134_v2, 16  ;;  %v550_v18 = vshll.u32 %v2134_v2, 16  ;;  %v2768_v21 = vld [vmem:[%s3271_s1 + $0x88] sm:$0xff]  }
  0x1f   : > { %2459 = vmatprep.subr.bf16.mxu1 %v2737_v32  ;;  %2561 = vmatprep.mubr.msk.bf16.mxu0 %vm295_vm1, %v1231_v59  ;;  %v1239_v63 = vor.u32 %v1238_v62, %v1235_v61  ;;  %v1433_v12 = vshll.u32 %v2259_v8, 16  ;;  %v1431_v19 = vshrl.u32 %v2259_v8, 16  ;;  %v555_v26 = vshrl.u32 %v2149_v17, 16  ;;  %v3059_v50 = vld [vmem:[%s2901_s6 + $0x10] sm:$0xf] }
  0x20   : > { %2556 = vmatpush3.bf16.msra.mxu0 %v2738_v35  ;;  %v448_v9 = vsel %vm445_vm4, %v446_v7, %v447_v3  ;;  %v549_v25 = vrot.slane %v547_v15, 1  ;;  %v558_v27 = vshll.u32 %v2149_v17, 16  ;;  %v552_v28 = vrot.slane %v550_v18, 2  ;;  %v2758_v35 = vld [vmem:[%s3271_s1 + $0x68] sm:$0xff]  }
  0x21   : > { %2557 = vmatprep.subr.bf16.mxu0 %v2740_v43  ;;  %v1240_v4 = vsel %vm673_vm3, %v1230_v54, %v1239_v63  ;;  %v1435_v23 = vrot.slane %v1433_v12, 1  ;;  %v557_v29 = vrot.slane %v555_v26, 1  ;;  %v1438_v31 = vshll.u32 %v3016_v10, 16  ;;  %v3068_v54 = vld [vmem:[%s2901_s6 + $0x14] sm:$0xf]  ;;  %v2762_v63 = vld [vmem:[%s3271_s1 + $0x78] sm:$0xff]  }
  0x22   : > { %2460 = vmatpush3.bf16.msra.mxu1 %v2737_v32  ;;  %v560_v30 = vrot.slane %v558_v27, 2  ;;  %v2754_v32 = vld [vmem:[%s3271_s1 + $0x60] sm:$0xff]   ;;  %v2260_v34 = vcombine.low %v2931_v22, %v2967_v49  ;;  %v553_v37 = vor.u32 %v552_v28, %v549_v25  ;;  %v3056_v49 = vld [vmem:[%s2901_s6 + $0xc] sm:$0xf]  ;;  %v3094_v12 = vld [vmem:[%s2901_s6 + $0x10] sm:$0x3] }
  0x23   : > { %2461 = vmatprep.subr.bf16.mxu1 %v2739_v42  ;;  %v1436_v39 = vor.u32 %v1435_v23, %v1431_v19  ;;  %v1440_v40 = vrot.slane %v1438_v31, 1  ;;  %v646_v22 = vld [vmem:[%s2901_s6] sm:$0x8]  ;;  %v2290_v55 = vcombine.low %v1528_v46, %v3056_v49  ;;  %v2769_v23 = vld [vmem:[%s3271_s1 + $0x188] sm:$0xff]   ;;  %v2770_v28 = vld [vmem:[%s3271_s1 + $0x90] sm:$0xff]  }
  0x24   : > { %2558 = vmatpush3.bf16.msra.mxu0 %v2740_v43  ;;  %v3033_v38 = vor.u32 %v560_v30, %v557_v29  ;;  %v3043_v43 = vld [vmem:[%s2901_s6 + $0xc] sm:$0xf]  ;;  %v2164_v44 = vcombine.low %v646_v22, %v3037_v41  ;;  %v2771_v29 = vld [vmem:[%s3271_s1 + $0x190] sm:$0xff]   ;;  %v2772_v30 = vld [vmem:[%s3271_s1 + $0x98] sm:$0xff]  }
  0x25   : > { %2559 = vmatprep.subr.bf16.mxu0 %v2742_v48  ;;  %v1557_v59 = vshrl.u32 %v2290_v55, 16  ;;  %v1560_v60 = vshll.u32 %v2290_v55, 16  ;;  %v2785_v55 = vld [vmem:[%s3271_s1 + $0x1b0] sm:$0xff]  }
  0x26   : > { %2462 = vmatpush3.bf16.msra.mxu1 %v2739_v42  ;;  %v3040_v42 = vld [vmem:[%s2901_s6 + $0x8] sm:$0xf]  ;;  %v675_v52 = vshrl.u32 %v2164_v44, 16  ;;  %v678_v53 = vshll.u32 %v2164_v44, 16 }
  0x27   : > { %2463 = vmatprep.subr.bf16.mxu1 %v2741_v47  ;;  %v2165_v45 = vcombine.low %v3040_v42, %v3043_v43  ;;  %v1562_v7 = vrot.slane %v1560_v60, 3  ;;  %v2786_v60 = vld [vmem:[%s3271_s1 + $0xb8] sm:$0xff]  }
  0x28   : > { %2560 = vmatpush3.bf16.msra.mxu0 %v2742_v48  ;;  %v1441_v48 = vsel %vm255_vm0, %v1436_v39, %v1440_v40  ;;  %v677_v2 = vrot.slane %v675_v52, 3  ;;  %v2776_v39 = vld [vmem:[%s3271_s1 + $0xa0] sm:$0xff]   ;;  %v877_v52 = vld [vmem:[%s2901_s6 + $0x10] sm:$0x7] }
  0x29   : > { %2565 = vmatprep.subr.bf16.mxu0 %v2744_v58  ;;  %v683_v56 = vshrl.u32 %v2165_v45, 16 }
  0x2a   : > { %2464 = vmatpush3.bf16.msra.mxu1 %v2741_v47  ;;  %v562_v47 = vsel %vm545_vm5, %v553_v37, %v3033_v38 }
  0x2b   : > { %2469 = vmatprep.subr.bf16.mxu1 %v2743_v57  ;;  %2562 = vmatmul.mubr.msk.bf16.vlgmr.msra.gmra.mrb[0].mxu0 %vm295_vm1, %v1240_v4  ;;  %v685_v4 = vrot.slane %v683_v56, 3  ;;  %v3162_v56 = vcombine.low %v3043_v43, %v877_v52 }
  0x2c   : > { %2566 = vmatpush3.bf16.msra.mxu0 %v2744_v58  ;;  %2573 = vmatprep.mubr.msk.bf16.mxu0 %vm295_vm1, %v2259_v8  ;;  %v3073_v58 = vcombine.low %v3059_v50, %v3068_v54  ;;  %v2765_v8 = vld [vmem:[%s3271_s1 + $0x80] sm:$0xff]  }
  0x2d   : > { %2466 = vmatmul.mubr.msk.bf16.vlgmr.msra.gmra.mrb[0].mxu1 %vm295_vm1, %v2119_v1  ;;  %2567 = vmatprep.subr.bf16.mxu0 %v2748_v6  ;;  %v1442_v1 = vshrl.u32 %v3016_v10, 16 }
  0x2e   : > { %2470 = vmatpush3.bf16.msra.mxu1 %v2743_v57  ;;  %2477 = vmatprep.mubr.msk.bf16.mxu1 %vm295_vm1, %v448_v9  ;;  %v686_v57 = vshll.u32 %v2165_v45, 16  ;;  %v1565_v61 = vshrl.u32 %v3073_v58, 16  ;;  %v1568_v62 = vshll.u32 %v3073_v58, 16  ;;  %v1675_v44 = vrot.slane %v3073_v58, 3 }
  0x2f   : > { %2471 = vmatprep.subr.bf16.mxu1 %v2747_v5  ;;  %v1444_v15 = vor.u32 %v1442_v1, %v1440_v40  ;;  %v2779_v40 = vld [vmem:[%s3271_s1 + $0x1a0] sm:$0xff]   ;;  %v2182_v58 = vcombine.low %v3043_v43, %v3094_v12  ;;  %v2794_v43 = vld [vmem:[%s3271_s1 + $0x1c8] sm:$0xff]  }
  0x30   : > { %2568 = vmatpush3.bf16.msra.mxu0 %v2748_v6  ;;  %v1559_v6 = vrot.slane %v1557_v59, 2  ;;  %v1567_v9 = vrot.slane %v1565_v61, 2 }
  0x31   : > { %2569 = vmatprep.subr.bf16.mxu0 %v2750_v14 }
  0x32   : > { %2472 = vmatpush3.bf16.msra.mxu1 %v2747_v5  ;;  %v688_v5 = vrot.slane %v686_v57, 4  ;;  %v1563_v18 = vor.u32 %v1562_v7, %v1559_v6  ;;  %v1784_v6 = vrot.slane %v1568_v62, 4 }
  0x33   : > { %2473 = vmatprep.subr.bf16.mxu1 %v2749_v11 }
  0x34   : > { %2570 = vmatpush3.bf16.msra.mxu0 %v2750_v14  ;;  %v2767_v14 = vld [vmem:[%s3271_s1 + $0x180] sm:$0xff]   ;;  %v689_v17 = vor.u32 %v688_v5, %v685_v4 }
  0x35   : > { %2571 = vmatprep.subr.bf16.mxu0 %v2752_v24 }
  0x36   : > { %2474 = vmatpush3.bf16.msra.mxu1 %v2749_v11  ;;  %v1570_v11 = vrot.slane %v1568_v62, 3 }
  0x37   : > { %2475 = vmatprep.subr.bf16.mxu1 %v2751_v20 }
  0x38   : > { %2572 = vmatpush3.bf16.msra.mxu0 %v2752_v24  ;;  %v1571_v19 = vor.u32 %v1570_v11, %v1567_v9  ;;  %v3108_v24 = vld [vmem:[%s2901_s6 + $0x18] ss:$0 sps:$4 sm:$0x11]  }
  0x39   : > { %2577 = vmatprep.subr.bf16.mxu0 %v2756_v33  ;;  %v1677_v7 = vrot.slane %v3108_v24, 3  ;;  %v3183_v9 = vld [vmem:[%s2901_s6 + $0x18] sm:$0x3] }
  0x3a   : > { %2476 = vmatpush3.bf16.msra.mxu1 %v2751_v20  ;;  %v2166_v20 = vcombine.low %v3094_v12, %v3094_v12  ;;  %v1572_v26 = vsel %vm1555_vm6, %v1563_v18, %v1571_v19  ;;  %v2793_v18 = vld [vmem:[%s3271_s1 + $0xc8] sm:$0xff]  }
  0x3b   : > { %2481 = vmatprep.subr.bf16.mxu1 %v2754_v32  ;;  %2574 = vmatmul.mubr.msk.bf16.vlgmr.msra.gmra.mrb[0].mxu0 %vm295_vm1, %v2260_v34  ;;  %v1661_v34 = vld [vmem:[%s2901_s6 + $0x8] sm:$0x8] }
  0x3c   : > { %2578 = vmatpush3.bf16.msra.mxu0 %v2756_v33  ;;  %2585 = vmatprep.mubr.msk.bf16.mxu0 %vm295_vm1, %v1441_v48  ;;  %v692_v27 = vshrl.u32 %v2166_v20, 16  ;;  %v695_v10 = vshll.u32 %v2166_v20, 16  ;;  %v1574_v33 = vshll.u32 %v3108_v24, 16  ;;  %v2783_v48 = vld [vmem:[%s3271_s1 + $0x1a8] sm:$0xff]   ;;  %v2796_v24 = vld [vmem:[%s3271_s1 + $0x1d0] sm:$0xff]  }
  0x3d   : > { %2478 = vmatmul.mubr.msk.bf16.vlgmr.msra.gmra.mrb[0].mxu1 %vm295_vm1, %v447_v3  ;;  %2579 = vmatprep.subr.bf16.mxu0 %v2759_v36  ;;  %v680_v3 = vrot.slane %v678_v53, 4  ;;  %v2784_v53 = vld [vmem:[%s3271_s1 + $0xb0] sm:$0xff]  }
  0x3e   : > { %2482 = vmatpush3.bf16.msra.mxu1 %v2754_v32  ;;  %2489 = vmatprep.mubr.msk.bf16.mxu1 %vm295_vm1, %v562_v47  ;;  %v694_v31 = vrot.slane %v692_v27, 3  ;;  %v697_v32 = vrot.slane %v695_v10, 4  ;;  %v2782_v47 = vld [vmem:[%s3271_s1 + $0xa8] sm:$0xff]   ;;  %v987_v27 = vld [vmem:[%s2901_s6 + $0x4] sm:$0xe]  ;;  %v2797_v10 = vld [vmem:[%s3271_s1 + $0xd8] sm:$0xff]  }
  0x3f   : > { %2483 = vmatprep.subr.bf16.mxu1 %v2758_v35  ;;  %v681_v16 = vor.u32 %v680_v3, %v677_v2  ;;  %v1783_v2 = vrot.slane %v1565_v61, 3  ;;  %v897_v3 = vshll.u32 %v3162_v56, 16  ;;  %v2791_v61 = vld [vmem:[%s3271_s1 + $0x1c0] sm:$0xff]  }
  0x40   : > { %2580 = vmatpush3.bf16.msra.mxu0 %v2759_v36  ;;  %v2307_v36 = vcombine.low %v1661_v34, %v3056_v49  ;;  %v698_v37 = vor.u32 %v697_v32, %v694_v31  ;;  %v2800_v32 = vld [vmem:[%s3271_s1 + $0xe0] sm:$0xff]  }
  0x41   : > { %2581 = vmatprep.subr.bf16.mxu0 %v2761_v13  ;;  %v690_v25 = vsel %vm673_vm3, %v681_v16, %v689_v17  ;;  %v899_v11 = vrot.slane %v897_v3, 1  ;;  %v1678_v16 = vsel %vm1113_vm2, %v1675_v44, %v1677_v7 }
  0x42   : > { %2484 = vmatpush3.bf16.msra.mxu1 %v2758_v35  ;;  %v2773_v35 = vld [vmem:[%s3271_s1 + $0x198] sm:$0xff]   ;;  %v1674_v22 = vrot.slane %v2307_v36, 3  ;;  %v699_v45 = vsel %vm673_vm3, %v689_v17, %v698_v37  ;;  %v1776_v57 = vshrl.u32 %v2307_v36, 16  ;;  %v1779_v59 = vshll.u32 %v2307_v36, 16  ;;  %v2803_v37 = vld [vmem:[%s3271_s1 + $0xe8] sm:$0xff]  }
  0x43   : > { %2485 = vmatprep.subr.bf16.mxu1 %v2760_v51  ;;  %v2322_v17 = vcombine.low %v3183_v9, %v3183_v9  ;;  %v1001_v36 = vrot.slane %v3162_v56, 1 }
  0x44   : > { %2582 = vmatpush3.bf16.msra.mxu0 %v2761_v13  ;;  %v1676_v13 = vsel %vm1113_vm2, %v1674_v22, %v1675_v44  ;;  %v1778_v4 = vrot.slane %v1776_v57, 3  ;;  %v1781_v5 = vrot.slane %v1779_v59, 4  ;;  %v2805_v22 = vld [vmem:[%s3271_s1 + $0xf0] sm:$0xff]  }
  0x45   : > { %2583 = vmatprep.subr.bf16.mxu0 %v2763_v0  ;;  %v1788_v20 = vshrl.u32 %v2322_v17, 16  ;;  %v2806_v44 = vld [vmem:[%s3271_s1 + $0x1f0] sm:$0xff]  }
  0x46   : > { %2486 = vmatpush3.bf16.msra.mxu1 %v2760_v51  ;;  %v2181_v51 = vcombine.low %v3037_v41, %v3040_v42 }
  0x47   : > { %2487 = vmatprep.subr.bf16.mxu1 %v2762_v63 }
  0x48   : > { %2584 = vmatpush3.bf16.msra.mxu0 %v2763_v0  ;;  %v892_v41 = vshll.u32 %v2181_v51, 16  ;;  %v890_v0 = vshrl.u32 %v2181_v51, 16 }
  0x49   : > { %2589 = vmatprep.subr.bf16.mxu0 %v2767_v14 }
  0x4a   : > { %2488 = vmatpush3.bf16.msra.mxu1 %v2762_v63  ;;  %v2787_v63 = vld [vmem:[%s3271_s1 + $0x1b8] sm:$0xff]   ;;  %v894_v1 = vrot.slane %v892_v41, 1 }
  0x4b   : > { %2493 = vmatprep.subr.bf16.mxu1 %v2765_v8  ;;  %2586 = vmatmul.mubr.msk.bf16.vlgmr.msra.gmra.mrb[0].mxu0 %vm295_vm1, %v1444_v15  ;;  %v1785_v15 = vor.u32 %v1784_v6, %v1783_v2 }
  0x4c   : > { %2590 = vmatpush3.bf16.msra.mxu0 %v2767_v14  ;;  %2597 = vmatprep.mubr.msk.bf16.mxu0 %vm295_vm1, %v1572_v26  ;;  %v895_v62 = vor.u32 %v894_v1, %v890_v0  ;;  %v1782_v14 = vor.u32 %v1781_v5, %v1778_v4 }
  0x4d   : > { %2490 = vmatmul.mubr.msk.bf16.vlgmr.msra.gmra.mrb[0].mxu1 %vm295_vm1, %v3033_v38  ;;  %2591 = vmatprep.subr.bf16.mxu0 %v2769_v23  ;;  %v1576_v38 = vrot.slane %v1574_v33, 3  ;;  %v2801_v33 = vld [vmem:[%s3271_s1 + $0x1e0] sm:$0xff]  }
  0x4e   : > { %2494 = vmatpush3.bf16.msra.mxu1 %v2765_v8  ;;  %2501 = vmatprep.mubr.msk.bf16.mxu1 %vm295_vm1, %v690_v25  ;;  %v2789_v8 = vld [vmem:[%s3271_s1 + $0xc0] sm:$0xff]   ;;  %v900_v12 = vsel %vm255_vm0, %v895_v62, %v899_v11  ;;  %v1790_v25 = vrot.slane %v1788_v20, 3 }
  0x4f   : > { %2495 = vmatprep.subr.bf16.mxu1 %v2768_v21  ;;  %v1577_v46 = vsel %vm1555_vm6, %v1571_v19, %v1576_v38  ;;  %v1786_v19 = vsel %vm673_vm3, %v1782_v14, %v1785_v15  ;;  %v2804_v38 = vld [vmem:[%s3271_s1 + $0x1e8] sm:$0xff]  }
  0x50   : > { %2592 = vmatpush3.bf16.msra.mxu0 %v2769_v23  ;;  %v2795_v23 = vld [vmem:[%s3271_s1 + $0xd0] sm:$0xff]  }
  0x51   : > { %2593 = vmatprep.subr.bf16.mxu0 %v2771_v29 }
  0x52   : > { %2496 = vmatpush3.bf16.msra.mxu1 %v2768_v21  ;;  %v1791_v21 = vshll.u32 %v2322_v17, 16 }
  0x53   : > { %2497 = vmatprep.subr.bf16.mxu1 %v2770_v28 }
  0x54   : > { %2594 = vmatpush3.bf16.msra.mxu0 %v2771_v29  ;;  %v1793_v26 = vrot.slane %v1791_v21, 4  ;;  %v901_v29 = vshrl.u32 %v3162_v56, 16 }
  0x55   : > { %2595 = vmatprep.subr.bf16.mxu0 %v2773_v35 }
  0x56   : > { %2498 = vmatpush3.bf16.msra.mxu1 %v2770_v28  ;;  %v2798_v28 = vld [vmem:[%s3271_s1 + $0x1d8] sm:$0xff]   ;;  %v1794_v31 = vor.u32 %v1793_v26, %v1790_v25  ;;  %v903_v34 = vor.u32 %v901_v29, %v899_v11 }
  0x57   : > { %2499 = vmatprep.subr.bf16.mxu1 %v2772_v30 }
  0x58   : > { %2596 = vmatpush3.bf16.msra.mxu0 %v2773_v35 }
  0x59   : > { %2601 = vmatprep.subr.bf16.mxu0 %v2779_v40 }
  0x5a   : > { %2500 = vmatpush3.bf16.msra.mxu1 %v2772_v30  ;;  %v2212_v30 = vcombine.low %v987_v27, %v3040_v42  ;;  %v1795_v42 = vsel %vm673_vm3, %v1785_v15, %v1794_v31 }
  0x5b   : > { %2505 = vmatprep.subr.bf16.mxu1 %v2776_v39  ;;  %2598 = vmatmul.mubr.msk.bf16.vlgmr.msra.gmra.mrb[0].mxu0 %vm295_vm1, %v1577_v46 }
  0x5c   : > { %2602 = vmatpush3.bf16.msra.mxu0 %v2779_v40  ;;  %2609 = vmatprep.mubr.msk.bf16.mxu0 %vm295_vm1, %v1676_v13  ;;  %v1000_v35 = vrot.slane %v2212_v30, 1 }
  0x5d   : > { %2502 = vmatmul.mubr.msk.bf16.vlgmr.msra.gmra.mrb[0].mxu1 %vm295_vm1, %v699_v45  ;;  %2603 = vmatprep.subr.bf16.mxu0 %v2783_v48  ;;  %v2338_v45 = vcombine.low %v3068_v54, %v3183_v9 }
  0x5e   : > { %2506 = vmatpush3.bf16.msra.mxu1 %v2776_v39  ;;  %2513 = vmatprep.mubr.msk.bf16.mxu1 %vm295_vm1, %v2181_v51  ;;  %v2337_v39 = vcombine.low %v3056_v49, %v3059_v50  ;;  %v1002_v40 = vsel %vm445_vm4, %v1000_v35, %v1001_v36  ;;  %v2807_v49 = vld [vmem:[%s3271_s1 + $0xf8] sm:$0xff]  }
  0x5f   : > { %2507 = vmatprep.subr.bf16.mxu1 %v2782_v47  ;;  %v2808_v50 = vld [vmem:[%s3271_s1 + $0x1f8] sm:$0xff]  }
  0x60   : > { %2604 = vmatpush3.bf16.msra.mxu0 %v2783_v48  ;;  %v2345_v48 = vld [vmem:[%s3272_s2] ss:$0 sm:$0xff] }
  0x61   : > { %2605 = vmatprep.subr.bf16.mxu0 %v2785_v55 }
  0x62   : > { %2508 = vmatpush3.bf16.msra.mxu1 %v2782_v47 }
  0x63   : > { %2509 = vmatprep.subr.bf16.mxu1 %v2784_v53 }
  0x64   : > { %2606 = vmatpush3.bf16.msra.mxu0 %v2785_v55 }
  0x65   : > { %2607 = vmatprep.subr.bf16.mxu0 %v2787_v63 }
  0x66   : > { %2510 = vmatpush3.bf16.msra.mxu1 %v2784_v53 }
  0x67   : > { %2511 = vmatprep.subr.bf16.mxu1 %v2786_v60 }
  0x68   : > { %2608 = vmatpush3.bf16.msra.mxu0 %v2787_v63 }
  0x69   : > { %2613 = vmatprep.subr.bf16.mxu0 %v2791_v61 }
  0x6a   : > { %2512 = vmatpush3.bf16.msra.mxu1 %v2786_v60 }
  0x6b   : > { %2517 = vmatprep.subr.bf16.mxu1 %v2789_v8  ;;  %2610 = vmatmul.mubr.msk.bf16.vlgmr.msra.gmra.mrb[0].mxu0 %vm295_vm1, %v1678_v16 }
  0x6c   : > { %2614 = vmatpush3.bf16.msra.mxu0 %v2791_v61  ;;  %2621 = vmatprep.mubr.msk.bf16.mxu0 %vm295_vm1, %v1786_v19 }
  0x6d   : > { %2514 = vmatmul.mubr.msk.bf16.vlgmr.msra.gmra.mrb[0].mxu1 %vm295_vm1, %v2182_v58  ;;  %2615 = vmatprep.subr.bf16.mxu0 %v2794_v43 }
  0x6e   : > { %2518 = vmatpush3.bf16.msra.mxu1 %v2789_v8  ;;  %2525 = vmatprep.mubr.msk.bf16.mxu1 %vm295_vm1, %v900_v12 }
  0x6f   : > { %2519 = vmatprep.subr.bf16.mxu1 %v2793_v18 }
  0x70   : > { %2616 = vmatpush3.bf16.msra.mxu0 %v2794_v43 }
  0x71   : > { %2617 = vmatprep.subr.bf16.mxu0 %v2796_v24 }
  0x72   : > { %2520 = vmatpush3.bf16.msra.mxu1 %v2793_v18 }
  0x73   : > { %2521 = vmatprep.subr.bf16.mxu1 %v2795_v23 }
  0x74   : > { %2618 = vmatpush3.bf16.msra.mxu0 %v2796_v24 }
  0x75   : > { %2619 = vmatprep.subr.bf16.mxu0 %v2798_v28 }
  0x76   : > { %2522 = vmatpush3.bf16.msra.mxu1 %v2795_v23 }
  0x77   : > { %2523 = vmatprep.subr.bf16.mxu1 %v2797_v10 }
  0x78   : > { %2620 = vmatpush3.bf16.msra.mxu0 %v2798_v28 }
  0x79   : > { %2625 = vmatprep.subr.bf16.mxu0 %v2801_v33 }
  0x7a   : > { %2524 = vmatpush3.bf16.msra.mxu1 %v2797_v10 }
  0x7b   : > { %2529 = vmatprep.subr.bf16.mxu1 %v2800_v32  ;;  %2622 = vmatmul.mubr.msk.bf16.vlgmr.msra.gmra.mrb[0].mxu0 %vm295_vm1, %v1795_v42 }
  0x7c   : > { %2626 = vmatpush3.bf16.msra.mxu0 %v2801_v33  ;;  %2633 = vmatprep.mubr.msk.bf16.mxu0 %vm295_vm1, %v2337_v39 }
  0x7d   : > { %2526 = vmatmul.mubr.msk.bf16.vlgmr.msra.gmra.mrb[0].mxu1 %vm295_vm1, %v903_v34  ;;  %2627 = vmatprep.subr.bf16.mxu0 %v2804_v38 }
  0x7e   : > { %2530 = vmatpush3.bf16.msra.mxu1 %v2800_v32  ;;  %2537 = vmatprep.mubr.msk.bf16.mxu1 %vm295_vm1, %v1002_v40 }
  0x7f   : > { %2531 = vmatprep.subr.bf16.mxu1 %v2803_v37 }
  0x80   : > { %2628 = vmatpush3.bf16.msra.mxu0 %v2804_v38 }
  0x81   : > { %2629 = vmatprep.subr.bf16.mxu0 %v2806_v44 }
  0x82   : > { %2532 = vmatpush3.bf16.msra.mxu1 %v2803_v37 }
  0x83   : > { %2533 = vmatprep.subr.bf16.mxu1 %v2805_v22 }
  0x84   : > { %2630 = vmatpush3.bf16.msra.mxu0 %v2806_v44 }
  0x85   : > { %2631 = vmatprep.subr.bf16.mxu0 %v2808_v50 }
  0x86   : > { %2534 = vmatpush3.bf16.msra.mxu1 %v2805_v22 }
  0x87   : > { %2535 = vmatprep.subr.bf16.mxu1 %v2807_v49 }
  0x88   : > { %2632 = vmatpush3.bf16.msra.mxu0 %v2808_v50 }
  0x8a   : > { %2536 = vmatpush3.bf16.msra.mxu1 %v2807_v49 }
  0x8b   : > { %2634 = vmatmul.mubr.msk.bf16.vlgmr.msra.gmra.mrb[0].mxu0 %vm295_vm1, %v2338_v45 }
  0x8d   : > { %2538 = vmatmul.mubr.msk.bf16.vlgmr.msra.gmra.mrb[0].mxu1 %vm295_vm1, %v1001_v36 }
 0x15e   : > { %v2635_v47 = vpop.f32.mrb[0].mxu0 }
 0x15f   : > { %v1954_v52 = vpop.f32.mrb[1].mxu0 }
 0x160   : > { %v2539_v46 = vpop.f32.mrb[0].mxu1  ;;  %v2636_v55 = vpop.f32.mrb[2].mxu0 }
 0x161   : > { %v2637_v51 = vadd.f32 %v2635_v47, %v2539_v46  ;;  %v1067_v13 = vpop.f32.mrb[1].mxu1  ;;  %v1957_v59 = vpop.f32.mrb[3].mxu0 }
 0x162   : > { %v2638_v54 = vadd.f32 %v1954_v52, %v1067_v13  ;;  %v2540_v53 = vpop.f32.mrb[2].mxu1 }
 0x163   : > { %v1982_v41 = vadd.f32 %v2637_v51, %v2345_v48  ;;  %v2639_v56 = vadd.f32 %v2636_v55, %v2540_v53  ;;  %v1070_v57 = vpop.f32.mrb[3].mxu1 }
 0x164   : > { %v1980_v60 = vadd.f32 %v2638_v54, %v2345_v48  ;;  %v2640_v63 = vadd.f32 %v1957_v59, %v1070_v57 }
 0x165   : > { %1986 = vst [vmem:[%s221_s19 + $0x10] sm:$0xff] %v1982_v41  ;;  %v1983_v0 = vadd.f32 %v2639_v56, %v2345_v48 }
 0x166   : > { %1984 = vst [vmem:[%s221_s19] sm:$0xff] %v1980_v60  ;;  %v1981_v1 = vadd.f32 %v2640_v63, %v2345_v48 }
 0x167   : > { %1987 = vst [vmem:[%s221_s19 + $0x18] sm:$0xf] %v1983_v0 }
 0x168   : > { %1985 = vst [vmem:[%s221_s19 + $0x8] sm:$0xff] %v1981_v1 }
 0x169 PF: > { %s13_s14 = sadd.s32 1, %s2834_s14   ;;  %s3274_s12 = smov %s2830_s13 }
 0x16a   : > { %p10_p5 = scmp.ge.s32.totalorder %s13_s14, 4   ;;  %s3275_s13 = smov %s3277_s15 }
 0x16c   :  { %12 = sbr.rel (!%p10_p5) target bundleno = 2 (0x2), region = 83 }

</bundles_post_ra>
